<compile_context>
chip_gen: v6e
topology: v6e:2x2x1
jax: 0.10.0
libtpu: 0.0.40
codegen_flags: <defaults>
</compile_context>

<pallas_src>
import functools
import math

import jax
import jax.numpy as jnp
from jax.experimental import pallas as pl
from jax.experimental.pallas import tpu as pltpu

NUM_HEAD = 4


def _gelu(x):
    # matches the PyTorch gelu used in the module:
    # 0.5 * x * (1 + tanh(sqrt(2/pi) * (x + 0.044715*x^3)))
    return 0.5 * x * (1.0 + jnp.tanh(math.sqrt(2.0 / math.pi)
                                     * (x + 0.044715 * x * x * x)))


def _layernorm(x, gamma, beta, eps=1e-5):
    # gamma/beta are (1, NX); x is (M, NX). Biased variance, eps inside sqrt.
    mean = jnp.mean(x, axis=-1, keepdims=True)
    var = jnp.mean((x - mean) ** 2, axis=-1, keepdims=True)
    return gamma * ((x - mean) * jax.lax.rsqrt(var + eps)) + beta


def block_kernel(x_ref, w_attn_ref, w_proj_ref, w_fc_ref, b_fc_ref, w_p2_ref,
                 vec_ref, o_ref, a_scr, *, num_head):
    BB, T, NX = x_ref.shape
    D = NX // num_head
    M = BB * T

    xb = x_ref[...].reshape(M, NX)                    # (M, NX) f32

    # Packed tiny vectors: rows = b_attn, b_proj, g1, be1, b_p2, g2, be2, pad.
    vecs = vec_ref[...]                               # (8, NX) f32
    b_attn = vecs[0:1, :]
    b_proj = vecs[1:2, :]
    g1 = vecs[2:3, :]
    be1 = vecs[3:4, :]
    b_p2 = vecs[4:5, :]
    g2 = vecs[5:6, :]
    be2 = vecs[6:7, :]

    # --- conv_attn: shared q=k=v projection (bf16 operands, f32 accumulate) --
    c = jnp.dot(xb.astype(jnp.bfloat16), w_attn_ref[...],
                preferred_element_type=jnp.float32) + b_attn      # (M, NX)
    c3 = c.reshape(BB, T, NX)                                     # (BB, T, NX)

    # Causal mask built in-kernel (matches w*b + 1e-9*(1-b) of the reference).
    row = jax.lax.broadcasted_iota(jnp.int32, (T, T), 0)
    col = jax.lax.broadcasted_iota(jnp.int32, (T, T), 1)
    maskf = (col <= row).astype(jnp.float32)                      # (T, T)

    # --- per-head attention, batched over the BB examples -------------------
    for h in range(num_head):
        ch = c3[:, :, h * D:(h + 1) * D]                          # (BB, T, D)
        # scores = ch @ ch^T without materializing a transpose.
        s = jax.lax.dot_general(ch, ch, (((2,), (2,)), ((0,), (0,))),
                                preferred_element_type=jnp.float32)  # (BB,T,T)
        s = s * maskf + 1e-9 * (1.0 - maskf)
        s = s - jnp.max(s, axis=-1, keepdims=True)
        e = jnp.exp(s)
        p = e * pl.reciprocal(jnp.sum(e, axis=-1, keepdims=True), approx=True)
        # attention output for this head -> lane-slice store into scratch slab
        a_scr[:, :, h * D:(h + 1) * D] = jax.lax.dot_general(
            p, ch, (((2,), (1,)), ((0,), (0,))),
            preferred_element_type=jnp.float32)                   # (BB, T, D)

    a = a_scr[...].reshape(M, NX)                                 # (M, NX)

    # --- conv_proj + residual + LayerNorm1 ----------------------------------
    a = jnp.dot(a.astype(jnp.bfloat16), w_proj_ref[...],
                preferred_element_type=jnp.float32) + b_proj
    h1 = _layernorm(a + xb, g1, be1)

    # --- MLP: conv_fc -> gelu -> conv_proj ----------------------------------
    fc = jnp.dot(h1.astype(jnp.bfloat16), w_fc_ref[...],
                 preferred_element_type=jnp.float32) + b_fc_ref[...]  # (M,HID)
    fc = _gelu(fc)
    mlp = jnp.dot(fc.astype(jnp.bfloat16), w_p2_ref[...],
                  preferred_element_type=jnp.float32) + b_p2          # (M, NX)

    # --- residual + LayerNorm2 ----------------------------------------------
    o_ref[...] = _layernorm(h1 + mlp, g2, be2).reshape(BB, T, NX)


def _pick_block_batch(B, T, target_rows=256):
    """Largest divisor of B with BB*T <= target_rows (fills MXU M dimension)."""
    cap = max(1, min(B, target_rows // max(T, 1)))
    for bb in range(cap, 0, -1):
        if B % bb == 0:
            return bb
    return 1


def block_forward(x, params, num_head=NUM_HEAD):
    B, T, NX = x.shape
    HID = params['w_fc'].shape[1]
    BB = _pick_block_batch(B, T)

    # bf16 weights for the four Conv1D matmuls (f32 accumulation in-kernel).
    w_attn = params['w_attn'].astype(jnp.bfloat16)
    w_proj = params['w_proj'].astype(jnp.bfloat16)
    w_fc = params['w_fc'].astype(jnp.bfloat16)
    w_p2 = params['w_p2'].astype(jnp.bfloat16)

    # Pack the seven tiny (1, NX) vectors into one (8, NX) slab (single DMA).
    vecs = jnp.concatenate(
        [params['b_attn'], params['b_proj'], params['g1'], params['be1'],
         params['b_p2'], params['g2'], params['be2'],
         jnp.zeros((1, NX), jnp.float32)], axis=0)                 # (8, NX)

    kernel = functools.partial(block_kernel, num_head=num_head)
    full = lambda shape: pl.BlockSpec(shape, lambda g: (0, 0))

    return pl.pallas_call(
        kernel,
        out_shape=jax.ShapeDtypeStruct((B, T, NX), jnp.float32),
        grid=(B // BB,),
        in_specs=[
            pl.BlockSpec((BB, T, NX), lambda g: (g, 0, 0)),   # x
            full((NX, NX)),                                   # conv_attn W (bf16)
            full((NX, NX)),                                   # conv_proj W (bf16)
            full((NX, HID)),                                  # mlp conv_fc W (bf16)
            full((1, HID)),                                   # mlp conv_fc b
            full((HID, NX)),                                  # mlp conv_p2 W (bf16)
            full((8, NX)),                                    # packed bias/ln slab
        ],
        out_specs=pl.BlockSpec((BB, T, NX), lambda g: (g, 0, 0)),
        scratch_shapes=[pltpu.VMEM((BB, T, NX), jnp.float32)],
        compiler_params=pltpu.CompilerParams(
            dimension_semantics=("parallel",)),
    )(x, w_attn, w_proj, w_fc, params['b_fc'], w_p2, vecs)


# ---------------- pure-JAX reference (mirrors the PyTorch code) ----------------
def ref_block(x, p, num_head=NUM_HEAD):
    B, T, NX = x.shape
    D = NX // num_head

    def ln(z, g, b, eps=1e-5):
        m = z.mean(-1, keepdims=True)
        v = ((z - m) ** 2).mean(-1, keepdims=True)
        return g * (z - m) / jnp.sqrt(v + eps) + b

    c = x @ p['w_attn'] + p['b_attn'][0]
    q = c.reshape(B, T, num_head, D).transpose(0, 2, 1, 3)   # (B,H,T,D)
    k = c.reshape(B, T, num_head, D).transpose(0, 2, 3, 1)   # (B,H,D,T)
    v = q
    w = jnp.matmul(q, k)
    mask = jnp.tril(jnp.ones((T, T), jnp.float32))[None, None]
    w = w * mask + 1e-9 * (1.0 - mask)
    w = jax.nn.softmax(w, axis=-1)
    a = jnp.matmul(w, v).transpose(0, 2, 1, 3).reshape(B, T, NX)
    a = a @ p['w_proj'] + p['b_proj'][0]
    h1 = ln(a + x, p['g1'][0], p['be1'][0])
    fc = h1 @ p['w_fc'] + p['b_fc'][0]
    fc = 0.5 * fc * (1.0 + jnp.tanh(math.sqrt(2.0 / math.pi)
                                    * (fc + 0.044715 * fc ** 3)))
    mlp = fc @ p['w_p2'] + p['b_p2'][0]
    return ln(h1 + mlp, p['g2'][0], p['be2'][0])


if __name__ == "__main__":
    B, T, NX = 16, 8, 32         # batch, n_ctx, embedding_dim (BB*T fills MXU M)
    HID = 4 * NX                 # MLP hidden dim (4 * nx)

    key = jax.random.PRNGKey(0)
    k0, k1, k2, k3, kx = jax.random.split(key, 5)

    # Parameter init mirrors the module's __init__:
    #   Conv1D weights ~ N(0, 0.02), biases = 0; LayerNorm gamma = 1, beta = 0.
    params = dict(
        w_attn=0.02 * jax.random.normal(k0, (NX, NX), jnp.float32),
        b_attn=jnp.zeros((1, NX), jnp.float32),
        w_proj=0.02 * jax.random.normal(k1, (NX, NX), jnp.float32),
        b_proj=jnp.zeros((1, NX), jnp.float32),
        g1=jnp.ones((1, NX), jnp.float32),
        be1=jnp.zeros((1, NX), jnp.float32),
        w_fc=0.02 * jax.random.normal(k2, (NX, HID), jnp.float32),
        b_fc=jnp.zeros((1, HID), jnp.float32),
        w_p2=0.02 * jax.random.normal(k3, (HID, NX), jnp.float32),
        b_p2=jnp.zeros((1, NX), jnp.float32),
        g2=jnp.ones((1, NX), jnp.float32),
        be2=jnp.zeros((1, NX), jnp.float32),
    )

    x = jax.random.normal(kx, (B, T, NX), jnp.float32)

    out = block_forward(x, params)
    out = jax.block_until_ready(out)

    ref = ref_block(x, params)
    assert out.shape == (B, T, NX)
    assert jnp.allclose(out, ref, atol=2e-3, rtol=2e-3), (
        f"max abs err {jnp.max(jnp.abs(out - ref))}")

    print("KERNEL_OK")
</pallas_src>

<mosaic_0001>
module attributes {stable_mosaic.version = 11 : i64} {
  func.func @block_kernel(%arg0: i32, %arg1: memref<16x8x32xf32, #tpu.memory_space<vmem>>, %arg2: memref<32x32xbf16, #tpu.memory_space<vmem>>, %arg3: memref<32x32xbf16, #tpu.memory_space<vmem>>, %arg4: memref<32x128xbf16, #tpu.memory_space<vmem>>, %arg5: memref<1x128xf32, #tpu.memory_space<vmem>>, %arg6: memref<128x32xbf16, #tpu.memory_space<vmem>>, %arg7: memref<8x32xf32, #tpu.memory_space<vmem>>, %arg8: memref<16x8x32xf32, #tpu.memory_space<vmem>>, %arg9: memref<16x8x32xf32, #tpu.memory_space<vmem>>) attributes {dimension_semantics = [#tpu.dimension_semantics<parallel>], iteration_bounds = array<i64: 1>, scalar_prefetch = 0 : i64, scratch_operands = 1 : i64, tpu.core_type = #tpu.core_type<tc>, window_params = [{transform_indices = @transform_0, window_bounds = array<i64: 16, 8, 32>}, {pipeline_mode = #tpu.pipeline_mode<synchronous>, transform_indices = @transform_1, window_bounds = array<i64: 32, 32>}, {pipeline_mode = #tpu.pipeline_mode<synchronous>, transform_indices = @transform_2, window_bounds = array<i64: 32, 32>}, {pipeline_mode = #tpu.pipeline_mode<synchronous>, transform_indices = @transform_3, window_bounds = array<i64: 32, 128>}, {pipeline_mode = #tpu.pipeline_mode<synchronous>, transform_indices = @transform_4, window_bounds = array<i64: 1, 128>}, {pipeline_mode = #tpu.pipeline_mode<synchronous>, transform_indices = @transform_5, window_bounds = array<i64: 128, 32>}, {pipeline_mode = #tpu.pipeline_mode<synchronous>, transform_indices = @transform_6, window_bounds = array<i64: 8, 32>}, {transform_indices = @transform_7, window_bounds = array<i64: 16, 8, 32>}]} {
    %c0 = arith.constant 0 : index
    %c0_0 = arith.constant 0 : index
    %c0_1 = arith.constant 0 : index
    %0 = vector.load %arg1[%c0, %c0_0, %c0_1] : memref<16x8x32xf32, #tpu.memory_space<vmem>>, vector<16x8x32xf32>
    %1 = vector.shape_cast %0 : vector<16x8x32xf32> to vector<128x32xf32>
    %c0_2 = arith.constant 0 : index
    %c0_3 = arith.constant 0 : index
    %2 = vector.load %arg7[%c0_2, %c0_3] : memref<8x32xf32, #tpu.memory_space<vmem>>, vector<8x32xf32>
    %3 = vector.extract_strided_slice %2 {offsets = [0, 0], sizes = [1, 32], strides = [1, 1]} : vector<8x32xf32> to vector<1x32xf32>
    %4 = vector.extract_strided_slice %2 {offsets = [1, 0], sizes = [1, 32], strides = [1, 1]} : vector<8x32xf32> to vector<1x32xf32>
    %5 = vector.extract_strided_slice %2 {offsets = [2, 0], sizes = [1, 32], strides = [1, 1]} : vector<8x32xf32> to vector<1x32xf32>
    %6 = vector.extract_strided_slice %2 {offsets = [3, 0], sizes = [1, 32], strides = [1, 1]} : vector<8x32xf32> to vector<1x32xf32>
    %7 = vector.extract_strided_slice %2 {offsets = [4, 0], sizes = [1, 32], strides = [1, 1]} : vector<8x32xf32> to vector<1x32xf32>
    %8 = vector.extract_strided_slice %2 {offsets = [5, 0], sizes = [1, 32], strides = [1, 1]} : vector<8x32xf32> to vector<1x32xf32>
    %9 = vector.extract_strided_slice %2 {offsets = [6, 0], sizes = [1, 32], strides = [1, 1]} : vector<8x32xf32> to vector<1x32xf32>
    %10 = arith.truncf %1 : vector<128x32xf32> to vector<128x32xbf16>
    %c0_4 = arith.constant 0 : index
    %c0_5 = arith.constant 0 : index
    %11 = vector.load %arg2[%c0_4, %c0_5] : memref<32x32xbf16, #tpu.memory_space<vmem>>, vector<32x32xbf16>
    %cst = arith.constant dense<0.000000e+00> : vector<128x32xf32>
    %12 = tpu.matmul %10, %11, %cst {dimension_numbers = #tpu.dot_dimension_numbers<[1], [0], [0], [1], [0, 0, 1, 1], [], []>} : vector<128x32xbf16>, vector<32x32xbf16>, vector<128x32xf32> -> vector<128x32xf32>
    %13 = vector.broadcast %3 : vector<1x32xf32> to vector<128x32xf32>
    %14 = arith.addf %12, %13 : vector<128x32xf32>
    %15 = vector.shape_cast %14 : vector<128x32xf32> to vector<16x8x32xf32>
    %16 = tpu.iota {dimensions = array<i32: 0>} : vector<8x8xi32>
    %17 = tpu.iota {dimensions = array<i32: 1>} : vector<8x8xi32>
    %18 = arith.cmpi sle, %17, %16 : vector<8x8xi32>
    %19 = arith.extui %18 : vector<8x8xi1> to vector<8x8xi32>
    %20 = arith.sitofp %19 : vector<8x8xi32> to vector<8x8xf32>
    %21 = vector.extract_strided_slice %15 {offsets = [0, 0, 0], sizes = [16, 8, 8], strides = [1, 1, 1]} : vector<16x8x32xf32> to vector<16x8x8xf32>
    %cst_6 = arith.constant dense<0.000000e+00> : vector<16x8x8xf32>
    %22 = tpu.matmul %21, %21, %cst_6 {dimension_numbers = #tpu.dot_dimension_numbers<[2], [2], [1], [1], [0, 0, 0, 1, 1, 1], [0], [0]>} : vector<16x8x8xf32>, vector<16x8x8xf32>, vector<16x8x8xf32> -> vector<16x8x8xf32>
    %23 = vector.shape_cast %20 : vector<8x8xf32> to vector<1x8x8xf32>
    %24 = vector.broadcast %23 : vector<1x8x8xf32> to vector<16x8x8xf32>
    %25 = arith.mulf %22, %24 : vector<16x8x8xf32>
    %cst_7 = arith.constant 1.000000e+00 : f32
    %26 = vector.broadcast %cst_7 : f32 to vector<8x8xf32>
    %27 = arith.subf %26, %20 : vector<8x8xf32>
    %cst_8 = arith.constant 9.99999971E-10 : f32
    %28 = vector.broadcast %cst_8 : f32 to vector<8x8xf32>
    %29 = arith.mulf %28, %27 : vector<8x8xf32>
    %30 = vector.shape_cast %29 : vector<8x8xf32> to vector<1x8x8xf32>
    %31 = vector.broadcast %30 : vector<1x8x8xf32> to vector<16x8x8xf32>
    %32 = arith.addf %25, %31 : vector<16x8x8xf32>
    %cst_9 = arith.constant dense<0xFF800000> : vector<16x8xf32>
    %33 = vector.multi_reduction <maximumf>, %32, %cst_9 [2] : vector<16x8x8xf32> to vector<16x8xf32>
    %34 = vector.shape_cast %33 : vector<16x8xf32> to vector<16x8x1xf32>
    %35 = vector.broadcast %34 : vector<16x8x1xf32> to vector<16x8x8xf32>
    %36 = arith.subf %32, %35 : vector<16x8x8xf32>
    %37 = math.exp %36 : vector<16x8x8xf32>
    %cst_10 = arith.constant dense<0.000000e+00> : vector<16x8xf32>
    %38 = vector.multi_reduction <add>, %37, %cst_10 [2] : vector<16x8x8xf32> to vector<16x8xf32>
    %39 = vector.shape_cast %38 : vector<16x8xf32> to vector<16x8x1xf32>
    %40 = tpu.reciprocal %39 {approx = true} : vector<16x8x1xf32> -> vector<16x8x1xf32>
    %41 = vector.broadcast %40 : vector<16x8x1xf32> to vector<16x8x8xf32>
    %42 = arith.mulf %37, %41 : vector<16x8x8xf32>
    %cst_11 = arith.constant dense<0.000000e+00> : vector<16x8x8xf32>
    %43 = tpu.matmul %42, %21, %cst_11 {dimension_numbers = #tpu.dot_dimension_numbers<[2], [1], [1], [2], [0, 0, 0, 1, 1, 2], [0], [0]>} : vector<16x8x8xf32>, vector<16x8x8xf32>, vector<16x8x8xf32> -> vector<16x8x8xf32>
    %c0_12 = arith.constant 0 : index
    %c0_13 = arith.constant 0 : index
    %c0_14 = arith.constant 0 : index
    %44 = vector.load %arg9[%c0_12, %c0_13, %c0_14] : memref<16x8x32xf32, #tpu.memory_space<vmem>>, vector<16x8x8xf32>
    tpu.vector_store %arg9[%c0_12, %c0_13, %c0_14], %43 {strides = array<i32>} : memref<16x8x32xf32, #tpu.memory_space<vmem>>, vector<16x8x8xf32>,
    %45 = vector.extract_strided_slice %15 {offsets = [0, 0, 8], sizes = [16, 8, 8], strides = [1, 1, 1]} : vector<16x8x32xf32> to vector<16x8x8xf32>
    %cst_15 = arith.constant dense<0.000000e+00> : vector<16x8x8xf32>
    %46 = tpu.matmul %45, %45, %cst_15 {dimension_numbers = #tpu.dot_dimension_numbers<[2], [2], [1], [1], [0, 0, 0, 1, 1, 1], [0], [0]>} : vector<16x8x8xf32>, vector<16x8x8xf32>, vector<16x8x8xf32> -> vector<16x8x8xf32>
    %47 = vector.shape_cast %20 : vector<8x8xf32> to vector<1x8x8xf32>
    %48 = vector.broadcast %47 : vector<1x8x8xf32> to vector<16x8x8xf32>
    %49 = arith.mulf %46, %48 : vector<16x8x8xf32>
    %cst_16 = arith.constant 1.000000e+00 : f32
    %50 = vector.broadcast %cst_16 : f32 to vector<8x8xf32>
    %51 = arith.subf %50, %20 : vector<8x8xf32>
    %cst_17 = arith.constant 9.99999971E-10 : f32
    %52 = vector.broadcast %cst_17 : f32 to vector<8x8xf32>
    %53 = arith.mulf %52, %51 : vector<8x8xf32>
    %54 = vector.shape_cast %53 : vector<8x8xf32> to vector<1x8x8xf32>
    %55 = vector.broadcast %54 : vector<1x8x8xf32> to vector<16x8x8xf32>
    %56 = arith.addf %49, %55 : vector<16x8x8xf32>
    %cst_18 = arith.constant dense<0xFF800000> : vector<16x8xf32>
    %57 = vector.multi_reduction <maximumf>, %56, %cst_18 [2] : vector<16x8x8xf32> to vector<16x8xf32>
    %58 = vector.shape_cast %57 : vector<16x8xf32> to vector<16x8x1xf32>
    %59 = vector.broadcast %58 : vector<16x8x1xf32> to vector<16x8x8xf32>
    %60 = arith.subf %56, %59 : vector<16x8x8xf32>
    %61 = math.exp %60 : vector<16x8x8xf32>
    %cst_19 = arith.constant dense<0.000000e+00> : vector<16x8xf32>
    %62 = vector.multi_reduction <add>, %61, %cst_19 [2] : vector<16x8x8xf32> to vector<16x8xf32>
    %63 = vector.shape_cast %62 : vector<16x8xf32> to vector<16x8x1xf32>
    %64 = tpu.reciprocal %63 {approx = true} : vector<16x8x1xf32> -> vector<16x8x1xf32>
    %65 = vector.broadcast %64 : vector<16x8x1xf32> to vector<16x8x8xf32>
    %66 = arith.mulf %61, %65 : vector<16x8x8xf32>
    %cst_20 = arith.constant dense<0.000000e+00> : vector<16x8x8xf32>
    %67 = tpu.matmul %66, %45, %cst_20 {dimension_numbers = #tpu.dot_dimension_numbers<[2], [1], [1], [2], [0, 0, 0, 1, 1, 2], [0], [0]>} : vector<16x8x8xf32>, vector<16x8x8xf32>, vector<16x8x8xf32> -> vector<16x8x8xf32>
    %c0_21 = arith.constant 0 : index
    %c0_22 = arith.constant 0 : index
    %c8 = arith.constant 8 : index
    %68 = vector.load %arg9[%c0_21, %c0_22, %c8] : memref<16x8x32xf32, #tpu.memory_space<vmem>>, vector<16x8x8xf32>
    tpu.vector_store %arg9[%c0_21, %c0_22, %c8], %67 {strides = array<i32>} : memref<16x8x32xf32, #tpu.memory_space<vmem>>, vector<16x8x8xf32>,
    %69 = vector.extract_strided_slice %15 {offsets = [0, 0, 16], sizes = [16, 8, 8], strides = [1, 1, 1]} : vector<16x8x32xf32> to vector<16x8x8xf32>
    %cst_23 = arith.constant dense<0.000000e+00> : vector<16x8x8xf32>
    %70 = tpu.matmul %69, %69, %cst_23 {dimension_numbers = #tpu.dot_dimension_numbers<[2], [2], [1], [1], [0, 0, 0, 1, 1, 1], [0], [0]>} : vector<16x8x8xf32>, vector<16x8x8xf32>, vector<16x8x8xf32> -> vector<16x8x8xf32>
    %71 = vector.shape_cast %20 : vector<8x8xf32> to vector<1x8x8xf32>
    %72 = vector.broadcast %71 : vector<1x8x8xf32> to vector<16x8x8xf32>
    %73 = arith.mulf %70, %72 : vector<16x8x8xf32>
    %cst_24 = arith.constant 1.000000e+00 : f32
    %74 = vector.broadcast %cst_24 : f32 to vector<8x8xf32>
    %75 = arith.subf %74, %20 : vector<8x8xf32>
    %cst_25 = arith.constant 9.99999971E-10 : f32
    %76 = vector.broadcast %cst_25 : f32 to vector<8x8xf32>
    %77 = arith.mulf %76, %75 : vector<8x8xf32>
    %78 = vector.shape_cast %77 : vector<8x8xf32> to vector<1x8x8xf32>
    %79 = vector.broadcast %78 : vector<1x8x8xf32> to vector<16x8x8xf32>
    %80 = arith.addf %73, %79 : vector<16x8x8xf32>
    %cst_26 = arith.constant dense<0xFF800000> : vector<16x8xf32>
    %81 = vector.multi_reduction <maximumf>, %80, %cst_26 [2] : vector<16x8x8xf32> to vector<16x8xf32>
    %82 = vector.shape_cast %81 : vector<16x8xf32> to vector<16x8x1xf32>
    %83 = vector.broadcast %82 : vector<16x8x1xf32> to vector<16x8x8xf32>
    %84 = arith.subf %80, %83 : vector<16x8x8xf32>
    %85 = math.exp %84 : vector<16x8x8xf32>
    %cst_27 = arith.constant dense<0.000000e+00> : vector<16x8xf32>
    %86 = vector.multi_reduction <add>, %85, %cst_27 [2] : vector<16x8x8xf32> to vector<16x8xf32>
    %87 = vector.shape_cast %86 : vector<16x8xf32> to vector<16x8x1xf32>
    %88 = tpu.reciprocal %87 {approx = true} : vector<16x8x1xf32> -> vector<16x8x1xf32>
    %89 = vector.broadcast %88 : vector<16x8x1xf32> to vector<16x8x8xf32>
    %90 = arith.mulf %85, %89 : vector<16x8x8xf32>
    %cst_28 = arith.constant dense<0.000000e+00> : vector<16x8x8xf32>
    %91 = tpu.matmul %90, %69, %cst_28 {dimension_numbers = #tpu.dot_dimension_numbers<[2], [1], [1], [2], [0, 0, 0, 1, 1, 2], [0], [0]>} : vector<16x8x8xf32>, vector<16x8x8xf32>, vector<16x8x8xf32> -> vector<16x8x8xf32>
    %c0_29 = arith.constant 0 : index
    %c0_30 = arith.constant 0 : index
    %c16 = arith.constant 16 : index
    %92 = vector.load %arg9[%c0_29, %c0_30, %c16] : memref<16x8x32xf32, #tpu.memory_space<vmem>>, vector<16x8x8xf32>
    tpu.vector_store %arg9[%c0_29, %c0_30, %c16], %91 {strides = array<i32>} : memref<16x8x32xf32, #tpu.memory_space<vmem>>, vector<16x8x8xf32>,
    %93 = vector.extract_strided_slice %15 {offsets = [0, 0, 24], sizes = [16, 8, 8], strides = [1, 1, 1]} : vector<16x8x32xf32> to vector<16x8x8xf32>
    %cst_31 = arith.constant dense<0.000000e+00> : vector<16x8x8xf32>
    %94 = tpu.matmul %93, %93, %cst_31 {dimension_numbers = #tpu.dot_dimension_numbers<[2], [2], [1], [1], [0, 0, 0, 1, 1, 1], [0], [0]>} : vector<16x8x8xf32>, vector<16x8x8xf32>, vector<16x8x8xf32> -> vector<16x8x8xf32>
    %95 = vector.shape_cast %20 : vector<8x8xf32> to vector<1x8x8xf32>
    %96 = vector.broadcast %95 : vector<1x8x8xf32> to vector<16x8x8xf32>
    %97 = arith.mulf %94, %96 : vector<16x8x8xf32>
    %cst_32 = arith.constant 1.000000e+00 : f32
    %98 = vector.broadcast %cst_32 : f32 to vector<8x8xf32>
    %99 = arith.subf %98, %20 : vector<8x8xf32>
    %cst_33 = arith.constant 9.99999971E-10 : f32
    %100 = vector.broadcast %cst_33 : f32 to vector<8x8xf32>
    %101 = arith.mulf %100, %99 : vector<8x8xf32>
    %102 = vector.shape_cast %101 : vector<8x8xf32> to vector<1x8x8xf32>
    %103 = vector.broadcast %102 : vector<1x8x8xf32> to vector<16x8x8xf32>
    %104 = arith.addf %97, %103 : vector<16x8x8xf32>
    %cst_34 = arith.constant dense<0xFF800000> : vector<16x8xf32>
    %105 = vector.multi_reduction <maximumf>, %104, %cst_34 [2] : vector<16x8x8xf32> to vector<16x8xf32>
    %106 = vector.shape_cast %105 : vector<16x8xf32> to vector<16x8x1xf32>
    %107 = vector.broadcast %106 : vector<16x8x1xf32> to vector<16x8x8xf32>
    %108 = arith.subf %104, %107 : vector<16x8x8xf32>
    %109 = math.exp %108 : vector<16x8x8xf32>
    %cst_35 = arith.constant dense<0.000000e+00> : vector<16x8xf32>
    %110 = vector.multi_reduction <add>, %109, %cst_35 [2] : vector<16x8x8xf32> to vector<16x8xf32>
    %111 = vector.shape_cast %110 : vector<16x8xf32> to vector<16x8x1xf32>
    %112 = tpu.reciprocal %111 {approx = true} : vector<16x8x1xf32> -> vector<16x8x1xf32>
    %113 = vector.broadcast %112 : vector<16x8x1xf32> to vector<16x8x8xf32>
    %114 = arith.mulf %109, %113 : vector<16x8x8xf32>
    %cst_36 = arith.constant dense<0.000000e+00> : vector<16x8x8xf32>
    %115 = tpu.matmul %114, %93, %cst_36 {dimension_numbers = #tpu.dot_dimension_numbers<[2], [1], [1], [2], [0, 0, 0, 1, 1, 2], [0], [0]>} : vector<16x8x8xf32>, vector<16x8x8xf32>, vector<16x8x8xf32> -> vector<16x8x8xf32>
    %c0_37 = arith.constant 0 : index
    %c0_38 = arith.constant 0 : index
    %c24 = arith.constant 24 : index
    %116 = vector.load %arg9[%c0_37, %c0_38, %c24] : memref<16x8x32xf32, #tpu.memory_space<vmem>>, vector<16x8x8xf32>
    tpu.vector_store %arg9[%c0_37, %c0_38, %c24], %115 {strides = array<i32>} : memref<16x8x32xf32, #tpu.memory_space<vmem>>, vector<16x8x8xf32>,
    %c0_39 = arith.constant 0 : index
    %c0_40 = arith.constant 0 : index
    %c0_41 = arith.constant 0 : index
    %117 = vector.load %arg9[%c0_39, %c0_40, %c0_41] : memref<16x8x32xf32, #tpu.memory_space<vmem>>, vector<16x8x32xf32>
    %118 = vector.shape_cast %117 : vector<16x8x32xf32> to vector<128x32xf32>
    %119 = arith.truncf %118 : vector<128x32xf32> to vector<128x32xbf16>
    %c0_42 = arith.constant 0 : index
    %c0_43 = arith.constant 0 : index
    %120 = vector.load %arg3[%c0_42, %c0_43] : memref<32x32xbf16, #tpu.memory_space<vmem>>, vector<32x32xbf16>
    %cst_44 = arith.constant dense<0.000000e+00> : vector<128x32xf32>
    %121 = tpu.matmul %119, %120, %cst_44 {dimension_numbers = #tpu.dot_dimension_numbers<[1], [0], [0], [1], [0, 0, 1, 1], [], []>} : vector<128x32xbf16>, vector<32x32xbf16>, vector<128x32xf32> -> vector<128x32xf32>
    %122 = vector.broadcast %4 : vector<1x32xf32> to vector<128x32xf32>
    %123 = arith.addf %121, %122 : vector<128x32xf32>
    %124 = arith.addf %123, %1 : vector<128x32xf32>
    %cst_45 = arith.constant dense<0.000000e+00> : vector<128xf32>
    %125 = vector.multi_reduction <add>, %124, %cst_45 [1] : vector<128x32xf32> to vector<128xf32>
    %126 = vector.shape_cast %125 : vector<128xf32> to vector<128x1xf32>
    %cst_46 = arith.constant 3.200000e+01 : f32
    %127 = vector.broadcast %cst_46 : f32 to vector<128x1xf32>
    %128 = arith.divf %126, %127 : vector<128x1xf32>
    %129 = vector.broadcast %128 : vector<128x1xf32> to vector<128x32xf32>
    %130 = arith.subf %124, %129 : vector<128x32xf32>
    %131 = arith.mulf %130, %130 : vector<128x32xf32>
    %cst_47 = arith.constant dense<0.000000e+00> : vector<128xf32>
    %132 = vector.multi_reduction <add>, %131, %cst_47 [1] : vector<128x32xf32> to vector<128xf32>
    %133 = vector.shape_cast %132 : vector<128xf32> to vector<128x1xf32>
    %cst_48 = arith.constant 3.200000e+01 : f32
    %134 = vector.broadcast %cst_48 : f32 to vector<128x1xf32>
    %135 = arith.divf %133, %134 : vector<128x1xf32>
    %136 = vector.broadcast %128 : vector<128x1xf32> to vector<128x32xf32>
    %137 = arith.subf %124, %136 : vector<128x32xf32>
    %cst_49 = arith.constant 9.99999974E-6 : f32
    %138 = vector.broadcast %cst_49 : f32 to vector<128x1xf32>
    %139 = arith.addf %135, %138 : vector<128x1xf32>
    %140 = math.rsqrt %139 : vector<128x1xf32>
    %141 = vector.broadcast %140 : vector<128x1xf32> to vector<128x32xf32>
    %142 = arith.mulf %137, %141 : vector<128x32xf32>
    %143 = vector.broadcast %5 : vector<1x32xf32> to vector<128x32xf32>
    %144 = arith.mulf %143, %142 : vector<128x32xf32>
    %145 = vector.broadcast %6 : vector<1x32xf32> to vector<128x32xf32>
    %146 = arith.addf %144, %145 : vector<128x32xf32>
    %147 = arith.truncf %146 : vector<128x32xf32> to vector<128x32xbf16>
    %c0_50 = arith.constant 0 : index
    %c0_51 = arith.constant 0 : index
    %148 = vector.load %arg4[%c0_50, %c0_51] : memref<32x128xbf16, #tpu.memory_space<vmem>>, vector<32x128xbf16>
    %cst_52 = arith.constant dense<0.000000e+00> : vector<128x128xf32>
    %149 = tpu.matmul %147, %148, %cst_52 {dimension_numbers = #tpu.dot_dimension_numbers<[1], [0], [0], [1], [0, 0, 1, 1], [], []>} : vector<128x32xbf16>, vector<32x128xbf16>, vector<128x128xf32> -> vector<128x128xf32>
    %c0_53 = arith.constant 0 : index
    %c0_54 = arith.constant 0 : index
    %150 = vector.load %arg5[%c0_53, %c0_54] : memref<1x128xf32, #tpu.memory_space<vmem>>, vector<1x128xf32>
    %151 = vector.broadcast %150 : vector<1x128xf32> to vector<128x128xf32>
    %152 = arith.addf %149, %151 : vector<128x128xf32>
    %cst_55 = arith.constant 5.000000e-01 : f32
    %153 = vector.broadcast %cst_55 : f32 to vector<128x128xf32>
    %154 = arith.mulf %153, %152 : vector<128x128xf32>
    %cst_56 = arith.constant 4.471500e-02 : f32
    %155 = vector.broadcast %cst_56 : f32 to vector<128x128xf32>
    %156 = arith.mulf %155, %152 : vector<128x128xf32>
    %157 = arith.mulf %156, %152 : vector<128x128xf32>
    %158 = arith.mulf %157, %152 : vector<128x128xf32>
    %159 = arith.addf %152, %158 : vector<128x128xf32>
    %cst_57 = arith.constant 0.797884583 : f32
    %160 = vector.broadcast %cst_57 : f32 to vector<128x128xf32>
    %161 = arith.mulf %160, %159 : vector<128x128xf32>
    %162 = math.tanh %161 : vector<128x128xf32>
    %cst_58 = arith.constant 1.000000e+00 : f32
    %163 = vector.broadcast %cst_58 : f32 to vector<128x128xf32>
    %164 = arith.addf %163, %162 : vector<128x128xf32>
    %165 = arith.mulf %154, %164 : vector<128x128xf32>
    %166 = arith.truncf %165 : vector<128x128xf32> to vector<128x128xbf16>
    %c0_59 = arith.constant 0 : index
    %c0_60 = arith.constant 0 : index
    %167 = vector.load %arg6[%c0_59, %c0_60] : memref<128x32xbf16, #tpu.memory_space<vmem>>, vector<128x32xbf16>
    %cst_61 = arith.constant dense<0.000000e+00> : vector<128x32xf32>
    %168 = tpu.matmul %166, %167, %cst_61 {dimension_numbers = #tpu.dot_dimension_numbers<[1], [0], [0], [1], [0, 0, 1, 1], [], []>} : vector<128x128xbf16>, vector<128x32xbf16>, vector<128x32xf32> -> vector<128x32xf32>
    %169 = vector.broadcast %7 : vector<1x32xf32> to vector<128x32xf32>
    %170 = arith.addf %168, %169 : vector<128x32xf32>
    %171 = arith.addf %146, %170 : vector<128x32xf32>
    %cst_62 = arith.constant dense<0.000000e+00> : vector<128xf32>
    %172 = vector.multi_reduction <add>, %171, %cst_62 [1] : vector<128x32xf32> to vector<128xf32>
    %173 = vector.shape_cast %172 : vector<128xf32> to vector<128x1xf32>
    %cst_63 = arith.constant 3.200000e+01 : f32
    %174 = vector.broadcast %cst_63 : f32 to vector<128x1xf32>
    %175 = arith.divf %173, %174 : vector<128x1xf32>
    %176 = vector.broadcast %175 : vector<128x1xf32> to vector<128x32xf32>
    %177 = arith.subf %171, %176 : vector<128x32xf32>
    %178 = arith.mulf %177, %177 : vector<128x32xf32>
    %cst_64 = arith.constant dense<0.000000e+00> : vector<128xf32>
    %179 = vector.multi_reduction <add>, %178, %cst_64 [1] : vector<128x32xf32> to vector<128xf32>
    %180 = vector.shape_cast %179 : vector<128xf32> to vector<128x1xf32>
    %cst_65 = arith.constant 3.200000e+01 : f32
    %181 = vector.broadcast %cst_65 : f32 to vector<128x1xf32>
    %182 = arith.divf %180, %181 : vector<128x1xf32>
    %183 = vector.broadcast %175 : vector<128x1xf32> to vector<128x32xf32>
    %184 = arith.subf %171, %183 : vector<128x32xf32>
    %cst_66 = arith.constant 9.99999974E-6 : f32
    %185 = vector.broadcast %cst_66 : f32 to vector<128x1xf32>
    %186 = arith.addf %182, %185 : vector<128x1xf32>
    %187 = math.rsqrt %186 : vector<128x1xf32>
    %188 = vector.broadcast %187 : vector<128x1xf32> to vector<128x32xf32>
    %189 = arith.mulf %184, %188 : vector<128x32xf32>
    %190 = vector.broadcast %8 : vector<1x32xf32> to vector<128x32xf32>
    %191 = arith.mulf %190, %189 : vector<128x32xf32>
    %192 = vector.broadcast %9 : vector<1x32xf32> to vector<128x32xf32>
    %193 = arith.addf %191, %192 : vector<128x32xf32>
    %194 = vector.shape_cast %193 : vector<128x32xf32> to vector<16x8x32xf32>
    %c0_67 = arith.constant 0 : index
    %c0_68 = arith.constant 0 : index
    %c0_69 = arith.constant 0 : index
    %195 = vector.load %arg8[%c0_67, %c0_68, %c0_69] : memref<16x8x32xf32, #tpu.memory_space<vmem>>, vector<16x8x32xf32>
    tpu.vector_store %arg8[%c0_67, %c0_68, %c0_69], %194 {strides = array<i32>} : memref<16x8x32xf32, #tpu.memory_space<vmem>>, vector<16x8x32xf32>,
    return
  }
  func.func @transform_0(%arg0: i32) -> (i32, i32, i32) {
    %c0_i32 = arith.constant 0 : i32
    %c0_i32_0 = arith.constant 0 : i32
    %c0_i32_1 = arith.constant 0 : i32
    return %arg0, %c0_i32, %c0_i32_0 : i32, i32, i32
  }
  func.func @transform_1(%arg0: i32) -> (i32, i32) {
    %c0_i32 = arith.constant 0 : i32
    %c0_i32_0 = arith.constant 0 : i32
    %c0_i32_1 = arith.constant 0 : i32
    return %c0_i32, %c0_i32_0 : i32, i32
  }
  func.func @transform_2(%arg0: i32) -> (i32, i32) {
    %c0_i32 = arith.constant 0 : i32
    %c0_i32_0 = arith.constant 0 : i32
    %c0_i32_1 = arith.constant 0 : i32
    return %c0_i32, %c0_i32_0 : i32, i32
  }
  func.func @transform_3(%arg0: i32) -> (i32, i32) {
    %c0_i32 = arith.constant 0 : i32
    %c0_i32_0 = arith.constant 0 : i32
    %c0_i32_1 = arith.constant 0 : i32
    return %c0_i32, %c0_i32_0 : i32, i32
  }
  func.func @transform_4(%arg0: i32) -> (i32, i32) {
    %c0_i32 = arith.constant 0 : i32
    %c0_i32_0 = arith.constant 0 : i32
    %c0_i32_1 = arith.constant 0 : i32
    return %c0_i32, %c0_i32_0 : i32, i32
  }
  func.func @transform_5(%arg0: i32) -> (i32, i32) {
    %c0_i32 = arith.constant 0 : i32
    %c0_i32_0 = arith.constant 0 : i32
    %c0_i32_1 = arith.constant 0 : i32
    return %c0_i32, %c0_i32_0 : i32, i32
  }
  func.func @transform_6(%arg0: i32) -> (i32, i32) {
    %c0_i32 = arith.constant 0 : i32
    %c0_i32_0 = arith.constant 0 : i32
    %c0_i32_1 = arith.constant 0 : i32
    return %c0_i32, %c0_i32_0 : i32, i32
  }
  func.func @transform_7(%arg0: i32) -> (i32, i32, i32) {
    %c0_i32 = arith.constant 0 : i32
    %c0_i32_0 = arith.constant 0 : i32
    %c0_i32_1 = arith.constant 0 : i32
    return %arg0, %c0_i32, %c0_i32_0 : i32, i32, i32
  }
}

</mosaic_0001>

<bundles_post_ra>
// kernel: tpu_custom_call.1
= control target key start
LH: loop header
LB: loop body
LE: loop exit
PB: predicated region body
PF: predicated region fallthrough
CT: control target
= control target key end

     0   :  { %12 = vsyncpa [#allocation4], 0  ;;  %s16453_s0 = inlined_call_operand.hbm [shape: f32[16,8,32], index: 0, kind: input, shape index: {}]   ;;  %s16454_s1 = inlined_call_operand.vmem [shape: bf16[32,32], index: 1, kind: input, shape index: {}]   ;;  %s16455_s2 = inlined_call_operand.vmem [shape: bf16[32,32], index: 2, kind: input, shape index: {}]   ;;  %s16456_s3 = inlined_call_operand.vmem [shape: bf16[32,128], index: 3, kind: input, shape index: {}]   ;;  %s16457_s4 = inlined_call_operand.vmem [shape: f32[1,128], index: 4, kind: input, shape index: {}]   ;;  %s16458_s5 = inlined_call_operand.vmem [shape: bf16[128,32], index: 5, kind: input, shape index: {}]   ;;  %s16459_s6 = inlined_call_operand.vmem [shape: f32[8,32], index: 6, kind: input, shape index: {}]   ;;  %s16460_s7 = inlined_call_operand.hbm [shape: f32[16,8,32], index: 7, kind: output, shape index: {}]  }
   0x1   :  { %13 = vsyncpa [#allocation5], 0  ;;  %s13667_s24 = smov [#allocation3]  }
   0x2   :  { %s19_s25 = sshll.u32 %s13667_s24, 4  ;;  %s20_s25 = int_to_ptr.vmem [resolvable:$true] %s19_s25 }
   0x3   :  { %s13631_s26 = scalar_lea.vmem %s20_s25, 2048  ;;  %p13636_p1 = scmp.lt.s32.totalorder %s20_s25, %s20_s25 }
   0x4   :  { %p13632_p0 = scmp.ne.s32.totalorder %s20_s25, %s13631_s26  ;;  %p13637_p2 = scmp.lt.s32.totalorder %s13631_s26, %s13631_s26 }
   0x6   :  { %p13638_p3 = por %p13637_p2, %p13636_p1 }
   0x8   :  { %p13639_p4 = pnand %p13638_p3, %p13632_p0 }
   0xa   :  { %13642 = shalt.err (!%p13639_p4)
}
   0xb   :  { %s13668_s27 = smov 128   ;;  %s13669_s28 = smov 8  }
   0xc   :  { %25 = dma.hbm_to_vmem [thread:$0]  %s16453_s0, 2048, %s20_s25, [#allocation4], %s13668_s27, %s13668_s27, %s13669_s28  }
   0xd   :  { %13663 = dma.done.wait [#allocation4], 2048  }
   0xe   :  { %13664 = vsyncadd [#allocation4], 4294965248  ;;  %v13239_v0 = vld [vmem:[%s16454_s1 + $0x8] sm:$0xff]   ;;  %v13240_v1 = vld [vmem:[%s16454_s1] sm:$0xff]   ;;  %vm87_vm0 = vcmask 261120   ;;  %v16461_v26 = vmov 0.0   ;;  %v71_v27 = vlaneseq }
   0xf   :  { %12480 = vmatprep.subr.bf16.mxu0 %v13239_v0  ;;  %v42_v2 = vld [vmem:[#allocation3] sm:$0xff]  ;;  %v43_v3 = vld [vmem:[#allocation3 + $0x8] sm:$0xff]  ;;  %v44_v5 = vld [vmem:[#allocation3 + $0x10] sm:$0xff]  ;;  %12505 = vmatprep.subr.mxu1 %v16461_v26  ;;  %vm13671_vm1 = vmmov 0   ;;  %vm216_vm2 = vcmask 64512   ;;  %s13672_s12 = smov 120  }
  0x10   :  { %12481 = vmatpush3.bf16.msra.mxu0 %v13239_v0  ;;  %v59_v4 = vpack.c.bf16 %v43_v3, %v42_v2  ;;  %v45_v6 = vld [vmem:[#allocation3 + $0x18] sm:$0xff]  ;;  %v46_v7 = vld [vmem:[#allocation3 + $0x20] sm:$0xff]  ;;  %v47_v8 = vld [vmem:[#allocation3 + $0x28] sm:$0xff]  ;;  %12507 = vmatprep.mubr.msk.f32.mxu1 %vm13671_vm1, %v16461_v26  ;;  %v13745_v28 = vshrl.u32 %v71_v27, 7  ;;  %v212_v0 = vand.u32 127, %v71_v27  ;;  %s13673_s13 = smov 112  }
  0x11   :  { %12482 = vmatprep.subr.bf16.mxu0 %v13240_v1  ;;  %v60_v9 = vpack.c.bf16 %v45_v6, %v44_v5  ;;  %v61_v10 = vpack.c.bf16 %v47_v8, %v46_v7  ;;  %v48_v11 = vld [vmem:[#allocation3 + $0x30] sm:$0xff]  ;;  %v49_v12 = vld [vmem:[#allocation3 + $0x38] sm:$0xff]  ;;  %v50_v13 = vld [vmem:[#allocation3 + $0x40] sm:$0xff]  ;;  %s13674_s14 = smov 104   ;;  %s13675_s15 = smov 16   ;;  %vm5419_vm4 = vcmask 130112  }
  0x12   :  { %12484 = vmatprep.mubr.msk.bf16.mxu0 %vm87_vm0, %v59_v4  ;;  %v51_v14 = vld [vmem:[#allocation3 + $0x48] sm:$0xff]  ;;  %v62_v15 = vpack.c.bf16 %v49_v12, %v48_v11  ;;  %v52_v17 = vld [vmem:[#allocation3 + $0x50] sm:$0xff]  ;;  %v53_v18 = vld [vmem:[#allocation3 + $0x58] sm:$0xff]  ;;  %16465 = vst [vmem:[#allocation9_spill] sm:$0xff] %v13745_v28  ;;  %v73_v29 = vsub.s32 0, %v13745_v28  ;;  %vm213_vm3 = vcmp.le.s32.totalorder %v212_v0, %v13745_v28  ;;  %vm8076_vm5 = vcmask 195712  }
  0x13   :  { %v63_v16 = vpack.c.bf16 %v51_v14, %v50_v13  ;;  %v54_v19 = vld [vmem:[#allocation3 + $0x60] sm:$0xff]  ;;  %v55_v20 = vld [vmem:[#allocation3 + $0x68] sm:$0xff]  ;;  %v64_v21 = vpack.c.bf16 %v53_v18, %v52_v17  ;;  %v56_v23 = vld [vmem:[#allocation3 + $0x70] sm:$0xff]  ;;  %s13676_s16 = smov 24   ;;  %vm10733_vm6 = vcmask 261312  }
  0x14   :  { %12483 = vmatpush3.bf16.msra.mxu0 %v13240_v1  ;;  %v65_v22 = vpack.c.bf16 %v55_v20, %v54_v19  ;;  %v57_v24 = vld [vmem:[#allocation3 + $0x78] sm:$0xff]  ;;  %v58_v30 = vld [vmem:[%s16459_s6] sm:$0xff]  ;;  %v13920_v1 = vsel %vm213_vm3, 1.0, %v16461_v26 }
  0x15   :  { %v66_v25 = vpack.c.bf16 %v57_v24, %v56_v23  ;;  %12500 = vmatprep.subr.mxu0 %v16461_v26  ;;  %v13751_v32 = vrot.slane %v58_v30, %v73_v29  ;;  %v1401_v2 = vsub.f32 1.0, %v13920_v1 }
  0x17   :  { %12485 = vmatmul.mubr.msk.bf16.vlgmr.msra.gmra.mxu0 %vm87_vm0, %v60_v9  ;;  %v13923_v3 = vmul.f32 1e-09, %v1401_v2 }
  0x18   :  { %12488 = vmatprep.mubr.msk.bf16.mxu0 %vm87_vm0, %v61_v10 }
  0x1f   :  { %12489 = vmatmul.mubr.msk.bf16.gmra.mxu0 %vm87_vm0, %v62_v15 }
  0x20   :  { %12492 = vmatprep.mubr.msk.bf16.mxu0 %vm87_vm0, %v63_v16 }
  0x27   :  { %12493 = vmatmul.mubr.msk.bf16.gmra.mxu0 %vm87_vm0, %v64_v21 }
  0x28   :  { %12496 = vmatprep.mubr.msk.bf16.mxu0 %vm87_vm0, %v65_v22 }
  0x2f   :  { %12497 = vmatmul.mubr.msk.bf16.gmra.mxu0 %vm87_vm0, %v66_v25 }
  0x30   :  { %12502 = vmatprep.mubr.msk.f32.mxu0 %vm13671_vm1, %v16461_v26 }
  0xd7   :  { %v12486_v31 = vpop.f32.mrf.mxu0 }
  0xd8   :  { %v13770_v40 = vadd.f32 %v12486_v31, %v13751_v32 }
  0xd9   :  { %v146_v33 = vpop.f32.mrf.mxu0 }
  0xda   :  { %v13754_v34 = vadd.f32 %v146_v33, %v13751_v32 }
  0xdb   :  { %v12487_v35 = vpop.f32.mrf.mxu0 }
  0xdc   :  { %12501 = vmatpush3.xpose.msk.msra.mxu0 %vm216_vm2, %v13754_v34  ;;  %v13780_v43 = vadd.f32 %v12487_v35, %v13751_v32 }
  0xdd   :  { %v149_v36 = vpop.f32.mrf.mxu0  ;;  %12545 = vmatprep.subr.mxu0 %v16461_v26 }
  0xde   :  { %v13760_v37 = vadd.f32 %v149_v36, %v13751_v32 }
  0xdf   :  { %v12490_v38 = vpop.f32.mrf.mxu0  ;;  %12503 = vmatmul.mubr.msk.f32.vlgmr.msra.gmra.mxu0 %vm216_vm2, %v13754_v34 }
  0xe0   :  { %12506 = vmatpush3.xpose.msk.msra.mxu1 %vm216_vm2, %v13760_v37  ;;  %12547 = vmatprep.mubr.msk.f32.mxu0 %vm13671_vm1, %v16461_v26  ;;  %v13818_v54 = vadd.f32 %v12490_v38, %v13751_v32 }
  0xe1   :  { %v162_v39 = vpop.f32.mrf.mxu0  ;;  %12510 = vmatprep.subr.mxu1 %v16461_v26 }
  0xe2   :  { %v13790_v46 = vadd.f32 %v162_v39, %v13751_v32 }
  0xe3   :  { %v12491_v41 = vpop.f32.mrf.mxu0  ;;  %12508 = vmatmul.mubr.msk.f32.vlgmr.msra.gmra.mxu1 %vm216_vm2, %v13760_v37 }
  0xe4   :  { %12511 = vmatpush3.xpose.msk.msra.mxu1 %vm216_vm2, %v13770_v40  ;;  %12512 = vmatprep.mubr.msk.f32.mxu1 %vm13671_vm1, %v16461_v26  ;;  %v13833_v57 = vadd.f32 %v12491_v41, %v13751_v32 }
  0xe5   :  { %v165_v42 = vpop.f32.mrf.mxu0  ;;  %12515 = vmatprep.subr.mxu1 %v16461_v26 }
  0xe6   :  { %v13800_v49 = vadd.f32 %v165_v42, %v13751_v32 }
  0xe7   :  { %v12494_v44 = vpop.f32.mrf.mxu0  ;;  %12513 = vmatmul.mubr.msk.f32.vlgmr.msra.gmra.mxu1 %vm216_vm2, %v13770_v40 }
  0xe8   :  { %12516 = vmatpush3.xpose.msk.msra.mxu1 %vm216_vm2, %v13780_v43  ;;  %12517 = vmatprep.mubr.msk.f32.mxu1 %vm13671_vm1, %v16461_v26  ;;  %v13873_v61 = vadd.f32 %v12494_v44, %v13751_v32 }
  0xe9   :  { %v178_v45 = vpop.f32.mrf.mxu0  ;;  %12520 = vmatprep.subr.mxu1 %v16461_v26 }
  0xea   :  { %v13856_v60 = vadd.f32 %v178_v45, %v13751_v32 }
  0xeb   :  { %v12495_v47 = vpop.f32.mrf.mxu0  ;;  %12518 = vmatmul.mubr.msk.f32.vlgmr.msra.gmra.mxu1 %vm216_vm2, %v13780_v43 }
  0xec   :  { %12521 = vmatpush3.xpose.msk.msra.mxu1 %vm216_vm2, %v13790_v46  ;;  %12522 = vmatprep.mubr.msk.f32.mxu1 %vm13671_vm1, %v16461_v26  ;;  %v13808_v52 = vadd.f32 %v12495_v47, %v13751_v32 }
  0xed   :  { %v181_v48 = vpop.f32.mrf.mxu0  ;;  %12525 = vmatprep.subr.mxu1 %v16461_v26 }
  0xee   :  { %v13803_v50 = vadd.f32 %v181_v48, %v13751_v32 }
  0xef   :  { %v12498_v51 = vpop.f32.mrf.mxu0  ;;  %12523 = vmatmul.mubr.msk.f32.vlgmr.msra.gmra.mxu1 %vm216_vm2, %v13790_v46 }
  0xf0   :  { %12526 = vmatpush3.xpose.msk.msra.mxu1 %vm216_vm2, %v13800_v49  ;;  %12546 = vmatpush3.xpose.msk.msra.mxu0 %vm216_vm2, %v13803_v50  ;;  %v13897_v63 = vadd.f32 %v12498_v51, %v13751_v32 }
  0xf1   :  { %v194_v53 = vpop.f32.mrf.mxu0  ;;  %12527 = vmatprep.mubr.msk.f32.mxu1 %vm13671_vm1, %v16461_v26  ;;  %12530 = vmatprep.subr.mxu1 %v16461_v26 }
  0xf2   :  { %12555 = vmatprep.subr.mxu0 %v16461_v26  ;;  %v13883_v62 = vadd.f32 %v194_v53, %v13751_v32 }
  0xf3   :  { %v12499_v55 = vpop.f32.mrf.mxu0  ;;  %12528 = vmatmul.mubr.msk.f32.vlgmr.msra.gmra.mxu1 %vm216_vm2, %v13800_v49  ;;  %12548 = vmatmul.mubr.msk.f32.vlgmr.msra.gmra.mxu0 %vm216_vm2, %v13803_v50 }
  0xf4   :  { %12531 = vmatpush3.xpose.msk.msra.mxu1 %vm216_vm2, %v13818_v54  ;;  %12556 = vmatpush3.xpose.msk.msra.mxu0 %vm216_vm2, %v13808_v52  ;;  %v13846_v59 = vadd.f32 %v12499_v55, %v13751_v32 }
  0xf5   :  { %v197_v56 = vpop.f32.mrf.mxu0  ;;  %12532 = vmatprep.mubr.msk.f32.mxu1 %vm13671_vm1, %v16461_v26  ;;  %12535 = vmatprep.subr.mxu1 %v16461_v26 }
  0xf6   :  { %v13836_v58 = vadd.f32 %v197_v56, %v13751_v32  ;;  %12557 = vmatprep.mubr.msk.f32.mxu0 %vm13671_vm1, %v16461_v26  ;;  %12565 = vmatprep.subr.mxu0 %v16461_v26 }
  0xf7   :  { %12533 = vmatmul.mubr.msk.f32.vlgmr.msra.gmra.mxu1 %vm216_vm2, %v13818_v54  ;;  %12558 = vmatmul.mubr.msk.f32.vlgmr.msra.gmra.mxu0 %vm216_vm2, %v13808_v52 }
  0xf8   :  { %12536 = vmatpush3.xpose.msk.msra.mxu1 %vm216_vm2, %v13833_v57  ;;  %12566 = vmatpush3.xpose.msk.msra.mxu0 %vm216_vm2, %v13836_v58 }
  0xf9   :  { %12537 = vmatprep.mubr.msk.f32.mxu1 %vm13671_vm1, %v16461_v26  ;;  %12540 = vmatprep.subr.mxu1 %v16461_v26 }
  0xfa   :  { %12567 = vmatprep.mubr.msk.f32.mxu0 %vm13671_vm1, %v16461_v26  ;;  %12575 = vmatprep.subr.mxu0 %v16461_v26 }
  0xfb   :  { %12538 = vmatmul.mubr.msk.f32.vlgmr.msra.gmra.mxu1 %vm216_vm2, %v13833_v57  ;;  %12568 = vmatmul.mubr.msk.f32.vlgmr.msra.gmra.mxu0 %vm216_vm2, %v13836_v58 }
  0xfc   :  { %12541 = vmatpush3.xpose.msk.msra.mxu1 %vm216_vm2, %v13856_v60  ;;  %12576 = vmatpush3.xpose.msk.msra.mxu0 %vm216_vm2, %v13846_v59 }
  0xfd   :  { %12542 = vmatprep.mubr.msk.f32.mxu1 %vm13671_vm1, %v16461_v26  ;;  %12550 = vmatprep.subr.mxu1 %v16461_v26 }
  0xfe   :  { %12577 = vmatprep.mubr.msk.f32.mxu0 %vm13671_vm1, %v16461_v26  ;;  %12585 = vmatprep.subr.mxu0 %v16461_v26 }
  0xff   :  { %12543 = vmatmul.mubr.msk.f32.vlgmr.msra.gmra.mxu1 %vm216_vm2, %v13856_v60  ;;  %12578 = vmatmul.mubr.msk.f32.vlgmr.msra.gmra.mxu0 %vm216_vm2, %v13846_v59 }
 0x100   :  { %12551 = vmatpush3.xpose.msk.msra.mxu1 %vm216_vm2, %v13873_v61  ;;  %12586 = vmatpush3.msra.mxu0 %v13760_v37 }
 0x101   :  { %12552 = vmatprep.mubr.msk.f32.mxu1 %vm13671_vm1, %v16461_v26  ;;  %12560 = vmatprep.subr.mxu1 %v16461_v26 }
 0x102   :  { %12587 = vmatprep.mubr.msk.f32.mxu0 %vm13671_vm1, %v16461_v26  ;;  %12595 = vmatprep.subr.mxu0 %v16461_v26 }
 0x103   :  { %12553 = vmatmul.mubr.msk.f32.vlgmr.msra.gmra.mxu1 %vm216_vm2, %v13873_v61 }
 0x104   :  { %12561 = vmatpush3.xpose.msk.msra.mxu1 %vm216_vm2, %v13883_v62  ;;  %12562 = vmatprep.mubr.msk.f32.mxu1 %vm13671_vm1, %v16461_v26 }
 0x105   :  { %12570 = vmatprep.subr.mxu1 %v16461_v26 }
 0x107   :  { %12563 = vmatmul.mubr.msk.f32.vlgmr.msra.gmra.mxu1 %vm216_vm2, %v13883_v62 }
 0x108   :  { %12571 = vmatpush3.xpose.msk.msra.mxu1 %vm216_vm2, %v13897_v63  ;;  %12572 = vmatprep.mubr.msk.f32.mxu1 %vm13671_vm1, %v16461_v26 }
 0x109   :  { %12580 = vmatprep.subr.mxu1 %v16461_v26 }
 0x10b   :  { %12573 = vmatmul.mubr.msk.f32.vlgmr.msra.gmra.mxu1 %vm216_vm2, %v13897_v63 }
 0x10c   :  { %12581 = vmatpush3.msra.mxu1 %v13754_v34  ;;  %12582 = vmatprep.mubr.msk.f32.mxu1 %vm13671_vm1, %v16461_v26 }
 0x10d   :  { %12590 = vmatprep.subr.mxu1 %v16461_v26 }
 0x19f   :  { %v286_v4 = vpop.f32.mrf.mxu0 }
 0x1a0   :  { %v1385_v5 = vmul.f32 %v13920_v1, %v286_v4 }
 0x1a1   :  { %v12504_v6 = vpop.f32.mrf.mxu0 }
 0x1a2   :  { %v13927_v7 = vadd.f32 %v13923_v3, %v1385_v5 }
 0x1a3   :  { %v359_v8 = vpop.f32.mrf.mxu1 }
 0x1a4   :  { %v1386_v9 = vmul.f32 %v13920_v1, %v359_v8  ;;  %v1419_v10 = vsel %vm216_vm2, %v13927_v7, -inf }
 0x1a5   :  { %v12509_v11 = vpop.f32.mrf.mxu1  ;;  %1420 = vmax.xlane.f32.xlu0 %v1419_v10 }
 0x1a6   :  { %v13933_v12 = vadd.f32 %v13923_v3, %v1386_v9 }
 0x1a7   :  { %v432_v13 = vpop.f32.mrf.mxu1 }
 0x1a8   :  { %v1387_v14 = vmul.f32 %v13920_v1, %v432_v13  ;;  %v1422_v15 = vsel %vm216_vm2, %v13933_v12, -inf }
 0x1a9   :  { %v12514_v16 = vpop.f32.mrf.mxu1  ;;  %1423 = vmax.xlane.f32.xlu0 %v1422_v15 }
 0x1aa   :  { %v13939_v17 = vadd.f32 %v13923_v3, %v1387_v14 }
 0x1ab   :  { %v505_v18 = vpop.f32.mrf.mxu1 }
 0x1ac   :  { %v1388_v19 = vmul.f32 %v13920_v1, %v505_v18  ;;  %v1425_v20 = vsel %vm216_vm2, %v13939_v17, -inf }
 0x1ad   :  { %1426 = vmax.xlane.f32.xlu1 %v1425_v20  ;;  %v12519_v21 = vpop.f32.mrf.mxu1 }
 0x1ae   :  { %v13945_v22 = vadd.f32 %v13923_v3, %v1388_v19 }
 0x1af   :  { %v578_v23 = vpop.f32.mrf.mxu1 }
 0x1b0   :  { %v1389_v24 = vmul.f32 %v13920_v1, %v578_v23  ;;  %v1428_v25 = vsel %vm216_vm2, %v13945_v22, -inf }
 0x1b1   :  { %1429 = vmax.xlane.f32.xlu1 %v1428_v25  ;;  %v12524_v27 = vpop.f32.mrf.mxu1 }
 0x1b2   :  { %v13951_v29 = vadd.f32 %v13923_v3, %v1389_v24 }
 0x1b3   :  { %v651_v30 = vpop.f32.mrf.mxu1  ;;  %v943_v31 = vpop.f32.mrf.mxu0 }
 0x1b4   :  { %v1390_v32 = vmul.f32 %v13920_v1, %v651_v30  ;;  %v1431_v33 = vsel %vm216_vm2, %v13951_v29, -inf  ;;  %v1394_v56 = vmul.f32 %v13920_v1, %v943_v31 }
 0x1b5   :  { %v12529_v35 = vpop.f32.mrf.mxu1  ;;  %1432 = vmax.xlane.f32.xlu0 %v1431_v33  ;;  %v12549_v36 = vpop.f32.mrf.mxu0 }
 0x1b6   :  { %v13957_v38 = vadd.f32 %v13923_v3, %v1390_v32  ;;  %v13977_v13 = vadd.f32 %v13923_v3, %v1394_v56 }
 0x1b7   :  { %v724_v39 = vpop.f32.mrf.mxu1  ;;  %v1089_v41 = vpop.f32.mrf.mxu0 }
 0x1b8   :  { %v1391_v42 = vmul.f32 %v13920_v1, %v724_v39  ;;  %v1434_v44 = vsel %vm216_vm2, %v13957_v38, -inf  ;;  %v1396_v10 = vmul.f32 %v13920_v1, %v1089_v41  ;;  %v1446_v23 = vsel %vm216_vm2, %v13977_v13, -inf }
 0x1b9   :  { %1435 = vmax.xlane.f32.xlu1 %v1434_v44  ;;  %v12534_v45 = vpop.f32.mrf.mxu1  ;;  %v12559_v47 = vpop.f32.mrf.mxu0 }
 0x1ba   :  { %v13963_v48 = vadd.f32 %v13923_v3, %v1391_v42  ;;  %v13989_v24 = vadd.f32 %v13923_v3, %v1396_v10 }
 0x1bb   :  { %v797_v51 = vpop.f32.mrf.mxu1  ;;  %v1235_v53 = vpop.f32.mrf.mxu0 }
 0x1bc   :  { %v1392_v55 = vmul.f32 %v13920_v1, %v797_v51  ;;  %v1437_v0 = vsel %vm216_vm2, %v13963_v48, -inf  ;;  %v1398_v18 = vmul.f32 %v13920_v1, %v1235_v53  ;;  %v1452_v36 = vsel %vm216_vm2, %v13989_v24, -inf }
 0x1bd   :  { %v12539_v2 = vpop.f32.mrf.mxu1  ;;  %1438 = vmax.xlane.f32.xlu0 %v1437_v0  ;;  %v12569_v4 = vpop.f32.mrf.mxu0 }
 0x1be   :  { %v13970_v5 = vadd.f32 %v13923_v3, %v1392_v55  ;;  %v13996_v31 = vadd.f32 %v13923_v3, %v1398_v18 }
 0x1bf   :  { %v870_v6 = vpop.f32.mrf.mxu1  ;;  %v1381_v8 = vpop.f32.mrf.mxu0 }
 0x1c0   :  { %v1393_v9 = vmul.f32 %v13920_v1, %v870_v6  ;;  %v1440_v11 = vsel %vm216_vm2, %v13970_v5, -inf  ;;  %v1400_v30 = vmul.f32 %v13920_v1, %v1381_v8  ;;  %v1458_v42 = vsel %vm216_vm2, %v13996_v31, -inf }
 0x1c1   :  { %1441 = vmax.xlane.f32.xlu1 %v1440_v11  ;;  %v12544_v14 = vpop.f32.mrf.mxu1  ;;  %v12579_v15 = vpop.f32.mrf.mxu0 }
 0x1c2   :  { %v13980_v16 = vadd.f32 %v13923_v3, %v1393_v9  ;;  %v14009_v44 = vadd.f32 %v13923_v3, %v1400_v30 }
 0x1c3   :  { %v1016_v19 = vpop.f32.mrf.mxu1 }
 0x1c4   :  { %v1395_v20 = vmul.f32 %v13920_v1, %v1016_v19  ;;  %v1443_v21 = vsel %vm216_vm2, %v13980_v16, -inf  ;;  %v1464_v56 = vsel %vm216_vm2, %v14009_v44, -inf }
 0x1c5   :  { %v12554_v25 = vpop.f32.mrf.mxu1  ;;  %1444 = vmax.xlane.f32.xlu0 %v1443_v21  ;;  %1447 = vmax.xlane.f32.xlu1 %v1446_v23 }
 0x1c6   :  { %v13992_v27 = vadd.f32 %v13923_v3, %v1395_v20 }
 0x1c7   :  { %v1162_v32 = vpop.f32.mrf.mxu1 }
 0x1c8   :  { %v1397_v33 = vmul.f32 %v13920_v1, %v1162_v32  ;;  %v1449_v35 = vsel %vm216_vm2, %v13992_v27, -inf }
 0x1c9   :  { %v12564_v39 = vpop.f32.mrf.mxu1  ;;  %1450 = vmax.xlane.f32.xlu0 %v1449_v35  ;;  %1453 = vmax.xlane.f32.xlu1 %v1452_v36 }
 0x1ca   :  { %v14004_v41 = vadd.f32 %v13923_v3, %v1397_v33 }
 0x1cb   :  { %v1308_v45 = vpop.f32.mrf.mxu1 }
 0x1cc   :  { %v1399_v47 = vmul.f32 %v13920_v1, %v1308_v45  ;;  %v1455_v51 = vsel %vm216_vm2, %v14004_v41, -inf }
 0x1cd   :  { %1456 = vmax.xlane.f32.xlu0 %v1455_v51  ;;  %1459 = vmax.xlane.f32.xlu1 %v1458_v42  ;;  %v12574_v53 = vpop.f32.mrf.mxu1 }
 0x1ce   :  { %v14015_v55 = vadd.f32 %v13923_v3, %v1399_v47 }
 0x1d0   :  { %v1461_v0 = vsel %vm216_vm2, %v14015_v55, -inf }
 0x1d1   :  { %1462 = vmax.xlane.f32.xlu0 %v1461_v0  ;;  %1465 = vmax.xlane.f32.xlu1 %v1464_v56 }
 0x22e   :  { %v1421_v2 = vpop.xlane.xlu0 %1420 }
 0x22f   :  { %v1467_v4 = vsub.f32 %v13927_v7, %v1421_v2 }
 0x231   :  { %v1483_v6 = vmul.f32 1.442695, %v1467_v4 }
 0x232   :  { %v1424_v8 = vpop.xlane.xlu0 %1423 }
 0x233   :  { %13253 = vpow2.f32 %v1483_v6  ;;  %v1468_v9 = vsub.f32 %v13933_v12, %v1424_v8 }
 0x235   :  { %v1485_v10 = vmul.f32 1.442695, %v1468_v9 }
 0x236   :  { %v1427_v11 = vpop.xlane.xlu1 %1426 }
 0x237   :  { %13255 = vpow2.f32 %v1485_v10  ;;  %v1469_v14 = vsub.f32 %v13939_v17, %v1427_v11 }
 0x239   :  { %v1487_v15 = vmul.f32 1.442695, %v1469_v14 }
 0x23a   :  { %v1430_v18 = vpop.xlane.xlu1 %1429 }
 0x23b   :  { %13257 = vpow2.f32 %v1487_v15  ;;  %v1470_v19 = vsub.f32 %v13945_v22, %v1430_v18 }
 0x23d   :  { %v1489_v20 = vmul.f32 1.442695, %v1470_v19 }
 0x23e   :  { %v1433_v21 = vpop.xlane.xlu0 %1432 }
 0x23f   :  { %13259 = vpow2.f32 %v1489_v20  ;;  %v1471_v7 = vsub.f32 %v13951_v29, %v1433_v21 }
 0x240   :  { %v14026_v23 = vpop.eup %13253 }
 0x241   :  { %v1491_v25 = vmul.f32 1.442695, %v1471_v7  ;;  %v1515_v12 = vsel %vm216_vm2, %v14026_v23, 0.0 }
 0x242   :  { %v1436_v30 = vpop.xlane.xlu1 %1435  ;;  %1516 = vadd.xlane.f32.xlu0 %v1515_v12 }
 0x243   :  { %13261 = vpow2.f32 %v1491_v25  ;;  %v1472_v17 = vsub.f32 %v13957_v38, %v1436_v30 }
 0x244   :  { %v14031_v32 = vpop.eup %13255 }
 0x245   :  { %v1493_v33 = vmul.f32 1.442695, %v1472_v17  ;;  %v1518_v22 = vsel %vm216_vm2, %v14031_v32, 0.0 }
 0x246   :  { %v1439_v35 = vpop.xlane.xlu0 %1438  ;;  %1519 = vadd.xlane.f32.xlu1 %v1518_v22 }
 0x247   :  { %13263 = vpow2.f32 %v1493_v33  ;;  %v1473_v29 = vsub.f32 %v13963_v48, %v1439_v35 }
 0x248   :  { %v14036_v36 = vpop.eup %13257 }
 0x249   :  { %v1495_v39 = vmul.f32 1.442695, %v1473_v29  ;;  %v1521_v42 = vsel %vm216_vm2, %v14036_v36, 0.0 }
 0x24a   :  { %v1442_v45 = vpop.xlane.xlu1 %1441  ;;  %1522 = vadd.xlane.f32.xlu0 %v1521_v42 }
 0x24b   :  { %13265 = vpow2.f32 %v1495_v39  ;;  %v1474_v8 = vsub.f32 %v13970_v5, %v1442_v45 }
 0x24c   :  { %v14040_v38 = vpop.eup %13259 }
 0x24d   :  { %v1524_v47 = vsel %vm216_vm2, %v14040_v38, 0.0  ;;  %v1497_v19 = vmul.f32 1.442695, %v1474_v8 }
 0x24e   :  { %v1445_v51 = vpop.xlane.xlu0 %1444  ;;  %v1448_v53 = vpop.xlane.xlu1 %1447  ;;  %1525 = vadd.xlane.f32.xlu1 %v1524_v47 }
 0x24f   :  { %v1475_v56 = vsub.f32 %v13980_v16, %v1445_v51  ;;  %v1476_v48 = vsub.f32 %v13977_v13, %v1448_v53 }
 0x250   :  { %v14046_v0 = vpop.eup %13261 }
 0x251   :  { %v1499_v2 = vmul.f32 1.442695, %v1475_v56  ;;  %v1501_v4 = vmul.f32 1.442695, %v1476_v48  ;;  %v1527_v6 = vsel %vm216_vm2, %v14046_v0, 0.0 }
 0x252   :  { %1528 = vadd.xlane.f32.xlu0 %v1527_v6  ;;  %v1451_v9 = vpop.xlane.xlu0 %1450  ;;  %v1454_v10 = vpop.xlane.xlu1 %1453 }
 0x253   :  { %13267 = vpow2.f32 %v1499_v2  ;;  %v1477_v11 = vsub.f32 %v13992_v27, %v1451_v9  ;;  %v1478_v14 = vsub.f32 %v13989_v24, %v1454_v10 }
 0x254   :  { %v14053_v16 = vpop.eup %13263  ;;  %13269 = vpow2.f32 %v1501_v4 }
 0x255   :  { %v1503_v13 = vmul.f32 1.442695, %v1477_v11  ;;  %v1505_v15 = vmul.f32 1.442695, %v1478_v14  ;;  %v1530_v18 = vsel %vm216_vm2, %v14053_v16, 0.0 }
 0x256   :  { %v1457_v20 = vpop.xlane.xlu0 %1456  ;;  %v1460_v21 = vpop.xlane.xlu1 %1459  ;;  %1531 = vadd.xlane.f32.xlu1 %v1530_v18 }
 0x257   :  { %13271 = vpow2.f32 %v1503_v13  ;;  %v1479_v5 = vsub.f32 %v14004_v41, %v1457_v20  ;;  %v1480_v7 = vsub.f32 %v13996_v31, %v1460_v21 }
 0x258   :  { %v14059_v27 = vpop.eup %13265  ;;  %13273 = vpow2.f32 %v1505_v15 }
 0x259   :  { %v1507_v24 = vmul.f32 1.442695, %v1479_v5  ;;  %v1533_v25 = vsel %vm216_vm2, %v14059_v27, 0.0  ;;  %13275 = vpow2.f32 %v1497_v19  ;;  %v1509_v12 = vmul.f32 1.442695, %v1480_v7 }
 0x25a   :  { %1534 = vadd.xlane.f32.xlu0 %v1533_v25  ;;  %v1463_v30 = vpop.xlane.xlu0 %1462  ;;  %v1466_v17 = vpop.xlane.xlu1 %1465 }
 0x25b   :  { %13277 = vpow2.f32 %v1507_v24  ;;  %v1481_v33 = vsub.f32 %v14015_v55, %v1463_v30  ;;  %v1482_v22 = vsub.f32 %v14009_v44, %v1466_v17 }
 0x25c   :  { %13279 = vpow2.f32 %v1509_v12 }
 0x25d   :  { %v1511_v41 = vmul.f32 1.442695, %v1481_v33  ;;  %v1513_v31 = vmul.f32 1.442695, %v1482_v22 }
 0x25f   :  { %13281 = vpow2.f32 %v1511_v41 }
 0x260   :  { %v14065_v35 = vpop.eup %13267  ;;  %13283 = vpow2.f32 %v1513_v31 }
 0x261   :  { %v14067_v29 = vpop.eup %13269  ;;  %v1539_v39 = vsel %vm216_vm2, %v14065_v35, 0.0 }
 0x262   :  { %1540 = vadd.xlane.f32.xlu0 %v1539_v39  ;;  %v1542_v42 = vsel %vm216_vm2, %v14067_v29, 0.0 }
 0x263   :  { %1543 = vadd.xlane.f32.xlu1 %v1542_v42 }
 0x264   :  { %v14073_v55 = vpop.eup %13271 }
 0x265   :  { %v14075_v44 = vpop.eup %13273  ;;  %v1545_v45 = vsel %vm216_vm2, %v14073_v55, 0.0 }
 0x266   :  { %1546 = vadd.xlane.f32.xlu0 %v1545_v45  ;;  %v1548_v47 = vsel %vm216_vm2, %v14075_v44, 0.0  ;;  %v14081_v51 = vpop.eup %13275 }
 0x267   :  { %1549 = vadd.xlane.f32.xlu1 %v1548_v47  ;;  %v1536_v48 = vsel %vm216_vm2, %v14081_v51, 0.0 }
 0x268   :  { %v14083_v53 = vpop.eup %13277 }
 0x269   :  { %v1551_v56 = vsel %vm216_vm2, %v14083_v53, 0.0  ;;  %v14089_v2 = vpop.eup %13279 }
 0x26a   :  { %1552 = vadd.xlane.f32.xlu0 %v1551_v56  ;;  %v1554_v8 = vsel %vm216_vm2, %v14089_v2, 0.0 }
 0x26b   :  { %1537 = vadd.xlane.f32.xlu1 %v1536_v48 }
 0x26c   :  { %v14091_v4 = vpop.eup %13281 }
 0x26d   :  { %v1557_v6 = vsel %vm216_vm2, %v14091_v4, 0.0  ;;  %v14097_v9 = vpop.eup %13283 }
 0x26e   :  { %1558 = vadd.xlane.f32.xlu0 %v1557_v6  ;;  %v1560_v10 = vsel %vm216_vm2, %v14097_v9, 0.0 }
 0x26f   :  { %1555 = vadd.xlane.f32.xlu1 %v1554_v8 }
 0x273   :  { %1561 = vadd.xlane.f32.xlu1 %v1560_v10 }
 0x284   :  { %2853 = vrot.lane.b32.xlu1 %v13760_v37, %s13672_s12  ;;  %2779 = vrot.lane.b32.xlu0 %v13754_v34, %s13672_s12 }
 0x288   :  { %2927 = vrot.lane.b32.xlu1 %v13770_v40, %s13672_s12  ;;  %3075 = vrot.lane.b32.xlu0 %v13790_v46, %s13672_s12 }
 0x28c   :  { %3001 = vrot.lane.b32.xlu1 %v13780_v43, %s13672_s12  ;;  %3223 = vrot.lane.b32.xlu0 %v13818_v54, %s13672_s12 }
 0x290   :  { %3149 = vrot.lane.b32.xlu1 %v13800_v49, %s13672_s12  ;;  %3371 = vrot.lane.b32.xlu0 %v13856_v60, %s13672_s12 }
 0x294   :  { %3297 = vrot.lane.b32.xlu1 %v13833_v57, %s13672_s12  ;;  %3519 = vrot.lane.b32.xlu0 %v13873_v61, %s13672_s12 }
 0x298   :  { %3445 = vrot.lane.b32.xlu1 %v13803_v50, %s13672_s12  ;;  %3667 = vrot.lane.b32.xlu0 %v13883_v62, %s13672_s12 }
 0x29c   :  { %3593 = vrot.lane.b32.xlu1 %v13808_v52, %s13672_s12  ;;  %3815 = vrot.lane.b32.xlu0 %v13897_v63, %s13672_s12 }
 0x2a0   :  { %3741 = vrot.lane.b32.xlu1 %v13836_v58, %s13672_s12 }
 0x2a4   :  { %3889 = vrot.lane.b32.xlu1 %v13846_v59, %s13672_s12 }
 0x2cb   :  { %v1517_v11 = vpop.xlane.xlu0 %1516 }
 0x2cc   :  { %13285 = vrcp.f32 %v1517_v11 }
 0x2cf   :  { %v1520_v14 = vpop.xlane.xlu1 %1519 }
 0x2d0   :  { %13287 = vrcp.f32 %v1520_v14 }
 0x2d3   :  { %v1523_v13 = vpop.xlane.xlu0 %1522 }
 0x2d4   :  { %13289 = vrcp.f32 %v1523_v13 }
 0x2d7   :  { %v1526_v15 = vpop.xlane.xlu1 %1525 }
 0x2d8   :  { %13291 = vrcp.f32 %v1526_v15 }
 0x2d9   :  { %v13286_v18 = vpop.eup %13285 }
 0x2da   :  { %v1579_v19 = vmul.f32 %v13286_v18, %v14026_v23 }
 0x2db   :  { %v1529_v20 = vpop.xlane.xlu0 %1528 }
 0x2dc   :  { %13293 = vrcp.f32 %v1529_v20  ;;  %12583 = vmatmul.mubr.msk.f32.vlgmr.msra.gmra.mxu1 %vm216_vm2, %v1579_v19 }
 0x2dd   :  { %v13288_v21 = vpop.eup %13287  ;;  %12591 = vmatpush3.msra.mxu1 %v13770_v40  ;;  %12592 = vmatprep.mubr.msk.f32.mxu1 %vm13671_vm1, %v16461_v26 }
 0x2de   :  { %v1580_v5 = vmul.f32 %v13288_v21, %v14031_v32  ;;  %12600 = vmatprep.subr.mxu1 %v16461_v26 }
 0x2df   :  { %v1532_v7 = vpop.xlane.xlu1 %1531 }
 0x2e0   :  { %13295 = vrcp.f32 %v1532_v7  ;;  %12588 = vmatmul.mubr.msk.f32.vlgmr.msra.gmra.mxu0 %vm216_vm2, %v1580_v5 }
 0x2e1   :  { %v13290_v24 = vpop.eup %13289  ;;  %12596 = vmatpush3.msra.mxu0 %v13780_v43  ;;  %12597 = vmatprep.mubr.msk.f32.mxu0 %vm13671_vm1, %v16461_v26 }
 0x2e2   :  { %v1581_v23 = vmul.f32 %v13290_v24, %v14036_v36  ;;  %12605 = vmatprep.subr.mxu0 %v16461_v26 }
 0x2e3   :  { %v1535_v25 = vpop.xlane.xlu0 %1534 }
 0x2e4   :  { %13297 = vrcp.f32 %v1535_v25  ;;  %12593 = vmatmul.mubr.msk.f32.vlgmr.msra.gmra.mxu1 %vm216_vm2, %v1581_v23 }
 0x2e5   :  { %v13292_v32 = vpop.eup %13291  ;;  %12601 = vmatpush3.msra.mxu1 %v13790_v46  ;;  %12602 = vmatprep.mubr.msk.f32.mxu1 %vm13671_vm1, %v16461_v26 }
 0x2e6   :  { %v1582_v12 = vmul.f32 %v13292_v32, %v14040_v38  ;;  %12610 = vmatprep.subr.mxu1 %v16461_v26 }
 0x2e8   :  { %12598 = vmatmul.mubr.msk.f32.vlgmr.msra.gmra.mxu0 %vm216_vm2, %v1582_v12 }
 0x2e9   :  { %v13294_v30 = vpop.eup %13293  ;;  %12606 = vmatpush3.msra.mxu0 %v13800_v49  ;;  %12607 = vmatprep.mubr.msk.f32.mxu0 %vm13671_vm1, %v16461_v26 }
 0x2ea   :  { %v1583_v36 = vmul.f32 %v13294_v30, %v14046_v0  ;;  %12615 = vmatprep.subr.mxu0 %v16461_v26 }
 0x2eb   :  { %v1541_v17 = vpop.xlane.xlu0 %1540 }
 0x2ec   :  { %13299 = vrcp.f32 %v1541_v17  ;;  %v1544_v33 = vpop.xlane.xlu1 %1543  ;;  %12603 = vmatmul.mubr.msk.f32.vlgmr.msra.gmra.mxu1 %vm216_vm2, %v1583_v36 }
 0x2ed   :  { %v13296_v38 = vpop.eup %13295  ;;  %12611 = vmatpush3.msra.mxu1 %v13818_v54  ;;  %12612 = vmatprep.mubr.msk.f32.mxu1 %vm13671_vm1, %v16461_v26 }
 0x2ee   :  { %v1584_v22 = vmul.f32 %v13296_v38, %v14053_v16  ;;  %12620 = vmatprep.subr.mxu1 %v16461_v26 }
 0x2ef   :  { %v1547_v41 = vpop.xlane.xlu0 %1546 }
 0x2f0   :  { %13301 = vrcp.f32 %v1547_v41  ;;  %v1550_v0 = vpop.xlane.xlu1 %1549  ;;  %12608 = vmatmul.mubr.msk.f32.vlgmr.msra.gmra.mxu0 %vm216_vm2, %v1584_v22 }
 0x2f1   :  { %v13298_v31 = vpop.eup %13297  ;;  %12616 = vmatpush3.msra.mxu0 %v13833_v57  ;;  %12617 = vmatprep.mubr.msk.f32.mxu0 %vm13671_vm1, %v16461_v26 }
 0x2f2   :  { %v1585_v39 = vmul.f32 %v13298_v31, %v14059_v27  ;;  %12625 = vmatprep.subr.mxu0 %v16461_v26 }
 0x2f3   :  { %v1553_v42 = vpop.xlane.xlu0 %1552 }
 0x2f4   :  { %13303 = vrcp.f32 %v1553_v42  ;;  %v1538_v16 = vpop.xlane.xlu1 %1537  ;;  %12613 = vmatmul.mubr.msk.f32.vlgmr.msra.gmra.mxu1 %vm216_vm2, %v1585_v39 }
 0x2f5   :  { %13305 = vrcp.f32 %v1538_v16  ;;  %12621 = vmatpush3.msra.mxu1 %v13856_v60  ;;  %12622 = vmatprep.mubr.msk.f32.mxu1 %vm13671_vm1, %v16461_v26 }
 0x2f6   :  { %12630 = vmatprep.subr.mxu1 %v16461_v26  ;;  %13307 = vrcp.f32 %v1544_v33 }
 0x2f7   :  { %v1559_v45 = vpop.xlane.xlu0 %1558 }
 0x2f8   :  { %13309 = vrcp.f32 %v1559_v45  ;;  %v1556_v47 = vpop.xlane.xlu1 %1555 }
 0x2f9   :  { %v13300_v27 = vpop.eup %13299  ;;  %13311 = vrcp.f32 %v1550_v0 }
 0x2fa   :  { %v1587_v56 = vmul.f32 %v13300_v27, %v14065_v35  ;;  %13313 = vrcp.f32 %v1556_v47 }
 0x2fb   :  { %v14166_v10 = vpop.permute.xlu0 %2779 }
 0x2fc   :  { %v1562_v48 = vpop.xlane.xlu1 %1561  ;;  %12623 = vmatmul.mubr.msk.f32.vlgmr.msra.gmra.mxu1 %vm216_vm2, %v1587_v56 }
 0x2fd   :  { %v13302_v6 = vpop.eup %13301  ;;  %12631 = vmatpush3.msra.mxu1 %v13873_v61  ;;  %12632 = vmatprep.mubr.msk.f32.mxu1 %vm13671_vm1, %v16461_v26  ;;  %13315 = vrcp.f32 %v1562_v48 }
 0x2fe   :  { %12640 = vmatprep.subr.mxu1 %v16461_v26  ;;  %v1589_v8 = vmul.f32 %v13302_v6, %v14073_v55 }
 0x2ff   :  { %v14180_v19 = vpop.permute.xlu0 %3075 }
 0x300   :  { %12633 = vmatmul.mubr.msk.f32.vlgmr.msra.gmra.mxu1 %vm216_vm2, %v1589_v8  ;;  %v14169_v11 = vpop.permute.xlu1 %2853 }
 0x301   :  { %v13304_v35 = vpop.eup %13303  ;;  %12641 = vmatpush3.msra.mxu1 %v13883_v62  ;;  %12642 = vmatprep.mubr.msk.f32.mxu1 %vm13671_vm1, %v16461_v26 }
 0x302   :  { %v13306_v14 = vpop.eup %13305  ;;  %12650 = vmatprep.subr.mxu1 %v16461_v26  ;;  %v1591_v13 = vmul.f32 %v13304_v35, %v14083_v53 }
 0x303   :  { %v1586_v55 = vmul.f32 %v13306_v14, %v14081_v51  ;;  %v13308_v15 = vpop.eup %13307  ;;  %v14204_v5 = vpop.permute.xlu0 %3223 }
 0x304   :  { %12643 = vmatmul.mubr.msk.f32.vlgmr.msra.gmra.mxu1 %vm216_vm2, %v1591_v13  ;;  %v14186_v20 = vpop.permute.xlu1 %2927  ;;  %v1588_v51 = vmul.f32 %v13308_v15, %v14067_v29 }
 0x305   :  { %v13310_v18 = vpop.eup %13309  ;;  %12618 = vmatmul.mubr.msk.f32.vlgmr.msra.gmra.mxu0 %vm216_vm2, %v1586_v55  ;;  %12651 = vmatpush3.msra.mxu1 %v13897_v63 }
 0x306   :  { %12626 = vmatpush3.msra.mxu0 %v13803_v50  ;;  %12652 = vmatprep.mubr.msk.f32.mxu1 %vm13671_vm1, %v16461_v26  ;;  %v1593_v53 = vmul.f32 %v13310_v18, %v14091_v4  ;;  %v13312_v21 = vpop.eup %13311 }
 0x307   :  { %12660 = vmatprep.subr.mxu1 %v16461_v26  ;;  %12627 = vmatprep.mubr.msk.f32.mxu0 %vm13671_vm1, %v16461_v26  ;;  %v1590_v29 = vmul.f32 %v13312_v21, %v14075_v44  ;;  %v13314_v4 = vpop.eup %13313  ;;  %v14227_v23 = vpop.permute.xlu0 %3371 }
 0x308   :  { %12635 = vmatprep.subr.mxu0 %v16461_v26  ;;  %12653 = vmatmul.mubr.msk.f32.vlgmr.msra.gmra.mxu1 %vm216_vm2, %v1593_v53  ;;  %v14209_v7 = vpop.permute.xlu1 %3001  ;;  %v1592_v44 = vmul.f32 %v13314_v4, %v14089_v2 }
 0x309   :  { %12628 = vmatmul.mubr.msk.f32.vlgmr.msra.gmra.mxu0 %vm216_vm2, %v1588_v51  ;;  %12661 = vmatpush3.xpose.msk.msra.mxu1 %vm216_vm2, %v14166_v10 }
 0x30a   :  { %12636 = vmatpush3.msra.mxu0 %v13808_v52  ;;  %12662 = vmatprep.mubr.msk.f32.mxu1 %vm13671_vm1, %v16461_v26  ;;  %v13316_v24 = vpop.eup %13315 }
 0x30b   :  { %12670 = vmatprep.subr.mxu1 %v16461_v26  ;;  %12637 = vmatprep.mubr.msk.f32.mxu0 %vm13671_vm1, %v16461_v26  ;;  %v1594_v2 = vmul.f32 %v13316_v24, %v14097_v9  ;;  %v14251_v9 = vpop.permute.xlu0 %3519 }
 0x30c   :  { %12645 = vmatprep.subr.mxu0 %v16461_v26  ;;  %12663 = vmatmul.mubr.msk.f32.vlgmr.msra.gmra.mxu1 %vm216_vm2, %v14166_v10  ;;  %v14232_v25 = vpop.permute.xlu1 %3149 }
 0x30d   :  { %12638 = vmatmul.mubr.msk.f32.vlgmr.msra.gmra.mxu0 %vm216_vm2, %v1590_v29  ;;  %12671 = vmatpush3.xpose.msk.msra.mxu1 %vm216_vm2, %v14186_v20 }
 0x30e   :  { %12646 = vmatpush3.msra.mxu0 %v13836_v58  ;;  %12672 = vmatprep.mubr.msk.f32.mxu1 %vm13671_vm1, %v16461_v26 }
 0x30f   :  { %12647 = vmatprep.mubr.msk.f32.mxu0 %vm13671_vm1, %v16461_v26  ;;  %12655 = vmatprep.subr.mxu0 %v16461_v26  ;;  %v14276_v12 = vpop.permute.xlu0 %3667 }
 0x310   :  { %12680 = vmatprep.subr.mxu1 %v16461_v26  ;;  %12673 = vmatmul.mubr.msk.f32.vlgmr.msra.gmra.mxu1 %vm216_vm2, %v14186_v20  ;;  %v14256_v32 = vpop.permute.xlu1 %3297 }
 0x311   :  { %12648 = vmatmul.mubr.msk.f32.vlgmr.msra.gmra.mxu0 %vm216_vm2, %v1592_v44  ;;  %12681 = vmatpush3.xpose.msk.msra.mxu1 %vm216_vm2, %v14180_v19 }
 0x312   :  { %12656 = vmatpush3.msra.mxu0 %v13846_v59  ;;  %12657 = vmatprep.mubr.msk.f32.mxu0 %vm13671_vm1, %v16461_v26 }
 0x313   :  { %12665 = vmatprep.subr.mxu0 %v16461_v26  ;;  %12682 = vmatprep.mubr.msk.f32.mxu1 %vm13671_vm1, %v16461_v26  ;;  %v14301_v36 = vpop.permute.xlu0 %3815 }
 0x314   :  { %12690 = vmatprep.subr.mxu1 %v16461_v26  ;;  %12683 = vmatmul.mubr.msk.f32.vlgmr.msra.gmra.mxu1 %vm216_vm2, %v14180_v19  ;;  %v14282_v30 = vpop.permute.xlu1 %3445 }
 0x315   :  { %12658 = vmatmul.mubr.msk.f32.vlgmr.msra.gmra.mxu0 %vm216_vm2, %v1594_v2  ;;  %12691 = vmatpush3.xpose.msk.msra.mxu1 %vm216_vm2, %v14204_v5 }
 0x316   :  { %12666 = vmatpush3.xpose.msk.msra.mxu0 %vm216_vm2, %v14169_v11  ;;  %12667 = vmatprep.mubr.msk.f32.mxu0 %vm13671_vm1, %v16461_v26 }
 0x317   :  { %12675 = vmatprep.subr.mxu0 %v16461_v26  ;;  %12692 = vmatprep.mubr.msk.f32.mxu1 %vm13671_vm1, %v16461_v26 }
 0x318   :  { %12700 = vmatprep.subr.mxu1 %v16461_v26  ;;  %12693 = vmatmul.mubr.msk.f32.vlgmr.msra.gmra.mxu1 %vm216_vm2, %v14204_v5  ;;  %v14306_v17 = vpop.permute.xlu1 %3593 }
 0x319   :  { %12668 = vmatmul.mubr.msk.f32.vlgmr.msra.gmra.mxu0 %vm216_vm2, %v14169_v11  ;;  %12701 = vmatpush3.xpose.msk.msra.mxu1 %vm216_vm2, %v14227_v23 }
 0x31a   :  { %12676 = vmatpush3.xpose.msk.msra.mxu0 %vm216_vm2, %v14209_v7  ;;  %12677 = vmatprep.mubr.msk.f32.mxu0 %vm13671_vm1, %v16461_v26 }
 0x31b   :  { %12685 = vmatprep.subr.mxu0 %v16461_v26  ;;  %12702 = vmatprep.mubr.msk.f32.mxu1 %vm13671_vm1, %v16461_v26 }
 0x31c   :  { %12710 = vmatprep.subr.mxu1 %v16461_v26  ;;  %12703 = vmatmul.mubr.msk.f32.vlgmr.msra.gmra.mxu1 %vm216_vm2, %v14227_v23  ;;  %v14329_v33 = vpop.permute.xlu1 %3741 }
 0x31d   :  { %12678 = vmatmul.mubr.msk.f32.vlgmr.msra.gmra.mxu0 %vm216_vm2, %v14209_v7  ;;  %12711 = vmatpush3.xpose.msk.msra.mxu1 %vm216_vm2, %v14251_v9 }
 0x31e   :  { %12686 = vmatpush3.xpose.msk.msra.mxu0 %vm216_vm2, %v14232_v25  ;;  %12687 = vmatprep.mubr.msk.f32.mxu0 %vm13671_vm1, %v16461_v26 }
 0x31f   :  { %12695 = vmatprep.subr.mxu0 %v16461_v26  ;;  %12712 = vmatprep.mubr.msk.f32.mxu1 %vm13671_vm1, %v16461_v26 }
 0x320   :  { %12720 = vmatprep.subr.mxu1 %v16461_v26  ;;  %12713 = vmatmul.mubr.msk.f32.vlgmr.msra.gmra.mxu1 %vm216_vm2, %v14251_v9  ;;  %v14342_v38 = vpop.permute.xlu1 %3889 }
 0x321   :  { %12688 = vmatmul.mubr.msk.f32.vlgmr.msra.gmra.mxu0 %vm216_vm2, %v14232_v25  ;;  %12721 = vmatpush3.xpose.msk.msra.mxu1 %vm216_vm2, %v14276_v12 }
 0x322   :  { %12696 = vmatpush3.xpose.msk.msra.mxu0 %vm216_vm2, %v14256_v32  ;;  %12697 = vmatprep.mubr.msk.f32.mxu0 %vm13671_vm1, %v16461_v26 }
 0x323   :  { %12705 = vmatprep.subr.mxu0 %v16461_v26  ;;  %12722 = vmatprep.mubr.msk.f32.mxu1 %vm13671_vm1, %v16461_v26 }
 0x324   :  { %12730 = vmatprep.subr.mxu1 %v16461_v26  ;;  %12723 = vmatmul.mubr.msk.f32.vlgmr.msra.gmra.mxu1 %vm216_vm2, %v14276_v12 }
 0x325   :  { %12698 = vmatmul.mubr.msk.f32.vlgmr.msra.gmra.mxu0 %vm216_vm2, %v14256_v32  ;;  %12731 = vmatpush3.xpose.msk.msra.mxu1 %vm216_vm2, %v14301_v36 }
 0x326   :  { %12706 = vmatpush3.xpose.msk.msra.mxu0 %vm216_vm2, %v14282_v30  ;;  %12707 = vmatprep.mubr.msk.f32.mxu0 %vm13671_vm1, %v16461_v26 }
 0x327   :  { %12715 = vmatprep.subr.mxu0 %v16461_v26  ;;  %12732 = vmatprep.mubr.msk.f32.mxu1 %vm13671_vm1, %v16461_v26 }
 0x328   :  { %12740 = vmatprep.subr.mxu1 %v16461_v26  ;;  %12733 = vmatmul.mubr.msk.f32.vlgmr.msra.gmra.mxu1 %vm216_vm2, %v14301_v36 }
 0x329   :  { %12708 = vmatmul.mubr.msk.f32.vlgmr.msra.gmra.mxu0 %vm216_vm2, %v14282_v30  ;;  %12741 = vmatpush3.msra.mxu1 %v14166_v10 }
 0x32a   :  { %12716 = vmatpush3.xpose.msk.msra.mxu0 %vm216_vm2, %v14306_v17  ;;  %12717 = vmatprep.mubr.msk.f32.mxu0 %vm13671_vm1, %v16461_v26 }
 0x32b   :  { %12725 = vmatprep.subr.mxu0 %v16461_v26  ;;  %12742 = vmatprep.mubr.msk.f32.mxu1 %vm13671_vm1, %v16461_v26 }
 0x32c   :  { %12750 = vmatprep.subr.mxu1 %v16461_v26 }
 0x32d   :  { %12718 = vmatmul.mubr.msk.f32.vlgmr.msra.gmra.mxu0 %vm216_vm2, %v14306_v17 }
 0x32e   :  { %12726 = vmatpush3.xpose.msk.msra.mxu0 %vm216_vm2, %v14329_v33  ;;  %12727 = vmatprep.mubr.msk.f32.mxu0 %vm13671_vm1, %v16461_v26 }
 0x32f   :  { %12735 = vmatprep.subr.mxu0 %v16461_v26 }
 0x331   :  { %12728 = vmatmul.mubr.msk.f32.vlgmr.msra.gmra.mxu0 %vm216_vm2, %v14329_v33 }
 0x332   :  { %12736 = vmatpush3.xpose.msk.msra.mxu0 %vm216_vm2, %v14342_v38  ;;  %12737 = vmatprep.mubr.msk.f32.mxu0 %vm13671_vm1, %v16461_v26 }
 0x333   :  { %12745 = vmatprep.subr.mxu0 %v16461_v26 }
 0x335   :  { %12738 = vmatmul.mubr.msk.f32.vlgmr.msra.gmra.mxu0 %vm216_vm2, %v14342_v38 }
 0x336   :  { %12746 = vmatpush3.msra.mxu0 %v14169_v11  ;;  %12747 = vmatprep.mubr.msk.f32.mxu0 %vm13671_vm1, %v16461_v26 }
 0x337   :  { %12755 = vmatprep.subr.mxu0 %v16461_v26 }
 0x39c   :  { %v1664_v22 = vpop.f32.mrf.mxu1 }
 0x39d   :  { %2763 = vst.msk [vmem:[#allocation2] sm:$0xff] %vm216_vm2, %v1664_v22 }
 0x39e   :  { %v12584_v41 = vpop.f32.mrf.mxu1 }
 0x3a0   :  { %v1737_v0 = vpop.f32.mrf.mxu0 }
 0x3a1   :  { %2764 = vst.msk [vmem:[#allocation2 + $0x8] sm:$0xff] %vm216_vm2, %v1737_v0 }
 0x3a2   :  { %v12589_v31 = vpop.f32.mrf.mxu0 }
 0x3a4   :  { %v1810_v39 = vpop.f32.mrf.mxu1 }
 0x3a5   :  { %2765 = vst.msk [vmem:[#allocation2 + $0x10] sm:$0xff] %vm216_vm2, %v1810_v39 }
 0x3a6   :  { %v12594_v42 = vpop.f32.mrf.mxu1 }
 0x3a8   :  { %v1883_v16 = vpop.f32.mrf.mxu0 }
 0x3a9   :  { %2766 = vst.msk [vmem:[#allocation2 + $0x18] sm:$0xff] %vm216_vm2, %v1883_v16 }
 0x3aa   :  { %v12599_v45 = vpop.f32.mrf.mxu0 }
 0x3ac   :  { %v1956_v47 = vpop.f32.mrf.mxu1 }
 0x3ad   :  { %2767 = vst.msk [vmem:[#allocation2 + $0x20] sm:$0xff] %vm216_vm2, %v1956_v47 }
 0x3ae   :  { %v12604_v27 = vpop.f32.mrf.mxu1 }
 0x3b0   :  { %v2029_v56 = vpop.f32.mrf.mxu0 }
 0x3b1   :  { %2768 = vst.msk [vmem:[#allocation2 + $0x28] sm:$0xff] %vm216_vm2, %v2029_v56 }
 0x3b2   :  { %v12609_v48 = vpop.f32.mrf.mxu0 }
 0x3b4   :  { %v2102_v6 = vpop.f32.mrf.mxu1 }
 0x3b5   :  { %2769 = vst.msk [vmem:[#allocation2 + $0x30] sm:$0xff] %vm216_vm2, %v2102_v6 }
 0x3b6   :  { %v12614_v8 = vpop.f32.mrf.mxu1 }
 0x3bc   :  { %v2248_v10 = vpop.f32.mrf.mxu1 }
 0x3bd   :  { %2771 = vst.msk [vmem:[#allocation2 + $0x40] sm:$0xff] %vm216_vm2, %v2248_v10 }
 0x3be   :  { %v12624_v35 = vpop.f32.mrf.mxu1 }
 0x3c0   :  { %v2394_v11 = vpop.f32.mrf.mxu1 }
 0x3c1   :  { %2773 = vst.msk [vmem:[#allocation2 + $0x50] sm:$0xff] %vm216_vm2, %v2394_v11 }
 0x3c2   :  { %v12634_v14 = vpop.f32.mrf.mxu1 }
 0x3c4   :  { %v2540_v13 = vpop.f32.mrf.mxu1 }
 0x3c5   :  { %v2175_v55 = vpop.f32.mrf.mxu0  ;;  %2775 = vst.msk [vmem:[#allocation2 + $0x60] sm:$0xff] %vm216_vm2, %v2540_v13 }
 0x3c6   :  { %2770 = vst.msk [vmem:[#allocation2 + $0x38] sm:$0xff] %vm216_vm2, %v2175_v55  ;;  %v12644_v15 = vpop.f32.mrf.mxu1 }
 0x3c7   :  { %v12619_v18 = vpop.f32.mrf.mxu0 }
 0x3c8   :  { %v2686_v53 = vpop.f32.mrf.mxu1 }
 0x3c9   :  { %v2321_v51 = vpop.f32.mrf.mxu0  ;;  %2777 = vst.msk [vmem:[#allocation2 + $0x70] sm:$0xff] %vm216_vm2, %v2686_v53 }
 0x3ca   :  { %2772 = vst.msk [vmem:[#allocation2 + $0x48] sm:$0xff] %vm216_vm2, %v2321_v51  ;;  %v12654_v21 = vpop.f32.mrf.mxu1 }
 0x3cb   :  { %v12629_v29 = vpop.f32.mrf.mxu0 }
 0x3cc   :  { %v2849_v4 = vpop.f32.mrf.mxu1 }
 0x3cd   :  { %v2467_v44 = vpop.f32.mrf.mxu0  ;;  %v3963_v24 = vmul.f32 %v13920_v1, %v2849_v4 }
 0x3ce   :  { %2774 = vst.msk [vmem:[#allocation2 + $0x58] sm:$0xff] %vm216_vm2, %v2467_v44  ;;  %v12664_v2 = vpop.f32.mrf.mxu1 }
 0x3cf   :  { %v12639_v22 = vpop.f32.mrf.mxu0  ;;  %v14373_v41 = vadd.f32 %v3963_v24, %v13923_v3 }
 0x3d0   :  { %v2997_v0 = vpop.f32.mrf.mxu1 }
 0x3d1   :  { %v2613_v31 = vpop.f32.mrf.mxu0  ;;  %v3965_v39 = vmul.f32 %v13920_v1, %v2997_v0  ;;  %v3995_v42 = vsel %vm216_vm2, %v14373_v41, -inf }
 0x3d2   :  { %2776 = vst.msk [vmem:[#allocation2 + $0x68] sm:$0xff] %vm216_vm2, %v2613_v31  ;;  %3996 = vmax.xlane.f32.xlu0 %v3995_v42  ;;  %v12674_v16 = vpop.f32.mrf.mxu1 }
 0x3d3   :  { %v12649_v45 = vpop.f32.mrf.mxu0  ;;  %v14380_v47 = vadd.f32 %v3965_v39, %v13923_v3 }
 0x3d4   :  { %v3145_v27 = vpop.f32.mrf.mxu1 }
 0x3d5   :  { %v2759_v56 = vpop.f32.mrf.mxu0  ;;  %v4001_v48 = vsel %vm216_vm2, %v14380_v47, -inf  ;;  %v3967_v18 = vmul.f32 %v13920_v1, %v3145_v27 }
 0x3d6   :  { %2778 = vst.msk [vmem:[#allocation2 + $0x78] sm:$0xff] %vm216_vm2, %v2759_v56  ;;  %4002 = vmax.xlane.f32.xlu0 %v4001_v48  ;;  %v12684_v6 = vpop.f32.mrf.mxu1 }
 0x3d7   :  { %v12659_v8 = vpop.f32.mrf.mxu0  ;;  %v14397_v22 = vadd.f32 %v3967_v18, %v13923_v3 }
 0x3d8   :  { %v3293_v10 = vpop.f32.mrf.mxu1 }
 0x3d9   :  { %v2923_v35 = vpop.f32.mrf.mxu0  ;;  %v3969_v0 = vmul.f32 %v13920_v1, %v3293_v10  ;;  %v4007_v48 = vsel %vm216_vm2, %v14397_v22, -inf }
 0x3da   :  { %v3964_v11 = vmul.f32 %v13920_v1, %v2923_v35  ;;  %v12694_v14 = vpop.f32.mrf.mxu1 }
 0x3db   :  { %v12669_v13 = vpop.f32.mrf.mxu0 }
 0x3dc   :  { %v3441_v55 = vpop.f32.mrf.mxu1  ;;  %v14387_v15 = vadd.f32 %v3964_v11, %v13923_v3  ;;  %v14413_v11 = vadd.f32 %v3969_v0, %v13923_v3 }
 0x3dd   :  { %v3071_v53 = vpop.f32.mrf.mxu0  ;;  %v3971_v6 = vmul.f32 %v13920_v1, %v3441_v55 }
 0x3de   :  { %v3966_v51 = vmul.f32 %v13920_v1, %v3071_v53  ;;  %v12704_v21 = vpop.f32.mrf.mxu1  ;;  %v3998_v29 = vsel %vm216_vm2, %v14387_v15, -inf }
 0x3df   :  { %3999 = vmax.xlane.f32.xlu1 %v3998_v29  ;;  %v12679_v4 = vpop.f32.mrf.mxu0  ;;  %v4013_v29 = vsel %vm216_vm2, %v14413_v11, -inf }
 0x3e0   :  { %v3589_v44 = vpop.f32.mrf.mxu1  ;;  %v14394_v24 = vadd.f32 %v3966_v51, %v13923_v3 }
 0x3e1   :  { %v3219_v2 = vpop.f32.mrf.mxu0  ;;  %v3973_v53 = vmul.f32 %v13920_v1, %v3589_v44 }
 0x3e2   :  { %v3968_v31 = vmul.f32 %v13920_v1, %v3219_v2  ;;  %v12714_v39 = vpop.f32.mrf.mxu1  ;;  %v4004_v42 = vsel %vm216_vm2, %v14394_v24, -inf  ;;  %v14425_v2 = vadd.f32 %v3971_v6, %v13923_v3 }
 0x3e3   :  { %4005 = vmax.xlane.f32.xlu0 %v4004_v42  ;;  %v12689_v16 = vpop.f32.mrf.mxu0  ;;  %v14431_v39 = vadd.f32 %v3973_v53, %v13923_v3 }
 0x3e4   :  { %v3737_v45 = vpop.f32.mrf.mxu1  ;;  %v14404_v27 = vadd.f32 %v3968_v31, %v13923_v3 }
 0x3e5   :  { %v3367_v56 = vpop.f32.mrf.mxu0  ;;  %v3975_v42 = vmul.f32 %v13920_v1, %v3737_v45 }
 0x3e6   :  { %v3970_v8 = vmul.f32 %v13920_v1, %v3367_v56  ;;  %v12724_v10 = vpop.f32.mrf.mxu1  ;;  %v4010_v35 = vsel %vm216_vm2, %v14404_v27, -inf  ;;  %v4019_v56 = vsel %vm216_vm2, %v14425_v2, -inf }
 0x3e7   :  { %4008 = vmax.xlane.f32.xlu0 %v4007_v48  ;;  %4011 = vmax.xlane.f32.xlu1 %v4010_v35  ;;  %v12699_v14 = vpop.f32.mrf.mxu0  ;;  %v4025_v35 = vsel %vm216_vm2, %v14431_v39, -inf }
 0x3e8   :  { %v3885_v13 = vpop.f32.mrf.mxu1  ;;  %v14416_v18 = vadd.f32 %v3970_v8, %v13923_v3 }
 0x3e9   :  { %v3515_v51 = vpop.f32.mrf.mxu0  ;;  %v3977_v45 = vmul.f32 %v13920_v1, %v3885_v13 }
 0x3ea   :  { %v3972_v55 = vmul.f32 %v13920_v1, %v3515_v51  ;;  %v12734_v21 = vpop.f32.mrf.mxu1  ;;  %v4016_v4 = vsel %vm216_vm2, %v14416_v18, -inf  ;;  %v14449_v51 = vadd.f32 %v3975_v42, %v13923_v3 }
 0x3eb   :  { %4014 = vmax.xlane.f32.xlu0 %v4013_v29  ;;  %4017 = vmax.xlane.f32.xlu1 %v4016_v4  ;;  %v12709_v0 = vpop.f32.mrf.mxu0 }
 0x3ec   :  { %v14428_v31 = vadd.f32 %v3972_v55, %v13923_v3  ;;  %v4031_v13 = vsel %vm216_vm2, %v14449_v51, -inf }
 0x3ed   :  { %v3663_v44 = vpop.f32.mrf.mxu0 }
 0x3ee   :  { %v3974_v16 = vmul.f32 %v13920_v1, %v3663_v44  ;;  %v4022_v48 = vsel %vm216_vm2, %v14428_v31, -inf  ;;  %v14460_v44 = vadd.f32 %v3977_v45, %v13923_v3 }
 0x3ef   :  { %4020 = vmax.xlane.f32.xlu0 %v4019_v56  ;;  %4023 = vmax.xlane.f32.xlu1 %v4022_v48  ;;  %v12719_v6 = vpop.f32.mrf.mxu0 }
 0x3f0   :  { %v14440_v8 = vadd.f32 %v3974_v16, %v13923_v3  ;;  %v4037_v56 = vsel %vm216_vm2, %v14460_v44, -inf }
 0x3f1   :  { %v3811_v10 = vpop.f32.mrf.mxu0 }
 0x3f2   :  { %v3976_v14 = vmul.f32 %v13920_v1, %v3811_v10  ;;  %v4028_v53 = vsel %vm216_vm2, %v14440_v8, -inf }
 0x3f3   :  { %4026 = vmax.xlane.f32.xlu0 %v4025_v35  ;;  %4029 = vmax.xlane.f32.xlu1 %v4028_v53  ;;  %v12729_v55 = vpop.f32.mrf.mxu0 }
 0x3f4   :  { %v14452_v21 = vadd.f32 %v3976_v14, %v13923_v3 }
 0x3f5   :  { %v3959_v29 = vpop.f32.mrf.mxu0 }
 0x3f6   :  { %v3978_v4 = vmul.f32 %v13920_v1, %v3959_v29  ;;  %v4034_v0 = vsel %vm216_vm2, %v14452_v21, -inf }
 0x3f7   :  { %4032 = vmax.xlane.f32.xlu0 %v4031_v13  ;;  %4035 = vmax.xlane.f32.xlu1 %v4034_v0  ;;  %v12739_v42 = vpop.f32.mrf.mxu0 }
 0x3f8   :  { %v14463_v16 = vadd.f32 %v3978_v4, %v13923_v3 }
 0x3fa   :  { %v4040_v48 = vsel %vm216_vm2, %v14463_v16, -inf }
 0x3fb   :  { %4038 = vmax.xlane.f32.xlu0 %v4037_v56  ;;  %4041 = vmax.xlane.f32.xlu1 %v4040_v48 }
 0x45b   :  { %v3997_v6 = vpop.xlane.xlu0 %3996 }
 0x45c   :  { %v4043_v10 = vsub.f32 %v14373_v41, %v3997_v6 }
 0x45e   :  { %v4059_v35 = vmul.f32 1.442695, %v4043_v10 }
 0x45f   :  { %v4003_v45 = vpop.xlane.xlu0 %4002 }
 0x460   :  { %13317 = vpow2.f32 %v4059_v35  ;;  %v4045_v14 = vsub.f32 %v14380_v47, %v4003_v45 }
 0x462   :  { %v4063_v53 = vmul.f32 1.442695, %v4045_v14 }
 0x464   :  { %13319 = vpow2.f32 %v4063_v53 }
 0x468   :  { %v4000_v55 = vpop.xlane.xlu1 %3999 }
 0x469   :  { %v4044_v29 = vsub.f32 %v14387_v15, %v4000_v55 }
 0x46b   :  { %v4061_v4 = vmul.f32 1.442695, %v4044_v29 }
 0x46c   :  { %v4006_v13 = vpop.xlane.xlu0 %4005 }
 0x46d   :  { %v14472_v0 = vpop.eup %13317  ;;  %13321 = vpow2.f32 %v4061_v4  ;;  %v4046_v42 = vsub.f32 %v14394_v24, %v4006_v13 }
 0x46e   :  { %v4091_v41 = vsel %vm216_vm2, %v14472_v0, 0.0 }
 0x46f   :  { %v4065_v56 = vmul.f32 1.442695, %v4046_v42  ;;  %4092 = vadd.xlane.f32.xlu0 %v4091_v41 }
 0x470   :  { %v4009_v48 = vpop.xlane.xlu0 %4008  ;;  %v4012_v6 = vpop.xlane.xlu1 %4011 }
 0x471   :  { %v14477_v47 = vpop.eup %13319  ;;  %13323 = vpow2.f32 %v4065_v56  ;;  %v4047_v10 = vsub.f32 %v14397_v22, %v4009_v48  ;;  %v4048_v15 = vsub.f32 %v14404_v27, %v4012_v6 }
 0x472   :  { %v4097_v35 = vsel %vm216_vm2, %v14477_v47, 0.0 }
 0x473   :  { %v4067_v45 = vmul.f32 1.442695, %v4047_v10  ;;  %v4069_v14 = vmul.f32 1.442695, %v4048_v15  ;;  %4098 = vadd.xlane.f32.xlu0 %v4097_v35 }
 0x474   :  { %v4015_v24 = vpop.xlane.xlu0 %4014  ;;  %v4018_v53 = vpop.xlane.xlu1 %4017 }
 0x475   :  { %13325 = vpow2.f32 %v4067_v45  ;;  %v4049_v55 = vsub.f32 %v14413_v11, %v4015_v24  ;;  %v4050_v29 = vsub.f32 %v14416_v18, %v4018_v53 }
 0x476   :  { %13327 = vpow2.f32 %v4069_v14 }
 0x477   :  { %v4071_v4 = vmul.f32 1.442695, %v4049_v55  ;;  %v4073_v13 = vmul.f32 1.442695, %v4050_v29 }
 0x478   :  { %v4021_v42 = vpop.xlane.xlu0 %4020  ;;  %v4024_v22 = vpop.xlane.xlu1 %4023 }
 0x479   :  { %13329 = vpow2.f32 %v4071_v4  ;;  %v4051_v27 = vsub.f32 %v14425_v2, %v4021_v42  ;;  %v4052_v41 = vsub.f32 %v14428_v31, %v4024_v22 }
 0x47a   :  { %v14487_v56 = vpop.eup %13321  ;;  %13331 = vpow2.f32 %v4073_v13 }
 0x47b   :  { %v4075_v48 = vmul.f32 1.442695, %v4051_v27  ;;  %v4077_v6 = vmul.f32 1.442695, %v4052_v41  ;;  %v4094_v11 = vsel %vm216_vm2, %v14487_v56, 0.0 }
 0x47c   :  { %v4027_v10 = vpop.xlane.xlu0 %4026  ;;  %v4030_v18 = vpop.xlane.xlu1 %4029  ;;  %4095 = vadd.xlane.f32.xlu1 %v4094_v11 }
 0x47d   :  { %13333 = vpow2.f32 %v4075_v48  ;;  %v4053_v15 = vsub.f32 %v14431_v39, %v4027_v10  ;;  %v4054_v35 = vsub.f32 %v14440_v8, %v4030_v18 }
 0x47e   :  { %v14493_v45 = vpop.eup %13323  ;;  %13335 = vpow2.f32 %v4077_v6 }
 0x47f   :  { %v4079_v2 = vmul.f32 1.442695, %v4053_v15  ;;  %v4081_v31 = vmul.f32 1.442695, %v4054_v35  ;;  %v4100_v14 = vsel %vm216_vm2, %v14493_v45, 0.0 }
 0x480   :  { %v4033_v24 = vpop.xlane.xlu0 %4032  ;;  %v4036_v53 = vpop.xlane.xlu1 %4035  ;;  %4101 = vadd.xlane.f32.xlu1 %v4100_v14 }
 0x481   :  { %13337 = vpow2.f32 %v4079_v2  ;;  %v4055_v55 = vsub.f32 %v14449_v51, %v4033_v24  ;;  %v4056_v29 = vsub.f32 %v14452_v21, %v4036_v53 }
 0x482   :  { %v14499_v4 = vpop.eup %13325  ;;  %13339 = vpow2.f32 %v4081_v31 }
 0x483   :  { %v14501_v39 = vpop.eup %13327  ;;  %v4083_v8 = vmul.f32 1.442695, %v4055_v55  ;;  %v4085_v13 = vmul.f32 1.442695, %v4056_v29  ;;  %v4103_v42 = vsel %vm216_vm2, %v14499_v4, 0.0 }
 0x484   :  { %4104 = vadd.xlane.f32.xlu0 %v4103_v42  ;;  %v4039_v22 = vpop.xlane.xlu0 %4038  ;;  %v4106_v27 = vsel %vm216_vm2, %v14501_v39, 0.0  ;;  %v4042_v42 = vpop.xlane.xlu1 %4041 }
 0x485   :  { %13341 = vpow2.f32 %v4083_v8  ;;  %v4057_v51 = vsub.f32 %v14460_v44, %v4039_v22  ;;  %4107 = vadd.xlane.f32.xlu1 %v4106_v27  ;;  %v4058_v22 = vsub.f32 %v14463_v16, %v4042_v42 }
 0x486   :  { %v14508_v21 = vpop.eup %13329  ;;  %13343 = vpow2.f32 %v4085_v13 }
 0x487   :  { %v14510_v41 = vpop.eup %13331  ;;  %v4087_v48 = vmul.f32 1.442695, %v4057_v51  ;;  %v4109_v6 = vsel %vm216_vm2, %v14508_v21, 0.0  ;;  %v4089_v27 = vmul.f32 1.442695, %v4058_v22 }
 0x488   :  { %4110 = vadd.xlane.f32.xlu0 %v4109_v6  ;;  %v4112_v11 = vsel %vm216_vm2, %v14510_v41, 0.0 }
 0x489   :  { %13345 = vpow2.f32 %v4087_v48  ;;  %4113 = vadd.xlane.f32.xlu1 %v4112_v11 }
 0x48a   :  { %v14516_v10 = vpop.eup %13333  ;;  %13347 = vpow2.f32 %v4089_v27 }
 0x48b   :  { %v14518_v18 = vpop.eup %13335  ;;  %v4115_v44 = vsel %vm216_vm2, %v14516_v10, 0.0 }
 0x48c   :  { %4116 = vadd.xlane.f32.xlu0 %v4115_v44  ;;  %v4118_v15 = vsel %vm216_vm2, %v14518_v18, 0.0 }
 0x48d   :  { %4119 = vadd.xlane.f32.xlu1 %v4118_v15 }
 0x48e   :  { %v14524_v35 = vpop.eup %13337 }
 0x48f   :  { %v14526_v2 = vpop.eup %13339  ;;  %v4121_v31 = vsel %vm216_vm2, %v14524_v35, 0.0 }
 0x490   :  { %4122 = vadd.xlane.f32.xlu0 %v4121_v31  ;;  %v4124_v14 = vsel %vm216_vm2, %v14526_v2, 0.0 }
 0x491   :  { %4125 = vadd.xlane.f32.xlu1 %v4124_v14 }
 0x492   :  { %v14532_v24 = vpop.eup %13341 }
 0x493   :  { %v14534_v53 = vpop.eup %13343  ;;  %v4127_v55 = vsel %vm216_vm2, %v14532_v24, 0.0 }
 0x494   :  { %4128 = vadd.xlane.f32.xlu0 %v4127_v55  ;;  %v4130_v29 = vsel %vm216_vm2, %v14534_v53, 0.0 }
 0x495   :  { %4131 = vadd.xlane.f32.xlu1 %v4130_v29 }
 0x496   :  { %v14540_v8 = vpop.eup %13345 }
 0x497   :  { %v4133_v13 = vsel %vm216_vm2, %v14540_v8, 0.0  ;;  %v14554_v51 = vpop.eup %13347 }
 0x498   :  { %4134 = vadd.xlane.f32.xlu0 %v4133_v13  ;;  %v4136_v48 = vsel %vm216_vm2, %v14554_v51, 0.0 }
 0x4a6   :  { %5510 = vrot.lane.b32.xlu1 %v13760_v37, %s13673_s13 }
 0x4aa   :  { %5584 = vrot.lane.b32.xlu1 %v13770_v40, %s13673_s13 }
 0x4ae   :  { %5436 = vrot.lane.b32.xlu0 %v13754_v34, %s13673_s13 }
 0x4b2   :  { %5732 = vrot.lane.b32.xlu0 %v13790_v46, %s13673_s13 }
 0x4b6   :  { %5880 = vrot.lane.b32.xlu0 %v13818_v54, %s13673_s13 }
 0x4ba   :  { %6028 = vrot.lane.b32.xlu0 %v13856_v60, %s13673_s13 }
 0x4be   :  { %6176 = vrot.lane.b32.xlu0 %v13873_v61, %s13673_s13 }
 0x4c2   :  { %6324 = vrot.lane.b32.xlu0 %v13883_v62, %s13673_s13 }
 0x4c6   :  { %6472 = vrot.lane.b32.xlu0 %v13897_v63, %s13673_s13 }
 0x4ce   :  { %4137 = vadd.xlane.f32.xlu1 %v4136_v48 }
 0x4df   :  { %5658 = vrot.lane.b32.xlu1 %v13780_v43, %s13673_s13 }
 0x4e3   :  { %5806 = vrot.lane.b32.xlu1 %v13800_v49, %s13673_s13 }
 0x4e7   :  { %5954 = vrot.lane.b32.xlu1 %v13833_v57, %s13673_s13 }
 0x4eb   :  { %6102 = vrot.lane.b32.xlu1 %v13803_v50, %s13673_s13 }
 0x4ef   :  { %6250 = vrot.lane.b32.xlu1 %v13808_v52, %s13673_s13 }
 0x4f3   :  { %6398 = vrot.lane.b32.xlu1 %v13836_v58, %s13673_s13 }
 0x4f7   :  { %6546 = vrot.lane.b32.xlu1 %v13846_v59, %s13673_s13 }
 0x4f8   :  { %v4093_v16 = vpop.xlane.xlu0 %4092 }
 0x4f9   :  { %13349 = vrcp.f32 %v4093_v16 }
 0x4fc   :  { %v4099_v6 = vpop.xlane.xlu0 %4098 }
 0x4fd   :  { %13351 = vrcp.f32 %v4099_v6 }
 0x505   :  { %v4096_v11 = vpop.xlane.xlu1 %4095 }
 0x506   :  { %v13350_v44 = vpop.eup %13349  ;;  %13353 = vrcp.f32 %v4096_v11 }
 0x507   :  { %v4155_v15 = vmul.f32 %v13350_v44, %v14472_v0 }
 0x509   :  { %v4102_v31 = vpop.xlane.xlu1 %4101  ;;  %12743 = vmatmul.mubr.msk.f32.vlgmr.msra.gmra.mxu1 %vm216_vm2, %v4155_v15 }
 0x50a   :  { %v13352_v14 = vpop.eup %13351  ;;  %13355 = vrcp.f32 %v4102_v31  ;;  %12751 = vmatpush3.msra.mxu1 %v14186_v20  ;;  %12752 = vmatprep.mubr.msk.f32.mxu1 %vm13671_vm1, %v16461_v26 }
 0x50b   :  { %12760 = vmatprep.subr.mxu1 %v16461_v26  ;;  %v4157_v55 = vmul.f32 %v13352_v14, %v14477_v47 }
 0x50d   :  { %v4105_v29 = vpop.xlane.xlu0 %4104  ;;  %12753 = vmatmul.mubr.msk.f32.vlgmr.msra.gmra.mxu1 %vm216_vm2, %v4157_v55 }
 0x50e   :  { %13357 = vrcp.f32 %v4105_v29  ;;  %v4108_v13 = vpop.xlane.xlu1 %4107  ;;  %12761 = vmatpush3.msra.mxu1 %v14180_v19  ;;  %12762 = vmatprep.mubr.msk.f32.mxu1 %vm13671_vm1, %v16461_v26 }
 0x50f   :  { %13359 = vrcp.f32 %v4108_v13  ;;  %12770 = vmatprep.subr.mxu1 %v16461_v26 }
 0x511   :  { %v4111_v20 = vpop.xlane.xlu0 %4110 }
 0x512   :  { %13361 = vrcp.f32 %v4111_v20  ;;  %v4114_v0 = vpop.xlane.xlu1 %4113 }
 0x513   :  { %v13354_v42 = vpop.eup %13353  ;;  %13363 = vrcp.f32 %v4114_v0 }
 0x514   :  { %v4156_v47 = vmul.f32 %v13354_v42, %v14487_v56 }
 0x515   :  { %v4117_v22 = vpop.xlane.xlu0 %4116 }
 0x516   :  { %13365 = vrcp.f32 %v4117_v22  ;;  %v4120_v27 = vpop.xlane.xlu1 %4119  ;;  %12748 = vmatmul.mubr.msk.f32.vlgmr.msra.gmra.mxu0 %vm216_vm2, %v4156_v47 }
 0x517   :  { %v13356_v48 = vpop.eup %13355  ;;  %13367 = vrcp.f32 %v4120_v27  ;;  %12756 = vmatpush3.msra.mxu0 %v14209_v7  ;;  %12757 = vmatprep.mubr.msk.f32.mxu0 %vm13671_vm1, %v16461_v26 }
 0x518   :  { %12765 = vmatprep.subr.mxu0 %v16461_v26  ;;  %v4158_v19 = vmul.f32 %v13356_v48, %v14493_v45 }
 0x519   :  { %v4123_v16 = vpop.xlane.xlu0 %4122 }
 0x51a   :  { %13369 = vrcp.f32 %v4123_v16  ;;  %v4126_v6 = vpop.xlane.xlu1 %4125  ;;  %12758 = vmatmul.mubr.msk.f32.vlgmr.msra.gmra.mxu0 %vm216_vm2, %v4158_v19 }
 0x51b   :  { %v13358_v56 = vpop.eup %13357  ;;  %13371 = vrcp.f32 %v4126_v6  ;;  %12766 = vmatpush3.msra.mxu0 %v14232_v25  ;;  %12767 = vmatprep.mubr.msk.f32.mxu0 %vm13671_vm1, %v16461_v26 }
 0x51c   :  { %v13360_v7 = vpop.eup %13359  ;;  %12775 = vmatprep.subr.mxu0 %v16461_v26  ;;  %v4159_v11 = vmul.f32 %v13358_v56, %v14499_v4 }
 0x51d   :  { %v4129_v44 = vpop.xlane.xlu0 %4128  ;;  %v4160_v45 = vmul.f32 %v13360_v7, %v14501_v39 }
 0x51e   :  { %13373 = vrcp.f32 %v4129_v44  ;;  %v4132_v15 = vpop.xlane.xlu1 %4131  ;;  %12763 = vmatmul.mubr.msk.f32.vlgmr.msra.gmra.mxu1 %vm216_vm2, %v4159_v11 }
 0x51f   :  { %v13362_v31 = vpop.eup %13361  ;;  %13375 = vrcp.f32 %v4132_v15  ;;  %12768 = vmatmul.mubr.msk.f32.vlgmr.msra.gmra.mxu0 %vm216_vm2, %v4160_v45  ;;  %12771 = vmatpush3.msra.mxu1 %v14204_v5 }
 0x520   :  { %v13364_v25 = vpop.eup %13363  ;;  %12776 = vmatpush3.msra.mxu0 %v14256_v32  ;;  %12772 = vmatprep.mubr.msk.f32.mxu1 %vm13671_vm1, %v16461_v26  ;;  %v4161_v4 = vmul.f32 %v13362_v31, %v14508_v21 }
 0x521   :  { %12780 = vmatprep.subr.mxu1 %v16461_v26  ;;  %v4135_v39 = vpop.xlane.xlu0 %4134  ;;  %12777 = vmatprep.mubr.msk.f32.mxu0 %vm13671_vm1, %v16461_v26  ;;  %v4162_v14 = vmul.f32 %v13364_v25, %v14510_v41 }
 0x522   :  { %13377 = vrcp.f32 %v4135_v39  ;;  %12785 = vmatprep.subr.mxu0 %v16461_v26  ;;  %12773 = vmatmul.mubr.msk.f32.vlgmr.msra.gmra.mxu1 %vm216_vm2, %v4161_v4 }
 0x523   :  { %v13366_v5 = vpop.eup %13365  ;;  %12778 = vmatmul.mubr.msk.f32.vlgmr.msra.gmra.mxu0 %vm216_vm2, %v4162_v14  ;;  %12781 = vmatpush3.msra.mxu1 %v14227_v23 }
 0x524   :  { %v13368_v32 = vpop.eup %13367  ;;  %12786 = vmatpush3.msra.mxu0 %v14282_v30  ;;  %12782 = vmatprep.mubr.msk.f32.mxu1 %vm13671_vm1, %v16461_v26  ;;  %v4163_v21 = vmul.f32 %v13366_v5, %v14516_v10 }
 0x525   :  { %12790 = vmatprep.subr.mxu1 %v16461_v26  ;;  %12787 = vmatprep.mubr.msk.f32.mxu0 %vm13671_vm1, %v16461_v26  ;;  %v4164_v41 = vmul.f32 %v13368_v32, %v14518_v18  ;;  %v14626_v55 = vpop.permute.xlu0 %5436 }
 0x526   :  { %12795 = vmatprep.subr.mxu0 %v16461_v26  ;;  %12783 = vmatmul.mubr.msk.f32.vlgmr.msra.gmra.mxu1 %vm216_vm2, %v4163_v21 }
 0x527   :  { %v13370_v23 = vpop.eup %13369  ;;  %12788 = vmatmul.mubr.msk.f32.vlgmr.msra.gmra.mxu0 %vm216_vm2, %v4164_v41  ;;  %12791 = vmatpush3.msra.mxu1 %v14251_v9 }
 0x528   :  { %v13372_v30 = vpop.eup %13371  ;;  %12796 = vmatpush3.msra.mxu0 %v14306_v17  ;;  %12792 = vmatprep.mubr.msk.f32.mxu1 %vm13671_vm1, %v16461_v26  ;;  %v4165_v10 = vmul.f32 %v13370_v23, %v14524_v35 }
 0x529   :  { %12800 = vmatprep.subr.mxu1 %v16461_v26  ;;  %12797 = vmatprep.mubr.msk.f32.mxu0 %vm13671_vm1, %v16461_v26  ;;  %v4166_v18 = vmul.f32 %v13372_v30, %v14526_v2  ;;  %v14646_v29 = vpop.permute.xlu0 %5732 }
 0x52a   :  { %12805 = vmatprep.subr.mxu0 %v16461_v26  ;;  %12793 = vmatmul.mubr.msk.f32.vlgmr.msra.gmra.mxu1 %vm216_vm2, %v4165_v10 }
 0x52b   :  { %v13374_v9 = vpop.eup %13373  ;;  %12798 = vmatmul.mubr.msk.f32.vlgmr.msra.gmra.mxu0 %vm216_vm2, %v4166_v18  ;;  %12801 = vmatpush3.msra.mxu1 %v14276_v12 }
 0x52c   :  { %v13376_v17 = vpop.eup %13375  ;;  %12806 = vmatpush3.msra.mxu0 %v14329_v33  ;;  %12802 = vmatprep.mubr.msk.f32.mxu1 %vm13671_vm1, %v16461_v26  ;;  %v4167_v35 = vmul.f32 %v13374_v9, %v14532_v24  ;;  %v14644_v33 = vpop.permute.xlu1 %5510 }
 0x52d   :  { %12810 = vmatprep.subr.mxu1 %v16461_v26  ;;  %12807 = vmatprep.mubr.msk.f32.mxu0 %vm13671_vm1, %v16461_v26  ;;  %v4168_v2 = vmul.f32 %v13376_v17, %v14534_v53 }
 0x52e   :  { %12815 = vmatprep.subr.mxu0 %v16461_v26  ;;  %12803 = vmatmul.mubr.msk.f32.vlgmr.msra.gmra.mxu1 %vm216_vm2, %v4167_v35 }
 0x52f   :  { %v13378_v12 = vpop.eup %13377  ;;  %12808 = vmatmul.mubr.msk.f32.vlgmr.msra.gmra.mxu0 %vm216_vm2, %v4168_v2  ;;  %12811 = vmatpush3.msra.mxu1 %v14301_v36 }
 0x530   :  { %12816 = vmatpush3.msra.mxu0 %v14342_v38  ;;  %12812 = vmatprep.mubr.msk.f32.mxu1 %vm13671_vm1, %v16461_v26  ;;  %v4169_v24 = vmul.f32 %v13378_v12, %v14540_v8  ;;  %v14662_v36 = vpop.permute.xlu1 %5584  ;;  %v14664_v38 = vpop.permute.xlu0 %5880 }
 0x531   :  { %12820 = vmatprep.subr.mxu1 %v16461_v26  ;;  %12817 = vmatprep.mubr.msk.f32.mxu0 %vm13671_vm1, %v16461_v26 }
 0x532   :  { %12813 = vmatmul.mubr.msk.f32.vlgmr.msra.gmra.mxu1 %vm216_vm2, %v4169_v24  ;;  %12825 = vmatprep.subr.mxu0 %v16461_v26 }
 0x533   :  { %12821 = vmatpush3.xpose.msk.msra.mxu1 %vm216_vm2, %v14626_v55  ;;  %12822 = vmatprep.mubr.msk.f32.mxu1 %vm13671_vm1, %v16461_v26 }
 0x534   :  { %12830 = vmatprep.subr.mxu1 %v16461_v26  ;;  %v14679_v53 = vpop.permute.xlu0 %6028 }
 0x536   :  { %12823 = vmatmul.mubr.msk.f32.vlgmr.msra.gmra.mxu1 %vm216_vm2, %v14626_v55 }
 0x537   :  { %12831 = vmatpush3.xpose.msk.msra.mxu1 %vm216_vm2, %v14662_v36  ;;  %12832 = vmatprep.mubr.msk.f32.mxu1 %vm13671_vm1, %v16461_v26 }
 0x538   :  { %12840 = vmatprep.subr.mxu1 %v16461_v26  ;;  %v14689_v8 = vpop.permute.xlu0 %6176 }
 0x53a   :  { %12833 = vmatmul.mubr.msk.f32.vlgmr.msra.gmra.mxu1 %vm216_vm2, %v14662_v36 }
 0x53b   :  { %12841 = vmatpush3.xpose.msk.msra.mxu1 %vm216_vm2, %v14646_v29  ;;  %12842 = vmatprep.mubr.msk.f32.mxu1 %vm13671_vm1, %v16461_v26 }
 0x53c   :  { %12850 = vmatprep.subr.mxu1 %v16461_v26  ;;  %v14704_v13 = vpop.permute.xlu0 %6324 }
 0x53e   :  { %12843 = vmatmul.mubr.msk.f32.vlgmr.msra.gmra.mxu1 %vm216_vm2, %v14646_v29 }
 0x53f   :  { %12851 = vmatpush3.xpose.msk.msra.mxu1 %vm216_vm2, %v14664_v38  ;;  %12852 = vmatprep.mubr.msk.f32.mxu1 %vm13671_vm1, %v16461_v26 }
 0x540   :  { %12860 = vmatprep.subr.mxu1 %v16461_v26  ;;  %v14714_v20 = vpop.permute.xlu0 %6472 }
 0x542   :  { %12853 = vmatmul.mubr.msk.f32.vlgmr.msra.gmra.mxu1 %vm216_vm2, %v14664_v38 }
 0x543   :  { %12861 = vmatpush3.xpose.msk.msra.mxu1 %vm216_vm2, %v14679_v53  ;;  %12862 = vmatprep.mubr.msk.f32.mxu1 %vm13671_vm1, %v16461_v26 }
 0x544   :  { %12870 = vmatprep.subr.mxu1 %v16461_v26 }
 0x546   :  { %12863 = vmatmul.mubr.msk.f32.vlgmr.msra.gmra.mxu1 %vm216_vm2, %v14679_v53 }
 0x547   :  { %12871 = vmatpush3.xpose.msk.msra.mxu1 %vm216_vm2, %v14689_v8  ;;  %12872 = vmatprep.mubr.msk.f32.mxu1 %vm13671_vm1, %v16461_v26 }
 0x548   :  { %12880 = vmatprep.subr.mxu1 %v16461_v26 }
 0x54a   :  { %12873 = vmatmul.mubr.msk.f32.vlgmr.msra.gmra.mxu1 %vm216_vm2, %v14689_v8 }
 0x54b   :  { %12881 = vmatpush3.xpose.msk.msra.mxu1 %vm216_vm2, %v14704_v13  ;;  %12882 = vmatprep.mubr.msk.f32.mxu1 %vm13671_vm1, %v16461_v26 }
 0x54c   :  { %12890 = vmatprep.subr.mxu1 %v16461_v26 }
 0x54e   :  { %12883 = vmatmul.mubr.msk.f32.vlgmr.msra.gmra.mxu1 %vm216_vm2, %v14704_v13 }
 0x54f   :  { %12891 = vmatpush3.xpose.msk.msra.mxu1 %vm216_vm2, %v14714_v20  ;;  %12892 = vmatprep.mubr.msk.f32.mxu1 %vm13671_vm1, %v16461_v26 }
 0x550   :  { %12900 = vmatprep.subr.mxu1 %v16461_v26 }
 0x552   :  { %12893 = vmatmul.mubr.msk.f32.vlgmr.msra.gmra.mxu1 %vm216_vm2, %v14714_v20 }
 0x553   :  { %12901 = vmatpush3.msra.mxu1 %v14626_v55  ;;  %12902 = vmatprep.mubr.msk.f32.mxu1 %vm13671_vm1, %v16461_v26 }
 0x554   :  { %12910 = vmatprep.subr.mxu1 %v16461_v26 }
 0x557   :  { %v4138_v0 = vpop.xlane.xlu1 %4137 }
 0x558   :  { %13379 = vrcp.f32 %v4138_v0 }
 0x55b   :  { %v14729_v42 = vpop.permute.xlu1 %5658 }
 0x55f   :  { %v14731_v22 = vpop.permute.xlu1 %5806 }
 0x563   :  { %v14740_v48 = vpop.permute.xlu1 %5954 }
 0x565   :  { %v13380_v47 = vpop.eup %13379 }
 0x566   :  { %v4170_v27 = vmul.f32 %v13380_v47, %v14554_v51 }
 0x567   :  { %v14755_v51 = vpop.permute.xlu1 %6102 }
 0x568   :  { %12818 = vmatmul.mubr.msk.f32.vlgmr.msra.gmra.mxu0 %vm216_vm2, %v4170_v27 }
 0x569   :  { %12826 = vmatpush3.xpose.msk.msra.mxu0 %vm216_vm2, %v14644_v33  ;;  %12827 = vmatprep.mubr.msk.f32.mxu0 %vm13671_vm1, %v16461_v26 }
 0x56a   :  { %12835 = vmatprep.subr.mxu0 %v16461_v26 }
 0x56b   :  { %v14765_v19 = vpop.permute.xlu1 %6250 }
 0x56c   :  { %12828 = vmatmul.mubr.msk.f32.vlgmr.msra.gmra.mxu0 %vm216_vm2, %v14644_v33 }
 0x56d   :  { %12836 = vmatpush3.xpose.msk.msra.mxu0 %vm216_vm2, %v14729_v42  ;;  %12837 = vmatprep.mubr.msk.f32.mxu0 %vm13671_vm1, %v16461_v26 }
 0x56e   :  { %12845 = vmatprep.subr.mxu0 %v16461_v26 }
 0x56f   :  { %v14780_v16 = vpop.permute.xlu1 %6398 }
 0x570   :  { %12838 = vmatmul.mubr.msk.f32.vlgmr.msra.gmra.mxu0 %vm216_vm2, %v14729_v42 }
 0x571   :  { %12846 = vmatpush3.xpose.msk.msra.mxu0 %vm216_vm2, %v14731_v22  ;;  %12847 = vmatprep.mubr.msk.f32.mxu0 %vm13671_vm1, %v16461_v26 }
 0x572   :  { %12855 = vmatprep.subr.mxu0 %v16461_v26 }
 0x573   :  { %v14790_v6 = vpop.permute.xlu1 %6546 }
 0x574   :  { %12848 = vmatmul.mubr.msk.f32.vlgmr.msra.gmra.mxu0 %vm216_vm2, %v14731_v22 }
 0x575   :  { %12856 = vmatpush3.xpose.msk.msra.mxu0 %vm216_vm2, %v14740_v48  ;;  %12857 = vmatprep.mubr.msk.f32.mxu0 %vm13671_vm1, %v16461_v26 }
 0x576   :  { %12865 = vmatprep.subr.mxu0 %v16461_v26 }
 0x578   :  { %12858 = vmatmul.mubr.msk.f32.vlgmr.msra.gmra.mxu0 %vm216_vm2, %v14740_v48 }
 0x579   :  { %12866 = vmatpush3.xpose.msk.msra.mxu0 %vm216_vm2, %v14755_v51  ;;  %12867 = vmatprep.mubr.msk.f32.mxu0 %vm13671_vm1, %v16461_v26 }
 0x57a   :  { %12875 = vmatprep.subr.mxu0 %v16461_v26 }
 0x57c   :  { %12868 = vmatmul.mubr.msk.f32.vlgmr.msra.gmra.mxu0 %vm216_vm2, %v14755_v51 }
 0x57d   :  { %12876 = vmatpush3.xpose.msk.msra.mxu0 %vm216_vm2, %v14765_v19  ;;  %12877 = vmatprep.mubr.msk.f32.mxu0 %vm13671_vm1, %v16461_v26 }
 0x57e   :  { %12885 = vmatprep.subr.mxu0 %v16461_v26 }
 0x580   :  { %12878 = vmatmul.mubr.msk.f32.vlgmr.msra.gmra.mxu0 %vm216_vm2, %v14765_v19 }
 0x581   :  { %12886 = vmatpush3.xpose.msk.msra.mxu0 %vm216_vm2, %v14780_v16  ;;  %12887 = vmatprep.mubr.msk.f32.mxu0 %vm13671_vm1, %v16461_v26 }
 0x582   :  { %12895 = vmatprep.subr.mxu0 %v16461_v26 }
 0x584   :  { %12888 = vmatmul.mubr.msk.f32.vlgmr.msra.gmra.mxu0 %vm216_vm2, %v14780_v16 }
 0x585   :  { %12896 = vmatpush3.xpose.msk.msra.mxu0 %vm216_vm2, %v14790_v6  ;;  %12897 = vmatprep.mubr.msk.f32.mxu0 %vm13671_vm1, %v16461_v26 }
 0x586   :  { %12905 = vmatprep.subr.mxu0 %v16461_v26 }
 0x588   :  { %12898 = vmatmul.mubr.msk.f32.vlgmr.msra.gmra.mxu0 %vm216_vm2, %v14790_v6 }
 0x589   :  { %12906 = vmatpush3.msra.mxu0 %v14644_v33  ;;  %12907 = vmatprep.mubr.msk.f32.mxu0 %vm13671_vm1, %v16461_v26 }
 0x58a   :  { %12915 = vmatprep.subr.mxu0 %v16461_v26 }
 0x5c9   :  { %v14805_v56 = vpop.f32.mrf.mxu1 }
 0x5ca   :  { %16466 = vst [vmem:[#allocation10_spill] sm:$0xff] %v14805_v56 }
 0x5cb   :  { %v12744_v7 = vpop.f32.mrf.mxu1 }
 0x5cd   :  { %v14807_v11 = vpop.f32.mrf.mxu1 }
 0x5cf   :  { %v12754_v44 = vpop.f32.mrf.mxu1 }
 0x5d6   :  { %v14809_v45 = vpop.f32.mrf.mxu0 }
 0x5d8   :  { %v12749_v15 = vpop.f32.mrf.mxu0 }
 0x5da   :  { %v14811_v31 = vpop.f32.mrf.mxu0 }
 0x5db   :  { %16467 = vst [vmem:[#allocation11_spill] sm:$0xff] %v14811_v31 }
 0x5dc   :  { %v12759_v25 = vpop.f32.mrf.mxu0 }
 0x5de   :  { %v14813_v4 = vpop.f32.mrf.mxu1 }
 0x5df   :  { %16468 = vst [vmem:[#allocation12_spill] sm:$0xff] %v14813_v4  ;;  %v14815_v39 = vpop.f32.mrf.mxu0 }
 0x5e0   :  { %16469 = vst [vmem:[#allocation13_spill] sm:$0xff] %v14815_v39  ;;  %v12764_v14 = vpop.f32.mrf.mxu1 }
 0x5e1   :  { %v12769_v5 = vpop.f32.mrf.mxu0 }
 0x5e2   :  { %v14817_v32 = vpop.f32.mrf.mxu1 }
 0x5e3   :  { %16470 = vst [vmem:[#allocation14_spill] sm:$0xff] %v14817_v32  ;;  %v14819_v21 = vpop.f32.mrf.mxu0 }
 0x5e4   :  { %16471 = vst [vmem:[#allocation15_spill] sm:$0xff] %v14819_v21  ;;  %v12774_v41 = vpop.f32.mrf.mxu1 }
 0x5e5   :  { %v12779_v23 = vpop.f32.mrf.mxu0 }
 0x5e6   :  { %v14821_v30 = vpop.f32.mrf.mxu1 }
 0x5e7   :  { %16472 = vst [vmem:[#allocation16_spill] sm:$0xff] %v14821_v30  ;;  %v14823_v10 = vpop.f32.mrf.mxu0 }
 0x5e8   :  { %16473 = vst [vmem:[#allocation17_spill] sm:$0xff] %v14823_v10  ;;  %v12784_v18 = vpop.f32.mrf.mxu1 }
 0x5e9   :  { %v12789_v55 = vpop.f32.mrf.mxu0 }
 0x5ea   :  { %v14825_v9 = vpop.f32.mrf.mxu1 }
 0x5eb   :  { %16474 = vst [vmem:[#allocation18_spill] sm:$0xff] %v14825_v9  ;;  %v14827_v17 = vpop.f32.mrf.mxu0 }
 0x5ec   :  { %16475 = vst [vmem:[#allocation19_spill] sm:$0xff] %v14827_v17  ;;  %v12794_v35 = vpop.f32.mrf.mxu1 }
 0x5ed   :  { %v12799_v2 = vpop.f32.mrf.mxu0 }
 0x5ee   :  { %v14829_v12 = vpop.f32.mrf.mxu1 }
 0x5ef   :  { %16476 = vst [vmem:[#allocation20_spill] sm:$0xff] %v14829_v12  ;;  %v14831_v33 = vpop.f32.mrf.mxu0 }
 0x5f0   :  { %16477 = vst [vmem:[#allocation21_spill] sm:$0xff] %v14831_v33  ;;  %v12804_v24 = vpop.f32.mrf.mxu1 }
 0x5f1   :  { %v12809_v0 = vpop.f32.mrf.mxu0 }
 0x5f2   :  { %v14833_v47 = vpop.f32.mrf.mxu1 }
 0x5f3   :  { %16478 = vst [vmem:[#allocation22_spill] sm:$0xff] %v14833_v47 }
 0x5f4   :  { %v12814_v27 = vpop.f32.mrf.mxu1 }
 0x5f6   :  { %v5506_v7 = vpop.f32.mrf.mxu1 }
 0x5f7   :  { %v6620_v44 = vmul.f32 %v13920_v1, %v5506_v7 }
 0x5f8   :  { %v12824_v15 = vpop.f32.mrf.mxu1 }
 0x5f9   :  { %v14837_v25 = vadd.f32 %v6620_v44, %v13923_v3 }
 0x5fa   :  { %v5654_v14 = vpop.f32.mrf.mxu1 }
 0x5fb   :  { %v6622_v5 = vmul.f32 %v13920_v1, %v5654_v14  ;;  %v6652_v41 = vsel %vm216_vm2, %v14837_v25, -inf }
 0x5fc   :  { %6653 = vmax.xlane.f32.xlu0 %v6652_v41  ;;  %v12834_v23 = vpop.f32.mrf.mxu1 }
 0x5fd   :  { %v14843_v18 = vadd.f32 %v6622_v5, %v13923_v3 }
 0x5fe   :  { %v5802_v55 = vpop.f32.mrf.mxu1 }
 0x5ff   :  { %v6658_v35 = vsel %vm216_vm2, %v14843_v18, -inf }
 0x600   :  { %6659 = vmax.xlane.f32.xlu0 %v6658_v35  ;;  %v12844_v2 = vpop.f32.mrf.mxu1 }
 0x601   :  { %v6624_v2 = vmul.f32 %v13920_v1, %v5802_v55 }
 0x602   :  { %v5950_v24 = vpop.f32.mrf.mxu1 }
 0x604   :  { %v12854_v0 = vpop.f32.mrf.mxu1 }
 0x606   :  { %v6098_v27 = vpop.f32.mrf.mxu1 }
 0x608   :  { %v12864_v7 = vpop.f32.mrf.mxu1 }
 0x60a   :  { %v6246_v44 = vpop.f32.mrf.mxu1 }
 0x60c   :  { %v12874_v15 = vpop.f32.mrf.mxu1 }
 0x60e   :  { %v6394_v14 = vpop.f32.mrf.mxu1 }
 0x610   :  { %v12884_v26 = vpop.f32.mrf.mxu1 }
 0x612   :  { %v6542_v28 = vpop.f32.mrf.mxu1 }
 0x614   :  { %v12894_v41 = vpop.f32.mrf.mxu1 }
 0x628   :  { %v14847_v23 = vpop.f32.mrf.mxu0 }
 0x629   :  { %16479 = vst [vmem:[#allocation23_spill] sm:$0xff] %v14847_v23 }
 0x62a   :  { %v12819_v5 = vpop.f32.mrf.mxu0 }
 0x62b   :  { %v14861_v5 = vadd.f32 %v6624_v2, %v13923_v3 }
 0x62c   :  { %v5580_v47 = vpop.f32.mrf.mxu0 }
 0x62d   :  { %v6621_v33 = vmul.f32 %v13920_v1, %v5580_v47 }
 0x62e   :  { %v12829_v12 = vpop.f32.mrf.mxu0 }
 0x62f   :  { %v14851_v35 = vadd.f32 %v6621_v33, %v13923_v3  ;;  %v6626_v33 = vmul.f32 %v13920_v1, %v5950_v24 }
 0x630   :  { %v5728_v0 = vpop.f32.mrf.mxu0 }
 0x631   :  { %v6623_v7 = vmul.f32 %v13920_v1, %v5728_v0  ;;  %v6655_v26 = vsel %vm216_vm2, %v14851_v35, -inf  ;;  %v14873_v2 = vadd.f32 %v6626_v33, %v13923_v3 }
 0x632   :  { %6656 = vmax.xlane.f32.xlu1 %v6655_v26  ;;  %v12839_v15 = vpop.f32.mrf.mxu0 }
 0x633   :  { %v14858_v41 = vadd.f32 %v6623_v7, %v13923_v3  ;;  %v6664_v7 = vsel %vm216_vm2, %v14861_v5, -inf  ;;  %v6628_v15 = vmul.f32 %v13920_v1, %v6098_v27  ;;  %v6670_v27 = vsel %vm216_vm2, %v14873_v2, -inf }
 0x634   :  { %v5876_v12 = vpop.f32.mrf.mxu0 }
 0x635   :  { %v6625_v47 = vmul.f32 %v13920_v1, %v5876_v12  ;;  %v6661_v55 = vsel %vm216_vm2, %v14858_v41, -inf  ;;  %v14884_v9 = vadd.f32 %v6628_v15, %v13923_v3  ;;  %v6632_v15 = vmul.f32 %v13920_v1, %v6394_v14 }
 0x636   :  { %6662 = vmax.xlane.f32.xlu0 %v6661_v55  ;;  %v12849_v0 = vpop.f32.mrf.mxu0 }
 0x637   :  { %v14868_v23 = vadd.f32 %v6625_v47, %v13923_v3  ;;  %v6630_v0 = vmul.f32 %v13920_v1, %v6246_v44  ;;  %v14909_v14 = vadd.f32 %v6632_v15, %v13923_v3 }
 0x638   :  { %v6024_v26 = vpop.f32.mrf.mxu0 }
 0x639   :  { %v6627_v24 = vmul.f32 %v13920_v1, %v6024_v26  ;;  %v6667_v12 = vsel %vm216_vm2, %v14868_v23, -inf  ;;  %v14895_v44 = vadd.f32 %v6630_v0, %v13923_v3 }
 0x63a   :  { %6665 = vmax.xlane.f32.xlu0 %v6664_v7  ;;  %6668 = vmax.xlane.f32.xlu1 %v6667_v12  ;;  %v12859_v55 = vpop.f32.mrf.mxu0 }
 0x63b   :  { %v14880_v47 = vadd.f32 %v6627_v24, %v13923_v3  ;;  %v6676_v55 = vsel %vm216_vm2, %v14884_v9, -inf  ;;  %v6682_v0 = vsel %vm216_vm2, %v14895_v44, -inf }
 0x63c   :  { %v6172_v17 = vpop.f32.mrf.mxu0 }
 0x63d   :  { %v6629_v33 = vmul.f32 %v13920_v1, %v6172_v17  ;;  %v6673_v26 = vsel %vm216_vm2, %v14880_v47, -inf }
 0x63e   :  { %6671 = vmax.xlane.f32.xlu0 %v6670_v27  ;;  %6674 = vmax.xlane.f32.xlu1 %v6673_v26  ;;  %v12869_v7 = vpop.f32.mrf.mxu0 }
 0x63f   :  { %v14892_v24 = vadd.f32 %v6629_v33, %v13923_v3  ;;  %v6634_v7 = vmul.f32 %v13920_v1, %v6542_v28  ;;  %v6688_v28 = vsel %vm216_vm2, %v14909_v14, -inf }
 0x640   :  { %v6320_v12 = vpop.f32.mrf.mxu0 }
 0x641   :  { %v6631_v17 = vmul.f32 %v13920_v1, %v6320_v12  ;;  %v6679_v10 = vsel %vm216_vm2, %v14892_v24, -inf }
 0x642   :  { %6677 = vmax.xlane.f32.xlu0 %v6676_v55  ;;  %6680 = vmax.xlane.f32.xlu1 %v6679_v10  ;;  %v12879_v27 = vpop.f32.mrf.mxu0 }
 0x643   :  { %v14904_v33 = vadd.f32 %v6631_v17, %v13923_v3  ;;  %v14919_v27 = vadd.f32 %v6634_v7, %v13923_v3 }
 0x644   :  { %v6468_v26 = vpop.f32.mrf.mxu0 }
 0x645   :  { %v6633_v12 = vmul.f32 %v13920_v1, %v6468_v26  ;;  %v6685_v30 = vsel %vm216_vm2, %v14904_v33, -inf }
 0x646   :  { %6683 = vmax.xlane.f32.xlu0 %v6682_v0  ;;  %6686 = vmax.xlane.f32.xlu1 %v6685_v30  ;;  %v12889_v10 = vpop.f32.mrf.mxu0 }
 0x647   :  { %v14916_v17 = vadd.f32 %v6633_v12, %v13923_v3  ;;  %v6694_v12 = vsel %vm216_vm2, %v14919_v27, -inf }
 0x648   :  { %v6616_v55 = vpop.f32.mrf.mxu0 }
 0x649   :  { %v6635_v15 = vmul.f32 %v13920_v1, %v6616_v55  ;;  %v6691_v26 = vsel %vm216_vm2, %v14916_v17, -inf }
 0x64a   :  { %6689 = vmax.xlane.f32.xlu0 %v6688_v28  ;;  %6692 = vmax.xlane.f32.xlu1 %v6691_v26  ;;  %v12899_v0 = vpop.f32.mrf.mxu0 }
 0x64b   :  { %v14927_v30 = vadd.f32 %v6635_v15, %v13923_v3 }
 0x64d   :  { %v6697_v7 = vsel %vm216_vm2, %v14927_v30, -inf }
 0x64e   :  { %6695 = vmax.xlane.f32.xlu0 %v6694_v12  ;;  %6698 = vmax.xlane.f32.xlu1 %v6697_v7 }
 0x685   :  { %v6654_v10 = vpop.xlane.xlu0 %6653 }
 0x686   :  { %v6700_v55 = vsub.f32 %v14837_v25, %v6654_v10 }
 0x688   :  { %v6716_v21 = vmul.f32 1.442695, %v6700_v55 }
 0x689   :  { %v6660_v32 = vpop.xlane.xlu0 %6659 }
 0x68a   :  { %13381 = vpow2.f32 %v6716_v21  ;;  %v6702_v28 = vsub.f32 %v14843_v18, %v6660_v32 }
 0x68c   :  { %v6720_v26 = vmul.f32 1.442695, %v6702_v28 }
 0x68e   :  { %13383 = vpow2.f32 %v6720_v26 }
 0x697   :  { %v14935_v15 = vpop.eup %13381 }
 0x698   :  { %v6748_v0 = vsel %vm216_vm2, %v14935_v15, 0.0 }
 0x699   :  { %6749 = vadd.xlane.f32.xlu0 %v6748_v0 }
 0x69b   :  { %v14939_v39 = vpop.eup %13383 }
 0x69c   :  { %v6754_v12 = vsel %vm216_vm2, %v14939_v39, 0.0 }
 0x69d   :  { %6755 = vadd.xlane.f32.xlu0 %v6754_v12 }
 0x6bb   :  { %v6657_v25 = vpop.xlane.xlu1 %6656 }
 0x6bc   :  { %v6701_v7 = vsub.f32 %v14851_v35, %v6657_v25 }
 0x6be   :  { %v6718_v21 = vmul.f32 1.442695, %v6701_v7 }
 0x6bf   :  { %v6663_v10 = vpop.xlane.xlu0 %6662 }
 0x6c0   :  { %13385 = vpow2.f32 %v6718_v21  ;;  %v6703_v32 = vsub.f32 %v14858_v41, %v6663_v10 }
 0x6c2   :  { %v6722_v18 = vmul.f32 1.442695, %v6703_v32 }
 0x6c3   :  { %v6666_v55 = vpop.xlane.xlu0 %6665  ;;  %v6669_v28 = vpop.xlane.xlu1 %6668 }
 0x6c4   :  { %13387 = vpow2.f32 %v6722_v18  ;;  %v6704_v26 = vsub.f32 %v14861_v5, %v6666_v55  ;;  %v6705_v0 = vsub.f32 %v14868_v23, %v6669_v28 }
 0x6c6   :  { %v6724_v4 = vmul.f32 1.442695, %v6704_v26  ;;  %v6726_v31 = vmul.f32 1.442695, %v6705_v0 }
 0x6c7   :  { %v6672_v56 = vpop.xlane.xlu0 %6671  ;;  %v6675_v12 = vpop.xlane.xlu1 %6674 }
 0x6c8   :  { %13389 = vpow2.f32 %v6724_v4  ;;  %v6706_v35 = vsub.f32 %v14873_v2, %v6672_v56  ;;  %v6707_v25 = vsub.f32 %v14880_v47, %v6675_v12 }
 0x6c9   :  { %13391 = vpow2.f32 %v6726_v31 }
 0x6ca   :  { %v6728_v7 = vmul.f32 1.442695, %v6706_v35  ;;  %v6730_v41 = vmul.f32 1.442695, %v6707_v25 }
 0x6cb   :  { %v6678_v21 = vpop.xlane.xlu0 %6677  ;;  %v6681_v10 = vpop.xlane.xlu1 %6680 }
 0x6cc   :  { %13393 = vpow2.f32 %v6728_v7  ;;  %v6708_v32 = vsub.f32 %v14884_v9, %v6678_v21  ;;  %v6709_v5 = vsub.f32 %v14892_v24, %v6681_v10 }
 0x6cd   :  { %v14951_v23 = vpop.eup %13385  ;;  %13395 = vpow2.f32 %v6730_v41 }
 0x6ce   :  { %v6732_v18 = vmul.f32 1.442695, %v6708_v32  ;;  %v6734_v55 = vmul.f32 1.442695, %v6709_v5  ;;  %v6751_v56 = vsel %vm216_vm2, %v14951_v23, 0.0 }
 0x6cf   :  { %v6684_v4 = vpop.xlane.xlu0 %6683  ;;  %v6687_v2 = vpop.xlane.xlu1 %6686  ;;  %6752 = vadd.xlane.f32.xlu1 %v6751_v56 }
 0x6d0   :  { %13397 = vpow2.f32 %v6732_v18  ;;  %v6710_v31 = vsub.f32 %v14895_v44, %v6684_v4  ;;  %v6711_v47 = vsub.f32 %v14904_v33, %v6687_v2 }
 0x6d1   :  { %v14957_v28 = vpop.eup %13387  ;;  %13399 = vpow2.f32 %v6734_v55 }
 0x6d2   :  { %v6736_v9 = vmul.f32 1.442695, %v6710_v31  ;;  %v6738_v24 = vmul.f32 1.442695, %v6711_v47  ;;  %v6757_v26 = vsel %vm216_vm2, %v14957_v28, 0.0 }
 0x6d3   :  { %v6690_v0 = vpop.xlane.xlu0 %6689  ;;  %v6693_v12 = vpop.xlane.xlu1 %6692  ;;  %6758 = vadd.xlane.f32.xlu1 %v6757_v26 }
 0x6d4   :  { %13401 = vpow2.f32 %v6736_v9  ;;  %v6712_v35 = vsub.f32 %v14909_v14, %v6690_v0  ;;  %v6713_v25 = vsub.f32 %v14916_v17, %v6693_v12 }
 0x6d5   :  { %v14963_v7 = vpop.eup %13389  ;;  %13403 = vpow2.f32 %v6738_v24 }
 0x6d6   :  { %v14965_v44 = vpop.eup %13391  ;;  %v6740_v33 = vmul.f32 1.442695, %v6712_v35  ;;  %v6742_v41 = vmul.f32 1.442695, %v6713_v25  ;;  %v6760_v21 = vsel %vm216_vm2, %v14963_v7, 0.0 }
 0x6d7   :  { %6761 = vadd.xlane.f32.xlu0 %v6760_v21  ;;  %v6696_v10 = vpop.xlane.xlu0 %6695  ;;  %v6763_v32 = vsel %vm216_vm2, %v14965_v44, 0.0  ;;  %v6699_v21 = vpop.xlane.xlu1 %6698 }
 0x6d8   :  { %13405 = vpow2.f32 %v6740_v33  ;;  %v6714_v14 = vsub.f32 %v14919_v27, %v6696_v10  ;;  %6764 = vadd.xlane.f32.xlu1 %v6763_v32  ;;  %v6715_v10 = vsub.f32 %v14927_v30, %v6699_v21 }
 0x6d9   :  { %v14972_v17 = vpop.eup %13393  ;;  %13407 = vpow2.f32 %v6742_v41 }
 0x6da   :  { %v14974_v5 = vpop.eup %13395  ;;  %v6744_v18 = vmul.f32 1.442695, %v6714_v14  ;;  %v6766_v55 = vsel %vm216_vm2, %v14972_v17, 0.0  ;;  %v6746_v32 = vmul.f32 1.442695, %v6715_v10 }
 0x6db   :  { %6767 = vadd.xlane.f32.xlu0 %v6766_v55  ;;  %v6769_v56 = vsel %vm216_vm2, %v14974_v5, 0.0 }
 0x6dc   :  { %13409 = vpow2.f32 %v6744_v18  ;;  %6770 = vadd.xlane.f32.xlu1 %v6769_v56 }
 0x6dd   :  { %v14980_v4 = vpop.eup %13397  ;;  %13411 = vpow2.f32 %v6746_v32 }
 0x6de   :  { %v14982_v2 = vpop.eup %13399  ;;  %v6772_v27 = vsel %vm216_vm2, %v14980_v4, 0.0 }
 0x6df   :  { %6773 = vadd.xlane.f32.xlu0 %v6772_v27  ;;  %v6775_v31 = vsel %vm216_vm2, %v14982_v2, 0.0 }
 0x6e0   :  { %6776 = vadd.xlane.f32.xlu1 %v6775_v31 }
 0x6e1   :  { %v14988_v47 = vpop.eup %13401 }
 0x6e2   :  { %v14990_v9 = vpop.eup %13403  ;;  %v6778_v24 = vsel %vm216_vm2, %v14988_v47, 0.0 }
 0x6e3   :  { %6779 = vadd.xlane.f32.xlu0 %v6778_v24  ;;  %v6781_v26 = vsel %vm216_vm2, %v14990_v9, 0.0 }
 0x6e4   :  { %6782 = vadd.xlane.f32.xlu1 %v6781_v26 }
 0x6e5   :  { %v14996_v0 = vpop.eup %13405 }
 0x6e6   :  { %v14998_v12 = vpop.eup %13407  ;;  %v6784_v35 = vsel %vm216_vm2, %v14996_v0, 0.0 }
 0x6e7   :  { %6785 = vadd.xlane.f32.xlu0 %v6784_v35  ;;  %v6787_v25 = vsel %vm216_vm2, %v14998_v12, 0.0 }
 0x6e8   :  { %6788 = vadd.xlane.f32.xlu1 %v6787_v25 }
 0x6e9   :  { %v15004_v33 = vpop.eup %13409 }
 0x6ea   :  { %v6790_v41 = vsel %vm216_vm2, %v15004_v33, 0.0 }
 0x6eb   :  { %6791 = vadd.xlane.f32.xlu0 %v6790_v41 }
 0x6f9   :  { %8167 = vrot.lane.b32.xlu1 %v13760_v37, %s13674_s14 }
 0x6fd   :  { %8241 = vrot.lane.b32.xlu1 %v13770_v40, %s13674_s14 }
 0x701   :  { %8093 = vrot.lane.b32.xlu0 %v13754_v34, %s13674_s14  ;;  %v15027_v34 = vpop.eup %13411 }
 0x702   :  { %v6793_v37 = vsel %vm216_vm2, %v15027_v34, 0.0 }
 0x705   :  { %8389 = vrot.lane.b32.xlu0 %v13790_v46, %s13674_s14 }
 0x709   :  { %8537 = vrot.lane.b32.xlu0 %v13818_v54, %s13674_s14 }
 0x70d   :  { %8685 = vrot.lane.b32.xlu0 %v13856_v60, %s13674_s14 }
 0x711   :  { %8833 = vrot.lane.b32.xlu0 %v13873_v61, %s13674_s14 }
 0x715   :  { %8981 = vrot.lane.b32.xlu0 %v13883_v62, %s13674_s14  ;;  %v16480_v62 = vmov 0.0  }
 0x719   :  { %9129 = vrot.lane.b32.xlu0 %v13897_v63, %s13674_s14 }
 0x721   :  { %6794 = vadd.xlane.f32.xlu1 %v6793_v37 }
 0x722   :  { %v6750_v40 = vpop.xlane.xlu0 %6749 }
 0x723   :  { %13413 = vrcp.f32 %v6750_v40 }
 0x726   :  { %v6756_v46 = vpop.xlane.xlu0 %6755 }
 0x727   :  { %13415 = vrcp.f32 %v6756_v46 }
 0x730   :  { %v13414_v54 = vpop.eup %13413 }
 0x731   :  { %v6812_v60 = vmul.f32 %v13414_v54, %v14935_v15 }
 0x732   :  { %8315 = vrot.lane.b32.xlu1 %v13780_v43, %s13674_s14 }
 0x733   :  { %12903 = vmatmul.mubr.msk.f32.vlgmr.msra.gmra.mxu1 %vm216_vm2, %v6812_v60 }
 0x734   :  { %v13416_v61 = vpop.eup %13415  ;;  %12911 = vmatpush3.msra.mxu1 %v14662_v36  ;;  %12912 = vmatprep.mubr.msk.f32.mxu1 %vm13671_vm1, %v16480_v62 }
 0x735   :  { %12920 = vmatprep.subr.mxu1 %v16480_v62  ;;  %v6814_v63 = vmul.f32 %v13416_v61, %v14939_v39 }
 0x736   :  { %8463 = vrot.lane.b32.xlu1 %v13800_v49, %s13674_s14 }
 0x737   :  { %12913 = vmatmul.mubr.msk.f32.vlgmr.msra.gmra.mxu1 %vm216_vm2, %v6814_v63 }
 0x738   :  { %12921 = vmatpush3.msra.mxu1 %v14646_v29  ;;  %12922 = vmatprep.mubr.msk.f32.mxu1 %vm13671_vm1, %v16480_v62 }
 0x739   :  { %12930 = vmatprep.subr.mxu1 %v16480_v62 }
 0x73a   :  { %8611 = vrot.lane.b32.xlu1 %v13833_v57, %s13674_s14 }
 0x73e   :  { %8759 = vrot.lane.b32.xlu1 %v13803_v50, %s13674_s14 }
 0x742   :  { %8907 = vrot.lane.b32.xlu1 %v13808_v52, %s13674_s14 }
 0x746   :  { %9055 = vrot.lane.b32.xlu1 %v13836_v58, %s13674_s14 }
 0x74a   :  { %9203 = vrot.lane.b32.xlu1 %v13846_v59, %s13674_s14 }
 0x758   :  { %v6753_v43 = vpop.xlane.xlu1 %6752 }
 0x759   :  { %13417 = vrcp.f32 %v6753_v43 }
 0x75c   :  { %v6759_v49 = vpop.xlane.xlu1 %6758 }
 0x75d   :  { %13419 = vrcp.f32 %v6759_v49 }
 0x760   :  { %v6762_v29 = vpop.xlane.xlu0 %6761 }
 0x761   :  { %13421 = vrcp.f32 %v6762_v29  ;;  %v6765_v36 = vpop.xlane.xlu1 %6764 }
 0x762   :  { %13423 = vrcp.f32 %v6765_v36 }
 0x764   :  { %v6768_v57 = vpop.xlane.xlu0 %6767 }
 0x765   :  { %13425 = vrcp.f32 %v6768_v57  ;;  %v6771_v50 = vpop.xlane.xlu1 %6770 }
 0x766   :  { %v13418_v39 = vpop.eup %13417  ;;  %13427 = vrcp.f32 %v6771_v50 }
 0x767   :  { %v6813_v52 = vmul.f32 %v13418_v39, %v14951_v23 }
 0x768   :  { %v6774_v30 = vpop.xlane.xlu0 %6773 }
 0x769   :  { %13429 = vrcp.f32 %v6774_v30  ;;  %v6777_v58 = vpop.xlane.xlu1 %6776  ;;  %12908 = vmatmul.mubr.msk.f32.vlgmr.msra.gmra.mxu0 %vm216_vm2, %v6813_v52 }
 0x76a   :  { %v13420_v59 = vpop.eup %13419  ;;  %13431 = vrcp.f32 %v6777_v58  ;;  %12916 = vmatpush3.msra.mxu0 %v14729_v42  ;;  %12917 = vmatprep.mubr.msk.f32.mxu0 %vm13671_vm1, %v16480_v62 }
 0x76b   :  { %12925 = vmatprep.subr.mxu0 %v16480_v62  ;;  %v6815_v15 = vmul.f32 %v13420_v59, %v14957_v28 }
 0x76c   :  { %v6780_v14 = vpop.xlane.xlu0 %6779 }
 0x76d   :  { %13433 = vrcp.f32 %v6780_v14  ;;  %v6783_v18 = vpop.xlane.xlu1 %6782  ;;  %12918 = vmatmul.mubr.msk.f32.vlgmr.msra.gmra.mxu0 %vm216_vm2, %v6815_v15 }
 0x76e   :  { %v13422_v23 = vpop.eup %13421  ;;  %13435 = vrcp.f32 %v6783_v18  ;;  %12926 = vmatpush3.msra.mxu0 %v14731_v22  ;;  %12927 = vmatprep.mubr.msk.f32.mxu0 %vm13671_vm1, %v16480_v62 }
 0x76f   :  { %v13424_v42 = vpop.eup %13423  ;;  %12935 = vmatprep.subr.mxu0 %v16480_v62  ;;  %v6816_v55 = vmul.f32 %v13422_v23, %v14963_v7 }
 0x770   :  { %v6786_v56 = vpop.xlane.xlu0 %6785  ;;  %v6817_v28 = vmul.f32 %v13424_v42, %v14965_v44 }
 0x771   :  { %13437 = vrcp.f32 %v6786_v56  ;;  %v6789_v27 = vpop.xlane.xlu1 %6788  ;;  %12923 = vmatmul.mubr.msk.f32.vlgmr.msra.gmra.mxu1 %vm216_vm2, %v6816_v55 }
 0x772   :  { %v13426_v31 = vpop.eup %13425  ;;  %13439 = vrcp.f32 %v6789_v27  ;;  %12928 = vmatmul.mubr.msk.f32.vlgmr.msra.gmra.mxu0 %vm216_vm2, %v6817_v28  ;;  %12931 = vmatpush3.msra.mxu1 %v14664_v38 }
 0x773   :  { %v13428_v22 = vpop.eup %13427  ;;  %12936 = vmatpush3.msra.mxu0 %v14740_v48  ;;  %12932 = vmatprep.mubr.msk.f32.mxu1 %vm13671_vm1, %v16480_v62  ;;  %v6818_v7 = vmul.f32 %v13426_v31, %v14972_v17 }
 0x774   :  { %12940 = vmatprep.subr.mxu1 %v16480_v62  ;;  %v6792_v44 = vpop.xlane.xlu0 %6791  ;;  %12937 = vmatprep.mubr.msk.f32.mxu0 %vm13671_vm1, %v16480_v62  ;;  %v6819_v24 = vmul.f32 %v13428_v22, %v14974_v5 }
 0x775   :  { %13441 = vrcp.f32 %v6792_v44  ;;  %12945 = vmatprep.subr.mxu0 %v16480_v62  ;;  %12933 = vmatmul.mubr.msk.f32.vlgmr.msra.gmra.mxu1 %vm216_vm2, %v6818_v7 }
 0x776   :  { %v13430_v38 = vpop.eup %13429  ;;  %12938 = vmatmul.mubr.msk.f32.vlgmr.msra.gmra.mxu0 %vm216_vm2, %v6819_v24  ;;  %12941 = vmatpush3.msra.mxu1 %v14679_v53 }
 0x777   :  { %v13432_v48 = vpop.eup %13431  ;;  %12946 = vmatpush3.msra.mxu0 %v14755_v51  ;;  %12942 = vmatprep.mubr.msk.f32.mxu1 %vm13671_vm1, %v16480_v62  ;;  %v6820_v17 = vmul.f32 %v13430_v38, %v14980_v4 }
 0x778   :  { %12950 = vmatprep.subr.mxu1 %v16480_v62  ;;  %12947 = vmatprep.mubr.msk.f32.mxu0 %vm13671_vm1, %v16480_v62  ;;  %v6821_v5 = vmul.f32 %v13432_v48, %v14982_v2  ;;  %v15106_v26 = vpop.permute.xlu0 %8093 }
 0x779   :  { %12955 = vmatprep.subr.mxu0 %v16480_v62  ;;  %12943 = vmatmul.mubr.msk.f32.vlgmr.msra.gmra.mxu1 %vm216_vm2, %v6820_v17 }
 0x77a   :  { %v13434_v53 = vpop.eup %13433  ;;  %12948 = vmatmul.mubr.msk.f32.vlgmr.msra.gmra.mxu0 %vm216_vm2, %v6821_v5  ;;  %12951 = vmatpush3.msra.mxu1 %v14689_v8 }
 0x77b   :  { %v13436_v51 = vpop.eup %13435  ;;  %12956 = vmatpush3.msra.mxu0 %v14765_v19  ;;  %12952 = vmatprep.mubr.msk.f32.mxu1 %vm13671_vm1, %v16480_v62  ;;  %v6822_v4 = vmul.f32 %v13434_v53, %v14988_v47 }
 0x77c   :  { %12960 = vmatprep.subr.mxu1 %v16480_v62  ;;  %12957 = vmatprep.mubr.msk.f32.mxu0 %vm13671_vm1, %v16480_v62  ;;  %v6823_v2 = vmul.f32 %v13436_v51, %v14990_v9  ;;  %v15126_v35 = vpop.permute.xlu0 %8389 }
 0x77d   :  { %12965 = vmatprep.subr.mxu0 %v16480_v62  ;;  %12953 = vmatmul.mubr.msk.f32.vlgmr.msra.gmra.mxu1 %vm216_vm2, %v6822_v4 }
 0x77e   :  { %v13438_v8 = vpop.eup %13437  ;;  %12958 = vmatmul.mubr.msk.f32.vlgmr.msra.gmra.mxu0 %vm216_vm2, %v6823_v2  ;;  %12961 = vmatpush3.msra.mxu1 %v14704_v13 }
 0x77f   :  { %v13440_v19 = vpop.eup %13439  ;;  %12966 = vmatpush3.msra.mxu0 %v14780_v16  ;;  %12962 = vmatprep.mubr.msk.f32.mxu1 %vm13671_vm1, %v16480_v62  ;;  %v6824_v47 = vmul.f32 %v13438_v8, %v14996_v0  ;;  %v15124_v16 = vpop.permute.xlu1 %8167 }
 0x780   :  { %12970 = vmatprep.subr.mxu1 %v16480_v62  ;;  %12967 = vmatprep.mubr.msk.f32.mxu0 %vm13671_vm1, %v16480_v62  ;;  %v6825_v9 = vmul.f32 %v13440_v19, %v14998_v12 }
 0x781   :  { %12975 = vmatprep.subr.mxu0 %v16480_v62  ;;  %12963 = vmatmul.mubr.msk.f32.vlgmr.msra.gmra.mxu1 %vm216_vm2, %v6824_v47 }
 0x782   :  { %v13442_v13 = vpop.eup %13441  ;;  %12968 = vmatmul.mubr.msk.f32.vlgmr.msra.gmra.mxu0 %vm216_vm2, %v6825_v9  ;;  %12971 = vmatpush3.msra.mxu1 %v14714_v20 }
 0x783   :  { %12976 = vmatpush3.msra.mxu0 %v14790_v6  ;;  %12972 = vmatprep.mubr.msk.f32.mxu1 %vm13671_vm1, %v16480_v62  ;;  %v6826_v0 = vmul.f32 %v13442_v13, %v15004_v33  ;;  %v15142_v20 = vpop.permute.xlu1 %8241  ;;  %v15144_v6 = vpop.permute.xlu0 %8537 }
 0x784   :  { %12980 = vmatprep.subr.mxu1 %v16480_v62  ;;  %12977 = vmatprep.mubr.msk.f32.mxu0 %vm13671_vm1, %v16480_v62 }
 0x785   :  { %12973 = vmatmul.mubr.msk.f32.vlgmr.msra.gmra.mxu1 %vm216_vm2, %v6826_v0  ;;  %12985 = vmatprep.subr.mxu0 %v16480_v62 }
 0x786   :  { %12981 = vmatpush3.xpose.msk.msra.mxu1 %vm216_vm2, %v15106_v26  ;;  %12982 = vmatprep.mubr.msk.f32.mxu1 %vm13671_vm1, %v16480_v62 }
 0x787   :  { %12990 = vmatprep.subr.mxu1 %v16480_v62  ;;  %v15159_v12 = vpop.permute.xlu0 %8685 }
 0x789   :  { %12983 = vmatmul.mubr.msk.f32.vlgmr.msra.gmra.mxu1 %vm216_vm2, %v15106_v26 }
 0x78a   :  { %12991 = vmatpush3.xpose.msk.msra.mxu1 %vm216_vm2, %v15142_v20  ;;  %12992 = vmatprep.mubr.msk.f32.mxu1 %vm13671_vm1, %v16480_v62 }
 0x78b   :  { %13000 = vmatprep.subr.mxu1 %v16480_v62  ;;  %v15169_v25 = vpop.permute.xlu0 %8833 }
 0x78d   :  { %12993 = vmatmul.mubr.msk.f32.vlgmr.msra.gmra.mxu1 %vm216_vm2, %v15142_v20 }
 0x78e   :  { %13001 = vmatpush3.xpose.msk.msra.mxu1 %vm216_vm2, %v15126_v35  ;;  %13002 = vmatprep.mubr.msk.f32.mxu1 %vm13671_vm1, %v16480_v62 }
 0x78f   :  { %13010 = vmatprep.subr.mxu1 %v16480_v62  ;;  %v15184_v33 = vpop.permute.xlu0 %8981 }
 0x791   :  { %13003 = vmatmul.mubr.msk.f32.vlgmr.msra.gmra.mxu1 %vm216_vm2, %v15126_v35 }
 0x792   :  { %13011 = vmatpush3.xpose.msk.msra.mxu1 %vm216_vm2, %v15144_v6  ;;  %13012 = vmatprep.mubr.msk.f32.mxu1 %vm13671_vm1, %v16480_v62 }
 0x793   :  { %13020 = vmatprep.subr.mxu1 %v16480_v62  ;;  %v15194_v41 = vpop.permute.xlu0 %9129 }
 0x795   :  { %13013 = vmatmul.mubr.msk.f32.vlgmr.msra.gmra.mxu1 %vm216_vm2, %v15144_v6 }
 0x796   :  { %13021 = vmatpush3.xpose.msk.msra.mxu1 %vm216_vm2, %v15159_v12  ;;  %13022 = vmatprep.mubr.msk.f32.mxu1 %vm13671_vm1, %v16480_v62 }
 0x797   :  { %13030 = vmatprep.subr.mxu1 %v16480_v62 }
 0x799   :  { %13023 = vmatmul.mubr.msk.f32.vlgmr.msra.gmra.mxu1 %vm216_vm2, %v15159_v12 }
 0x79a   :  { %13031 = vmatpush3.xpose.msk.msra.mxu1 %vm216_vm2, %v15169_v25  ;;  %13032 = vmatprep.mubr.msk.f32.mxu1 %vm13671_vm1, %v16480_v62 }
 0x79b   :  { %13040 = vmatprep.subr.mxu1 %v16480_v62 }
 0x79d   :  { %13033 = vmatmul.mubr.msk.f32.vlgmr.msra.gmra.mxu1 %vm216_vm2, %v15169_v25 }
 0x79e   :  { %13041 = vmatpush3.xpose.msk.msra.mxu1 %vm216_vm2, %v15184_v33  ;;  %13042 = vmatprep.mubr.msk.f32.mxu1 %vm13671_vm1, %v16480_v62 }
 0x79f   :  { %13050 = vmatprep.subr.mxu1 %v16480_v62 }
 0x7a1   :  { %13043 = vmatmul.mubr.msk.f32.vlgmr.msra.gmra.mxu1 %vm216_vm2, %v15184_v33 }
 0x7a2   :  { %13051 = vmatpush3.xpose.msk.msra.mxu1 %vm216_vm2, %v15194_v41  ;;  %13052 = vmatprep.mubr.msk.f32.mxu1 %vm13671_vm1, %v16480_v62 }
 0x7a3   :  { %13060 = vmatprep.subr.mxu1 %v16480_v62 }
 0x7a5   :  { %13053 = vmatmul.mubr.msk.f32.vlgmr.msra.gmra.mxu1 %vm216_vm2, %v15194_v41 }
 0x7a6   :  { %13061 = vmatpush3.msra.mxu1 %v15106_v26  ;;  %13062 = vmatprep.mubr.msk.f32.mxu1 %vm13671_vm1, %v16480_v62 }
 0x7a7   :  { %13070 = vmatprep.subr.mxu1 %v16480_v62 }
 0x7aa   :  { %v6795_v21 = vpop.xlane.xlu1 %6794 }
 0x7ab   :  { %13443 = vrcp.f32 %v6795_v21 }
 0x7ae   :  { %v15209_v10 = vpop.permute.xlu1 %8315 }
 0x7b2   :  { %v15211_v37 = vpop.permute.xlu1 %8463 }
 0x7b6   :  { %v15220_v46 = vpop.permute.xlu1 %8611 }
 0x7b8   :  { %v13444_v32 = vpop.eup %13443 }
 0x7b9   :  { %v6827_v40 = vmul.f32 %v13444_v32, %v15027_v34 }
 0x7ba   :  { %v15235_v34 = vpop.permute.xlu1 %8759 }
 0x7bb   :  { %12978 = vmatmul.mubr.msk.f32.vlgmr.msra.gmra.mxu0 %vm216_vm2, %v6827_v40 }
 0x7bc   :  { %12986 = vmatpush3.xpose.msk.msra.mxu0 %vm216_vm2, %v15124_v16  ;;  %12987 = vmatprep.mubr.msk.f32.mxu0 %vm13671_vm1, %v16480_v62 }
 0x7bd   :  { %12995 = vmatprep.subr.mxu0 %v16480_v62 }
 0x7be   :  { %v15245_v54 = vpop.permute.xlu1 %8907 }
 0x7bf   :  { %12988 = vmatmul.mubr.msk.f32.vlgmr.msra.gmra.mxu0 %vm216_vm2, %v15124_v16 }
 0x7c0   :  { %12996 = vmatpush3.xpose.msk.msra.mxu0 %vm216_vm2, %v15209_v10  ;;  %12997 = vmatprep.mubr.msk.f32.mxu0 %vm13671_vm1, %v16480_v62 }
 0x7c1   :  { %13005 = vmatprep.subr.mxu0 %v16480_v62 }
 0x7c2   :  { %v15260_v60 = vpop.permute.xlu1 %9055 }
 0x7c3   :  { %12998 = vmatmul.mubr.msk.f32.vlgmr.msra.gmra.mxu0 %vm216_vm2, %v15209_v10 }
 0x7c4   :  { %13006 = vmatpush3.xpose.msk.msra.mxu0 %vm216_vm2, %v15211_v37  ;;  %13007 = vmatprep.mubr.msk.f32.mxu0 %vm13671_vm1, %v16480_v62 }
 0x7c5   :  { %13015 = vmatprep.subr.mxu0 %v16480_v62 }
 0x7c6   :  { %v15270_v61 = vpop.permute.xlu1 %9203 }
 0x7c7   :  { %13008 = vmatmul.mubr.msk.f32.vlgmr.msra.gmra.mxu0 %vm216_vm2, %v15211_v37 }
 0x7c8   :  { %13016 = vmatpush3.xpose.msk.msra.mxu0 %vm216_vm2, %v15220_v46  ;;  %13017 = vmatprep.mubr.msk.f32.mxu0 %vm13671_vm1, %v16480_v62 }
 0x7c9   :  { %13025 = vmatprep.subr.mxu0 %v16480_v62 }
 0x7cb   :  { %13018 = vmatmul.mubr.msk.f32.vlgmr.msra.gmra.mxu0 %vm216_vm2, %v15220_v46 }
 0x7cc   :  { %13026 = vmatpush3.xpose.msk.msra.mxu0 %vm216_vm2, %v15235_v34  ;;  %13027 = vmatprep.mubr.msk.f32.mxu0 %vm13671_vm1, %v16480_v62 }
 0x7cd   :  { %13035 = vmatprep.subr.mxu0 %v16480_v62 }
 0x7cf   :  { %13028 = vmatmul.mubr.msk.f32.vlgmr.msra.gmra.mxu0 %vm216_vm2, %v15235_v34 }
 0x7d0   :  { %13036 = vmatpush3.xpose.msk.msra.mxu0 %vm216_vm2, %v15245_v54  ;;  %13037 = vmatprep.mubr.msk.f32.mxu0 %vm13671_vm1, %v16480_v62 }
 0x7d1   :  { %13045 = vmatprep.subr.mxu0 %v16480_v62 }
 0x7d3   :  { %13038 = vmatmul.mubr.msk.f32.vlgmr.msra.gmra.mxu0 %vm216_vm2, %v15245_v54 }
 0x7d4   :  { %13046 = vmatpush3.xpose.msk.msra.mxu0 %vm216_vm2, %v15260_v60  ;;  %13047 = vmatprep.mubr.msk.f32.mxu0 %vm13671_vm1, %v16480_v62 }
 0x7d5   :  { %13055 = vmatprep.subr.mxu0 %v16480_v62 }
 0x7d7   :  { %13048 = vmatmul.mubr.msk.f32.vlgmr.msra.gmra.mxu0 %vm216_vm2, %v15260_v60 }
 0x7d8   :  { %13056 = vmatpush3.xpose.msk.msra.mxu0 %vm216_vm2, %v15270_v61  ;;  %13057 = vmatprep.mubr.msk.f32.mxu0 %vm13671_vm1, %v16480_v62 }
 0x7d9   :  { %13065 = vmatprep.subr.mxu0 %v16480_v62 }
 0x7db   :  { %13058 = vmatmul.mubr.msk.f32.vlgmr.msra.gmra.mxu0 %vm216_vm2, %v15270_v61 }
 0x7dc   :  { %13066 = vmatpush3.msra.mxu0 %v15124_v16  ;;  %13067 = vmatprep.mubr.msk.f32.mxu0 %vm13671_vm1, %v16480_v62 }
 0x7dd   :  { %13075 = vmatprep.subr.mxu0 %v16480_v62 }
 0x7f3   :  { %v15285_v63 = vpop.f32.mrf.mxu1 }
 0x7f5   :  { %v12904_v43 = vpop.f32.mrf.mxu1 }
 0x7f7   :  { %v15287_v49 = vpop.f32.mrf.mxu1 }
 0x7f9   :  { %v12914_v29 = vpop.f32.mrf.mxu1 }
 0x829   :  { %v15289_v36 = vpop.f32.mrf.mxu0 }
 0x82b   :  { %v12909_v57 = vpop.f32.mrf.mxu0 }
 0x82d   :  { %v15291_v50 = vpop.f32.mrf.mxu0 }
 0x82f   :  { %v12919_v39 = vpop.f32.mrf.mxu0 }
 0x831   :  { %v15293_v52 = vpop.f32.mrf.mxu1 }
 0x832   :  { %v15295_v30 = vpop.f32.mrf.mxu0 }
 0x833   :  { %v12924_v58 = vpop.f32.mrf.mxu1 }
 0x834   :  { %v12929_v59 = vpop.f32.mrf.mxu0 }
 0x835   :  { %v15297_v15 = vpop.f32.mrf.mxu1 }
 0x836   :  { %v15299_v14 = vpop.f32.mrf.mxu0 }
 0x837   :  { %v12934_v18 = vpop.f32.mrf.mxu1 }
 0x838   :  { %v12939_v23 = vpop.f32.mrf.mxu0 }
 0x839   :  { %v15301_v42 = vpop.f32.mrf.mxu1 }
 0x83a   :  { %v15303_v55 = vpop.f32.mrf.mxu0 }
 0x83b   :  { %v12944_v56 = vpop.f32.mrf.mxu1 }
 0x83c   :  { %v12949_v28 = vpop.f32.mrf.mxu0 }
 0x83d   :  { %v15305_v27 = vpop.f32.mrf.mxu1 }
 0x83e   :  { %v15307_v31 = vpop.f32.mrf.mxu0 }
 0x83f   :  { %v12954_v22 = vpop.f32.mrf.mxu1 }
 0x840   :  { %v12959_v7 = vpop.f32.mrf.mxu0 }
 0x841   :  { %v15309_v44 = vpop.f32.mrf.mxu1 }
 0x842   :  { %v15311_v24 = vpop.f32.mrf.mxu0 }
 0x843   :  { %v12964_v38 = vpop.f32.mrf.mxu1 }
 0x844   :  { %v12969_v48 = vpop.f32.mrf.mxu0 }
 0x845   :  { %v15313_v17 = vpop.f32.mrf.mxu1 }
 0x847   :  { %v12974_v5 = vpop.f32.mrf.mxu1 }
 0x849   :  { %v8163_v53 = vpop.f32.mrf.mxu1 }
 0x84a   :  { %v9277_v51 = vmul.f32 %v13920_v1, %v8163_v53 }
 0x84b   :  { %v12984_v4 = vpop.f32.mrf.mxu1 }
 0x84c   :  { %v15317_v2 = vadd.f32 %v9277_v51, %v13923_v3 }
 0x84d   :  { %v8311_v26 = vpop.f32.mrf.mxu1 }
 0x84e   :  { %v9279_v8 = vmul.f32 %v13920_v1, %v8311_v26  ;;  %v9309_v19 = vsel %vm216_vm2, %v15317_v2, -inf }
 0x84f   :  { %9310 = vmax.xlane.f32.xlu0 %v9309_v19  ;;  %v12994_v47 = vpop.f32.mrf.mxu1 }
 0x850   :  { %v15323_v9 = vadd.f32 %v9279_v8, %v13923_v3 }
 0x851   :  { %v8459_v13 = vpop.f32.mrf.mxu1 }
 0x852   :  { %v9315_v16 = vsel %vm216_vm2, %v15323_v9, -inf  ;;  %v9281_v48 = vmul.f32 %v13920_v1, %v8459_v13 }
 0x853   :  { %9316 = vmax.xlane.f32.xlu0 %v9315_v16  ;;  %v13004_v0 = vpop.f32.mrf.mxu1 }
 0x854   :  { %v15341_v8 = vadd.f32 %v9281_v48, %v13923_v3 }
 0x855   :  { %v8607_v21 = vpop.f32.mrf.mxu1 }
 0x856   :  { %v9283_v47 = vmul.f32 %v13920_v1, %v8607_v21 }
 0x857   :  { %v13014_v32 = vpop.f32.mrf.mxu1 }
 0x859   :  { %v8755_v40 = vpop.f32.mrf.mxu1 }
 0x85b   :  { %v13024_v43 = vpop.f32.mrf.mxu1 }
 0x85d   :  { %v8903_v29 = vpop.f32.mrf.mxu1 }
 0x85f   :  { %v13034_v57 = vpop.f32.mrf.mxu1 }
 0x860   :  { %v9321_v57 = vsel %vm216_vm2, %v15341_v8, -inf }
 0x861   :  { %v9051_v39 = vpop.f32.mrf.mxu1 }
 0x863   :  { %v13044_v58 = vpop.f32.mrf.mxu1 }
 0x864   :  { %v15353_v58 = vadd.f32 %v9283_v47, %v13923_v3 }
 0x865   :  { %v9199_v59 = vpop.f32.mrf.mxu1 }
 0x867   :  { %v13054_v18 = vpop.f32.mrf.mxu1 }
 0x868   :  { %v9285_v18 = vmul.f32 %v13920_v1, %v8755_v40  ;;  %v9327_v40 = vsel %vm216_vm2, %v15353_v58, -inf }
 0x87b   :  { %v15327_v23 = vpop.f32.mrf.mxu0 }
 0x87d   :  { %v12979_v56 = vpop.f32.mrf.mxu0 }
 0x87f   :  { %v8237_v28 = vpop.f32.mrf.mxu0 }
 0x880   :  { %v9278_v22 = vmul.f32 %v13920_v1, %v8237_v28 }
 0x881   :  { %v12989_v7 = vpop.f32.mrf.mxu0 }
 0x882   :  { %v15331_v38 = vadd.f32 %v9278_v22, %v13923_v3  ;;  %v9287_v7 = vmul.f32 %v13920_v1, %v8903_v29 }
 0x883   :  { %v8385_v5 = vpop.f32.mrf.mxu0 }
 0x884   :  { %v9280_v53 = vmul.f32 %v13920_v1, %v8385_v5  ;;  %v9312_v51 = vsel %vm216_vm2, %v15331_v38, -inf  ;;  %v15364_v5 = vadd.f32 %v9285_v18, %v13923_v3  ;;  %v15375_v29 = vadd.f32 %v9287_v7, %v13923_v3 }
 0x885   :  { %9313 = vmax.xlane.f32.xlu1 %v9312_v51  ;;  %v12999_v4 = vpop.f32.mrf.mxu0 }
 0x886   :  { %v15338_v26 = vadd.f32 %v9280_v53, %v13923_v3 }
 0x887   :  { %v8533_v19 = vpop.f32.mrf.mxu0 }
 0x888   :  { %v9282_v16 = vmul.f32 %v13920_v1, %v8533_v19  ;;  %v9318_v13 = vsel %vm216_vm2, %v15338_v26, -inf }
 0x889   :  { %9319 = vmax.xlane.f32.xlu0 %v9318_v13  ;;  %v13009_v0 = vpop.f32.mrf.mxu0 }
 0x88a   :  { %v15348_v32 = vadd.f32 %v9282_v16, %v13923_v3  ;;  %v9289_v16 = vmul.f32 %v13920_v1, %v9051_v39  ;;  %v9333_v0 = vsel %vm216_vm2, %v15364_v5, -inf }
 0x88b   :  { %v8681_v43 = vpop.f32.mrf.mxu0 }
 0x88c   :  { %v9284_v21 = vmul.f32 %v13920_v1, %v8681_v43  ;;  %v9324_v56 = vsel %vm216_vm2, %v15348_v32, -inf  ;;  %v15389_v39 = vadd.f32 %v9289_v16, %v13923_v3 }
 0x88d   :  { %9322 = vmax.xlane.f32.xlu0 %v9321_v57  ;;  %9325 = vmax.xlane.f32.xlu1 %v9324_v56  ;;  %v13019_v28 = vpop.f32.mrf.mxu0  ;;  %v9339_v56 = vsel %vm216_vm2, %v15375_v29, -inf }
 0x88e   :  { %v15360_v22 = vadd.f32 %v9284_v21, %v13923_v3  ;;  %v9291_v28 = vmul.f32 %v13920_v1, %v9199_v59  ;;  %v9345_v59 = vsel %vm216_vm2, %v15389_v39, -inf }
 0x88f   :  { %v8829_v48 = vpop.f32.mrf.mxu0 }
 0x890   :  { %v9286_v53 = vmul.f32 %v13920_v1, %v8829_v48  ;;  %v9330_v51 = vsel %vm216_vm2, %v15360_v22, -inf }
 0x891   :  { %9328 = vmax.xlane.f32.xlu0 %v9327_v40  ;;  %9331 = vmax.xlane.f32.xlu1 %v9330_v51  ;;  %v13029_v4 = vpop.f32.mrf.mxu0 }
 0x892   :  { %v15372_v19 = vadd.f32 %v9286_v53, %v13923_v3  ;;  %v15399_v4 = vadd.f32 %v9291_v28, %v13923_v3 }
 0x893   :  { %v8977_v47 = vpop.f32.mrf.mxu0 }
 0x894   :  { %v9288_v13 = vmul.f32 %v13920_v1, %v8977_v47  ;;  %v9336_v43 = vsel %vm216_vm2, %v15372_v19, -inf }
 0x895   :  { %9334 = vmax.xlane.f32.xlu0 %v9333_v0  ;;  %9337 = vmax.xlane.f32.xlu1 %v9336_v43  ;;  %v13039_v57 = vpop.f32.mrf.mxu0  ;;  %v9351_v43 = vsel %vm216_vm2, %v15399_v4, -inf }
 0x896   :  { %v15384_v18 = vadd.f32 %v9288_v13, %v13923_v3 }
 0x897   :  { %v9125_v21 = vpop.f32.mrf.mxu0 }
 0x898   :  { %v9290_v7 = vmul.f32 %v13920_v1, %v9125_v21  ;;  %v9342_v48 = vsel %vm216_vm2, %v15384_v18, -inf }
 0x899   :  { %9340 = vmax.xlane.f32.xlu0 %v9339_v56  ;;  %9343 = vmax.xlane.f32.xlu1 %v9342_v48  ;;  %v13049_v53 = vpop.f32.mrf.mxu0 }
 0x89a   :  { %v15396_v40 = vadd.f32 %v9290_v7, %v13923_v3 }
 0x89b   :  { %v9273_v51 = vpop.f32.mrf.mxu0 }
 0x89c   :  { %v9292_v47 = vmul.f32 %v13920_v1, %v9273_v51  ;;  %v9348_v16 = vsel %vm216_vm2, %v15396_v40, -inf }
 0x89d   :  { %9346 = vmax.xlane.f32.xlu0 %v9345_v59  ;;  %9349 = vmax.xlane.f32.xlu1 %v9348_v16  ;;  %v13059_v13 = vpop.f32.mrf.mxu0 }
 0x89e   :  { %v15407_v0 = vadd.f32 %v9292_v47, %v13923_v3 }
 0x8a0   :  { %v9354_v57 = vsel %vm216_vm2, %v15407_v0, -inf }
 0x8a1   :  { %9352 = vmax.xlane.f32.xlu0 %v9351_v43  ;;  %9355 = vmax.xlane.f32.xlu1 %v9354_v57 }
 0x8d8   :  { %v9311_v1 = vpop.xlane.xlu0 %9310 }
 0x8d9   :  { %v9357_v21 = vsub.f32 %v15317_v2, %v9311_v1 }
 0x8db   :  { %v9373_v56 = vmul.f32 1.442695, %v9357_v21 }
 0x8dc   :  { %v9317_v28 = vpop.xlane.xlu0 %9316 }
 0x8dd   :  { %13445 = vpow2.f32 %v9373_v56  ;;  %v9359_v7 = vsub.f32 %v15323_v9, %v9317_v28 }
 0x8df   :  { %v9377_v48 = vmul.f32 1.442695, %v9359_v7 }
 0x8e1   :  { %13447 = vpow2.f32 %v9377_v48 }
 0x8ea   :  { %v15415_v3 = vpop.eup %13445 }
 0x8eb   :  { %v9405_v53 = vsel %vm216_vm2, %v15415_v3, 0.0 }
 0x8ec   :  { %9406 = vadd.xlane.f32.xlu0 %v9405_v53 }
 0x8ee   :  { %v15419_v51 = vpop.eup %13447 }
 0x8ef   :  { %v9411_v47 = vsel %vm216_vm2, %v15419_v51, 0.0 }
 0x8f0   :  { %9412 = vadd.xlane.f32.xlu0 %v9411_v47 }
 0x90e   :  { %v9314_v2 = vpop.xlane.xlu1 %9313 }
 0x90f   :  { %v9358_v59 = vsub.f32 %v15331_v38, %v9314_v2 }
 0x911   :  { %v9375_v16 = vmul.f32 1.442695, %v9358_v59 }
 0x912   :  { %v9320_v13 = vpop.xlane.xlu0 %9319 }
 0x913   :  { %13449 = vpow2.f32 %v9375_v16  ;;  %v9360_v9 = vsub.f32 %v15338_v26, %v9320_v13 }
 0x915   :  { %v9379_v43 = vmul.f32 1.442695, %v9360_v9 }
 0x916   :  { %v9323_v57 = vpop.xlane.xlu0 %9322  ;;  %v9326_v1 = vpop.xlane.xlu1 %9325 }
 0x917   :  { %13451 = vpow2.f32 %v9379_v43  ;;  %v9361_v21 = vsub.f32 %v15341_v8, %v9323_v57  ;;  %v9362_v56 = vsub.f32 %v15348_v32, %v9326_v1 }
 0x919   :  { %v9381_v28 = vmul.f32 1.442695, %v9361_v21  ;;  %v9383_v7 = vmul.f32 1.442695, %v9362_v56 }
 0x91a   :  { %v9329_v48 = vpop.xlane.xlu0 %9328  ;;  %v9332_v53 = vpop.xlane.xlu1 %9331 }
 0x91b   :  { %13453 = vpow2.f32 %v9381_v28  ;;  %v9363_v38 = vsub.f32 %v15353_v58, %v9329_v48  ;;  %v9364_v47 = vsub.f32 %v15360_v22, %v9332_v53 }
 0x91c   :  { %13455 = vpow2.f32 %v9383_v7 }
 0x91d   :  { %v9385_v2 = vmul.f32 1.442695, %v9363_v38  ;;  %v9387_v26 = vmul.f32 1.442695, %v9364_v47 }
 0x91e   :  { %v9335_v59 = vpop.xlane.xlu0 %9334  ;;  %v9338_v16 = vpop.xlane.xlu1 %9337 }
 0x91f   :  { %13457 = vpow2.f32 %v9385_v2  ;;  %v9365_v13 = vsub.f32 %v15364_v5, %v9335_v59  ;;  %v9366_v8 = vsub.f32 %v15372_v19, %v9338_v16 }
 0x920   :  { %v15431_v32 = vpop.eup %13449  ;;  %13459 = vpow2.f32 %v9387_v26 }
 0x921   :  { %v9389_v9 = vmul.f32 1.442695, %v9365_v13  ;;  %v9391_v43 = vmul.f32 1.442695, %v9366_v8  ;;  %v9408_v58 = vsel %vm216_vm2, %v15431_v32, 0.0 }
 0x922   :  { %v9341_v57 = vpop.xlane.xlu0 %9340  ;;  %v9344_v22 = vpop.xlane.xlu1 %9343  ;;  %9409 = vadd.xlane.f32.xlu1 %v9408_v58 }
 0x923   :  { %13461 = vpow2.f32 %v9389_v9  ;;  %v9367_v1 = vsub.f32 %v15375_v29, %v9341_v57  ;;  %v9368_v21 = vsub.f32 %v15384_v18, %v9344_v22 }
 0x924   :  { %v15437_v56 = vpop.eup %13451  ;;  %13463 = vpow2.f32 %v9391_v43 }
 0x925   :  { %v9393_v5 = vmul.f32 1.442695, %v9367_v1  ;;  %v9395_v19 = vmul.f32 1.442695, %v9368_v21  ;;  %v9414_v28 = vsel %vm216_vm2, %v15437_v56, 0.0 }
 0x926   :  { %v9347_v7 = vpop.xlane.xlu0 %9346  ;;  %v9350_v48 = vpop.xlane.xlu1 %9349  ;;  %9415 = vadd.xlane.f32.xlu1 %v9414_v28 }
 0x927   :  { %13465 = vpow2.f32 %v9393_v5  ;;  %v9369_v53 = vsub.f32 %v15389_v39, %v9347_v7  ;;  %v9370_v38 = vsub.f32 %v15396_v40, %v9350_v48 }
 0x928   :  { %v15443_v47 = vpop.eup %13453  ;;  %13467 = vpow2.f32 %v9395_v19 }
 0x929   :  { %v15445_v29 = vpop.eup %13455  ;;  %v9397_v18 = vmul.f32 1.442695, %v9369_v53  ;;  %v9399_v2 = vmul.f32 1.442695, %v9370_v38  ;;  %v9417_v26 = vsel %vm216_vm2, %v15443_v47, 0.0 }
 0x92a   :  { %9418 = vadd.xlane.f32.xlu0 %v9417_v26  ;;  %v9353_v59 = vpop.xlane.xlu0 %9352  ;;  %v9420_v16 = vsel %vm216_vm2, %v15445_v29, 0.0  ;;  %v9356_v13 = vpop.xlane.xlu1 %9355 }
 0x92b   :  { %13469 = vpow2.f32 %v9397_v18  ;;  %v9371_v39 = vsub.f32 %v15399_v4, %v9353_v59  ;;  %9421 = vadd.xlane.f32.xlu1 %v9420_v16  ;;  %v9372_v40 = vsub.f32 %v15407_v0, %v9356_v13  ;;  %v16481_v13 = vld [vmem:[#allocation10_spill] sm:$0xff] }
 0x92c   :  { %v15453_v8 = vpop.eup %13457  ;;  %13471 = vpow2.f32 %v9399_v2 }
 0x92d   :  { %v15455_v9 = vpop.eup %13459  ;;  %v9401_v43 = vmul.f32 1.442695, %v9371_v39  ;;  %v9403_v58 = vmul.f32 1.442695, %v9372_v40  ;;  %v9423_v57 = vsel %vm216_vm2, %v15453_v8, 0.0  ;;  %v16482_v39 = vld [vmem:[#allocation11_spill] sm:$0xff] }
 0x92e   :  { %9424 = vadd.xlane.f32.xlu0 %v9423_v57  ;;  %v9426_v22 = vsel %vm216_vm2, %v15455_v9, 0.0  ;;  %v16485_v40 = vld [vmem:[#allocation14_spill] sm:$0xff]  ;;  %v16492_v57 = vld [vmem:[#allocation21_spill] sm:$0xff] }
 0x92f   :  { %13473 = vpow2.f32 %v9401_v43  ;;  %9427 = vadd.xlane.f32.xlu1 %v9426_v22 }
 0x930   :  { %v15461_v4 = vpop.eup %13461  ;;  %13475 = vpow2.f32 %v9403_v58 }
 0x931   :  { %v15463_v0 = vpop.eup %13463  ;;  %v9429_v1 = vsel %vm216_vm2, %v15461_v4, 0.0 }
 0x932   :  { %9430 = vadd.xlane.f32.xlu0 %v9429_v1  ;;  %v9432_v21 = vsel %vm216_vm2, %v15463_v0, 0.0 }
 0x933   :  { %9433 = vadd.xlane.f32.xlu1 %v9432_v21 }
 0x934   :  { %v15469_v5 = vpop.eup %13465 }
 0x935   :  { %v15471_v19 = vpop.eup %13467  ;;  %v9435_v28 = vsel %vm216_vm2, %v15469_v5, 0.0 }
 0x936   :  { %9436 = vadd.xlane.f32.xlu0 %v9435_v28  ;;  %v9438_v7 = vsel %vm216_vm2, %v15471_v19, 0.0 }
 0x937   :  { %9439 = vadd.xlane.f32.xlu1 %v9438_v7 }
 0x938   :  { %v15477_v48 = vpop.eup %13469 }
 0x939   :  { %v15479_v53 = vpop.eup %13471  ;;  %v9441_v38 = vsel %vm216_vm2, %v15477_v48, 0.0 }
 0x93a   :  { %9442 = vadd.xlane.f32.xlu0 %v9441_v38  ;;  %v9444_v18 = vsel %vm216_vm2, %v15479_v53, 0.0 }
 0x93b   :  { %9445 = vadd.xlane.f32.xlu1 %v9444_v18 }
 0x93c   :  { %v15485_v2 = vpop.eup %13473 }
 0x93d   :  { %v15487_v26 = vpop.eup %13475  ;;  %v9447_v59 = vsel %vm216_vm2, %v15485_v2, 0.0 }
 0x93e   :  { %9448 = vadd.xlane.f32.xlu0 %v9447_v59  ;;  %v9450_v16 = vsel %vm216_vm2, %v15487_v26, 0.0 }
 0x93f   :  { %9451 = vadd.xlane.f32.xlu1 %v9450_v16 }
 0x950   :  { %5373 = vrot.lane.b32.xlu1 %v14809_v45, %s13669_s28  ;;  %v16484_v45 = vld [vmem:[#allocation13_spill] sm:$0xff] }
 0x954   :  { %5375 = vrot.lane.b32.xlu1 %v14807_v11, %s13669_s28  ;;  %5371 = vrot.lane.b32.xlu0 %v16481_v13, %s13669_s28  ;;  %v16483_v11 = vld [vmem:[#allocation12_spill] sm:$0xff] }
 0x958   :  { %5377 = vrot.lane.b32.xlu1 %v16482_v39, %s13669_s28  ;;  %8028 = vrot.lane.b32.xlu0 %v15285_v63, %s13675_s15  ;;  %v16486_v63 = vld [vmem:[#allocation15_spill] sm:$0xff] }
 0x95c   :  { %8030 = vrot.lane.b32.xlu1 %v15289_v36, %s13675_s15  ;;  %8032 = vrot.lane.b32.xlu0 %v15287_v49, %s13675_s15  ;;  %v16487_v49 = vld [vmem:[#allocation16_spill] sm:$0xff]  ;;  %v16488_v36 = vld [vmem:[#allocation17_spill] sm:$0xff] }
 0x960   :  { %8034 = vrot.lane.b32.xlu1 %v15291_v50, %s13675_s15  ;;  %5379 = vrot.lane.b32.xlu0 %v16483_v11, %s13669_s28  ;;  %v16489_v50 = vld [vmem:[#allocation18_spill] sm:$0xff] }
 0x964   :  { %5381 = vrot.lane.b32.xlu1 %v16484_v45, %s13669_s28  ;;  %5383 = vrot.lane.b32.xlu0 %v16485_v40, %s13669_s28 }
 0x968   :  { %5385 = vrot.lane.b32.xlu1 %v16486_v63, %s13669_s28  ;;  %8036 = vrot.lane.b32.xlu0 %v15293_v52, %s13675_s15  ;;  %v16490_v52 = vld [vmem:[#allocation19_spill] sm:$0xff] }
 0x96c   :  { %8038 = vrot.lane.b32.xlu1 %v15295_v30, %s13675_s15  ;;  %8040 = vrot.lane.b32.xlu0 %v15297_v15, %s13675_s15  ;;  %v16491_v15 = vld [vmem:[#allocation20_spill] sm:$0xff] }
 0x970   :  { %8042 = vrot.lane.b32.xlu1 %v15299_v14, %s13675_s15  ;;  %5387 = vrot.lane.b32.xlu0 %v16487_v49, %s13669_s28 }
 0x974   :  { %5389 = vrot.lane.b32.xlu1 %v16488_v36, %s13669_s28  ;;  %5391 = vrot.lane.b32.xlu0 %v16489_v50, %s13669_s28 }
 0x975   :  { %v9407_v43 = vpop.xlane.xlu0 %9406 }
 0x976   :  { %13477 = vrcp.f32 %v9407_v43 }
 0x978   :  { %5393 = vrot.lane.b32.xlu1 %v16490_v52, %s13669_s28  ;;  %8044 = vrot.lane.b32.xlu0 %v15301_v42, %s13675_s15  ;;  %v16493_v42 = vld [vmem:[#allocation22_spill] sm:$0xff] }
 0x979   :  { %v9413_v30 = vpop.xlane.xlu0 %9412 }
 0x97a   :  { %13479 = vrcp.f32 %v9413_v30 }
 0x97c   :  { %8046 = vrot.lane.b32.xlu1 %v15303_v55, %s13675_s15  ;;  %8048 = vrot.lane.b32.xlu0 %v15305_v27, %s13675_s15 }
 0x980   :  { %8050 = vrot.lane.b32.xlu1 %v15307_v31, %s13675_s15  ;;  %5395 = vrot.lane.b32.xlu0 %v16491_v15, %s13669_s28  ;;  %v16494_v31 = vld [vmem:[#allocation23_spill] sm:$0xff] }
 0x983   :  { %v13478_v14 = vpop.eup %13477 }
 0x984   :  { %v9469_v58 = vmul.f32 %v13478_v14, %v15415_v3  ;;  %5397 = vrot.lane.b32.xlu1 %v16492_v57, %s13669_s28  ;;  %5399 = vrot.lane.b32.xlu0 %v16493_v42, %s13669_s28 }
 0x986   :  { %13063 = vmatmul.mubr.msk.f32.vlgmr.msra.gmra.mxu1 %vm216_vm2, %v9469_v58 }
 0x987   :  { %v13480_v55 = vpop.eup %13479  ;;  %13071 = vmatpush3.msra.mxu1 %v15142_v20  ;;  %13072 = vmatprep.mubr.msk.f32.mxu1 %vm13671_vm1, %v16480_v62 }
 0x988   :  { %v9471_v27 = vmul.f32 %v13480_v55, %v15419_v51  ;;  %5401 = vrot.lane.b32.xlu1 %v16494_v31, %s13669_s28  ;;  %8052 = vrot.lane.b32.xlu0 %v15309_v44, %s13675_s15 }
 0x989   :  { %13080 = vmatprep.subr.mxu1 %v16480_v62 }
 0x98a   :  { %13073 = vmatmul.mubr.msk.f32.vlgmr.msra.gmra.mxu1 %vm216_vm2, %v9471_v27 }
 0x98b   :  { %13081 = vmatpush3.msra.mxu1 %v15126_v35  ;;  %13082 = vmatprep.mubr.msk.f32.mxu1 %vm13671_vm1, %v16480_v62 }
 0x98c   :  { %8054 = vrot.lane.b32.xlu1 %v15311_v24, %s13675_s15  ;;  %8056 = vrot.lane.b32.xlu0 %v15313_v17, %s13675_s15 }
 0x98d   :  { %13090 = vmatprep.subr.mxu1 %v16480_v62 }
 0x990   :  { %8058 = vrot.lane.b32.xlu1 %v15327_v23, %s13675_s15 }
 0x9ab   :  { %v9410_v20 = vpop.xlane.xlu1 %9409 }
 0x9ac   :  { %13481 = vrcp.f32 %v9410_v20 }
 0x9af   :  { %v9416_v44 = vpop.xlane.xlu1 %9415 }
 0x9b0   :  { %13483 = vrcp.f32 %v9416_v44 }
 0x9b3   :  { %v9419_v3 = vpop.xlane.xlu0 %9418 }
 0x9b4   :  { %13485 = vrcp.f32 %v9419_v3  ;;  %v9422_v35 = vpop.xlane.xlu1 %9421 }
 0x9b5   :  { %13487 = vrcp.f32 %v9422_v35 }
 0x9b7   :  { %v9425_v51 = vpop.xlane.xlu0 %9424 }
 0x9b8   :  { %13489 = vrcp.f32 %v9425_v51  ;;  %v9428_v22 = vpop.xlane.xlu1 %9427 }
 0x9b9   :  { %v13482_v24 = vpop.eup %13481  ;;  %13491 = vrcp.f32 %v9428_v22 }
 0x9ba   :  { %v9470_v17 = vmul.f32 %v13482_v24, %v15431_v32 }
 0x9bb   :  { %v9431_v1 = vpop.xlane.xlu0 %9430 }
 0x9bc   :  { %13493 = vrcp.f32 %v9431_v1  ;;  %v9434_v21 = vpop.xlane.xlu1 %9433  ;;  %13068 = vmatmul.mubr.msk.f32.vlgmr.msra.gmra.mxu0 %vm216_vm2, %v9470_v17 }
 0x9bd   :  { %v13484_v23 = vpop.eup %13483  ;;  %13495 = vrcp.f32 %v9434_v21  ;;  %13076 = vmatpush3.msra.mxu0 %v15209_v10  ;;  %13077 = vmatprep.mubr.msk.f32.mxu0 %vm13671_vm1, %v16480_v62 }
 0x9be   :  { %v9472_v28 = vmul.f32 %v13484_v23, %v15437_v56  ;;  %13085 = vmatprep.subr.mxu0 %v16480_v62 }
 0x9bf   :  { %v9437_v7 = vpop.xlane.xlu0 %9436 }
 0x9c0   :  { %13497 = vrcp.f32 %v9437_v7  ;;  %v9440_v38 = vpop.xlane.xlu1 %9439  ;;  %13078 = vmatmul.mubr.msk.f32.vlgmr.msra.gmra.mxu0 %vm216_vm2, %v9472_v28 }
 0x9c1   :  { %v13486_v32 = vpop.eup %13485  ;;  %13499 = vrcp.f32 %v9440_v38  ;;  %13086 = vmatpush3.msra.mxu0 %v15211_v37  ;;  %13087 = vmatprep.mubr.msk.f32.mxu0 %vm13671_vm1, %v16480_v62 }
 0x9c2   :  { %v13488_v10 = vpop.eup %13487  ;;  %v9473_v18 = vmul.f32 %v13486_v32, %v15443_v47  ;;  %13095 = vmatprep.subr.mxu0 %v16480_v62  ;;  %v13241_v32 = vld [vmem:[%s16455_s2 + $0x8] sm:$0xff]  }
 0x9c3   :  { %v9474_v56 = vmul.f32 %v13488_v10, %v15445_v29  ;;  %v9443_v59 = vpop.xlane.xlu0 %9442  ;;  %v13242_v10 = vld [vmem:[%s16455_s2] sm:$0xff]  }
 0x9c4   :  { %13501 = vrcp.f32 %v9443_v59  ;;  %v9446_v16 = vpop.xlane.xlu1 %9445  ;;  %13083 = vmatmul.mubr.msk.f32.vlgmr.msra.gmra.mxu1 %vm216_vm2, %v9473_v18 }
 0x9c5   :  { %v13490_v13 = vpop.eup %13489  ;;  %13503 = vrcp.f32 %v9446_v16  ;;  %13088 = vmatmul.mubr.msk.f32.vlgmr.msra.gmra.mxu0 %vm216_vm2, %v9474_v56  ;;  %13091 = vmatpush3.msra.mxu1 %v15144_v6 }
 0x9c6   :  { %v13492_v37 = vpop.eup %13491  ;;  %v9475_v39 = vmul.f32 %v13490_v13, %v15453_v8  ;;  %13096 = vmatpush3.msra.mxu0 %v15220_v46  ;;  %13092 = vmatprep.mubr.msk.f32.mxu1 %vm13671_vm1, %v16480_v62 }
 0x9c7   :  { %v9476_v47 = vmul.f32 %v13492_v37, %v15455_v9  ;;  %13100 = vmatprep.subr.mxu1 %v16480_v62  ;;  %v9449_v29 = vpop.xlane.xlu0 %9448  ;;  %13097 = vmatprep.mubr.msk.f32.mxu0 %vm13671_vm1, %v16480_v62 }
 0x9c8   :  { %13505 = vrcp.f32 %v9449_v29  ;;  %13105 = vmatprep.subr.mxu0 %v16480_v62  ;;  %v9452_v6 = vpop.xlane.xlu1 %9451  ;;  %13093 = vmatmul.mubr.msk.f32.vlgmr.msra.gmra.mxu1 %vm216_vm2, %v9475_v39 }
 0x9c9   :  { %v13494_v8 = vpop.eup %13493  ;;  %13507 = vrcp.f32 %v9452_v6  ;;  %13098 = vmatmul.mubr.msk.f32.vlgmr.msra.gmra.mxu0 %vm216_vm2, %v9476_v47  ;;  %13101 = vmatpush3.msra.mxu1 %v15159_v12 }
 0x9ca   :  { %v13496_v46 = vpop.eup %13495  ;;  %v9477_v9 = vmul.f32 %v13494_v8, %v15461_v4  ;;  %13106 = vmatpush3.msra.mxu0 %v15235_v34  ;;  %13102 = vmatprep.mubr.msk.f32.mxu1 %vm13671_vm1, %v16480_v62 }
 0x9cb   :  { %v9478_v11 = vmul.f32 %v13496_v46, %v15463_v0  ;;  %13110 = vmatprep.subr.mxu1 %v16480_v62  ;;  %v5372_v45 = vpop.permute.xlu0 %5371  ;;  %13107 = vmatprep.mubr.msk.f32.mxu0 %vm13671_vm1, %v16480_v62 }
 0x9cc   :  { %5420 = vst.msk [vmem:[#allocation2] sm:$0xff] %vm5419_vm4, %v5372_v45  ;;  %13115 = vmatprep.subr.mxu0 %v16480_v62  ;;  %v5374_v12 = vpop.permute.xlu1 %5373  ;;  %13103 = vmatmul.mubr.msk.f32.vlgmr.msra.gmra.mxu1 %vm216_vm2, %v9477_v9 }
 0x9cd   :  { %v13498_v4 = vpop.eup %13497  ;;  %5421 = vst.msk [vmem:[#allocation2 + $0x8] sm:$0xff] %vm5419_vm4, %v5374_v12  ;;  %13108 = vmatmul.mubr.msk.f32.vlgmr.msra.gmra.mxu0 %vm216_vm2, %v9478_v11  ;;  %13111 = vmatpush3.msra.mxu1 %v15169_v25 }
 0x9ce   :  { %v13500_v34 = vpop.eup %13499  ;;  %v9479_v0 = vmul.f32 %v13498_v4, %v15469_v5  ;;  %13116 = vmatpush3.msra.mxu0 %v15245_v54  ;;  %13112 = vmatprep.mubr.msk.f32.mxu1 %vm13671_vm1, %v16480_v62 }
 0x9cf   :  { %v9480_v40 = vmul.f32 %v13500_v34, %v15471_v19  ;;  %13120 = vmatprep.subr.mxu1 %v16480_v62  ;;  %v8029_v63 = vpop.permute.xlu0 %8028  ;;  %13117 = vmatprep.mubr.msk.f32.mxu0 %vm13671_vm1, %v16480_v62 }
 0x9d0   :  { %8077 = vst.msk [vmem:[#allocation2] sm:$0xff] %vm8076_vm5, %v8029_v63  ;;  %13125 = vmatprep.subr.mxu0 %v16480_v62  ;;  %v5376_v25 = vpop.permute.xlu1 %5375  ;;  %13113 = vmatmul.mubr.msk.f32.vlgmr.msra.gmra.mxu1 %vm216_vm2, %v9479_v0 }
 0x9d1   :  { %v13502_v5 = vpop.eup %13501  ;;  %5422 = vst.msk [vmem:[#allocation2 + $0x10] sm:$0xff] %vm5419_vm4, %v5376_v25  ;;  %13118 = vmatmul.mubr.msk.f32.vlgmr.msra.gmra.mxu0 %vm216_vm2, %v9480_v40  ;;  %13121 = vmatpush3.msra.mxu1 %v15184_v33 }
 0x9d2   :  { %v13504_v54 = vpop.eup %13503  ;;  %v9481_v19 = vmul.f32 %v13502_v5, %v15477_v48  ;;  %13126 = vmatpush3.msra.mxu0 %v15260_v60  ;;  %13122 = vmatprep.mubr.msk.f32.mxu1 %vm13671_vm1, %v16480_v62 }
 0x9d3   :  { %v9482_v49 = vmul.f32 %v13504_v54, %v15479_v53  ;;  %13130 = vmatprep.subr.mxu1 %v16480_v62  ;;  %v8033_v36 = vpop.permute.xlu0 %8032  ;;  %13127 = vmatprep.mubr.msk.f32.mxu0 %vm13671_vm1, %v16480_v62 }
 0x9d4   :  { %8079 = vst.msk [vmem:[#allocation2 + $0x10] sm:$0xff] %vm8076_vm5, %v8033_v36  ;;  %13135 = vmatprep.subr.mxu0 %v16480_v62  ;;  %v5378_v33 = vpop.permute.xlu1 %5377  ;;  %13123 = vmatmul.mubr.msk.f32.vlgmr.msra.gmra.mxu1 %vm216_vm2, %v9481_v19 }
 0x9d5   :  { %v13506_v48 = vpop.eup %13505  ;;  %5423 = vst.msk [vmem:[#allocation2 + $0x18] sm:$0xff] %vm5419_vm4, %v5378_v33  ;;  %13128 = vmatmul.mubr.msk.f32.vlgmr.msra.gmra.mxu0 %vm216_vm2, %v9482_v49  ;;  %13131 = vmatpush3.msra.mxu1 %v15194_v41 }
 0x9d6   :  { %v13508_v60 = vpop.eup %13507  ;;  %v9483_v53 = vmul.f32 %v13506_v48, %v15485_v2  ;;  %13136 = vmatpush3.msra.mxu0 %v15270_v61  ;;  %13132 = vmatprep.mubr.msk.f32.mxu1 %vm13671_vm1, %v16480_v62 }
 0x9d7   :  { %v9484_v50 = vmul.f32 %v13508_v60, %v15487_v26  ;;  %v5380_v43 = vpop.permute.xlu0 %5379  ;;  %13137 = vmatprep.mubr.msk.f32.mxu0 %vm13671_vm1, %v16480_v62  ;;  %13140 = vmatprep.subr.bf16.mxu1 %v13241_v32 }
 0x9d8   :  { %5424 = vst.msk [vmem:[#allocation2 + $0x20] sm:$0xff] %vm5419_vm4, %v5380_v43  ;;  %v8031_v52 = vpop.permute.xlu1 %8030  ;;  %13133 = vmatmul.mubr.msk.f32.vlgmr.msra.gmra.mxu1 %vm216_vm2, %v9483_v53 }
 0x9d9   :  { %8078 = vst.msk [vmem:[#allocation2 + $0x8] sm:$0xff] %vm8076_vm5, %v8031_v52  ;;  %13138 = vmatmul.mubr.msk.f32.vlgmr.msra.gmra.mxu0 %vm216_vm2, %v9484_v50  ;;  %13141 = vmatpush3.bf16.msra.mxu1 %v13241_v32 }
 0x9da   :  { %13142 = vmatprep.subr.bf16.mxu1 %v13242_v10 }
 0x9db   :  { %v5384_v41 = vpop.permute.xlu0 %5383 }
 0x9dc   :  { %5426 = vst.msk [vmem:[#allocation2 + $0x30] sm:$0xff] %vm5419_vm4, %v5384_v41  ;;  %v8035_v61 = vpop.permute.xlu1 %8034 }
 0x9dd   :  { %8080 = vst.msk [vmem:[#allocation2 + $0x18] sm:$0xff] %vm8076_vm5, %v8035_v61  ;;  %13143 = vmatpush3.bf16.msra.mxu1 %v13242_v10 }
 0x9df   :  { %v8037_v2 = vpop.permute.xlu0 %8036 }
 0x9e0   :  { %8081 = vst.msk [vmem:[#allocation2 + $0x20] sm:$0xff] %vm8076_vm5, %v8037_v2  ;;  %v5382_v26 = vpop.permute.xlu1 %5381 }
 0x9e1   :  { %5425 = vst.msk [vmem:[#allocation2 + $0x28] sm:$0xff] %vm5419_vm4, %v5382_v26 }
 0x9e3   :  { %v8041_v62 = vpop.permute.xlu0 %8040 }
 0x9e4   :  { %8083 = vst.msk [vmem:[#allocation2 + $0x30] sm:$0xff] %vm8076_vm5, %v8041_v62  ;;  %v5386_v30 = vpop.permute.xlu1 %5385 }
 0x9e5   :  { %5427 = vst.msk [vmem:[#allocation2 + $0x38] sm:$0xff] %vm5419_vm4, %v5386_v30 }
 0x9e7   :  { %v5388_v15 = vpop.permute.xlu0 %5387 }
 0x9e8   :  { %5428 = vst.msk [vmem:[#allocation2 + $0x40] sm:$0xff] %vm5419_vm4, %v5388_v15  ;;  %v8039_v14 = vpop.permute.xlu1 %8038 }
 0x9e9   :  { %8082 = vst.msk [vmem:[#allocation2 + $0x28] sm:$0xff] %vm8076_vm5, %v8039_v14 }
 0x9eb   :  { %v5392_v58 = vpop.permute.xlu0 %5391 }
 0x9ec   :  { %5430 = vst.msk [vmem:[#allocation2 + $0x50] sm:$0xff] %vm5419_vm4, %v5392_v58  ;;  %v8043_v57 = vpop.permute.xlu1 %8042 }
 0x9ed   :  { %8084 = vst.msk [vmem:[#allocation2 + $0x38] sm:$0xff] %vm8076_vm5, %v8043_v57 }
 0x9ef   :  { %v8045_v42 = vpop.permute.xlu0 %8044 }
 0x9f0   :  { %8085 = vst.msk [vmem:[#allocation2 + $0x40] sm:$0xff] %vm8076_vm5, %v8045_v42  ;;  %v5390_v55 = vpop.permute.xlu1 %5389 }
 0x9f1   :  { %5429 = vst.msk [vmem:[#allocation2 + $0x48] sm:$0xff] %vm5419_vm4, %v5390_v55 }
 0x9f3   :  { %v8049_v27 = vpop.permute.xlu0 %8048 }
 0x9f4   :  { %8087 = vst.msk [vmem:[#allocation2 + $0x50] sm:$0xff] %vm8076_vm5, %v8049_v27  ;;  %v5394_v31 = vpop.permute.xlu1 %5393 }
 0x9f5   :  { %5431 = vst.msk [vmem:[#allocation2 + $0x58] sm:$0xff] %vm5419_vm4, %v5394_v31 }
 0x9f7   :  { %v5396_v20 = vpop.permute.xlu0 %5395 }
 0x9f8   :  { %5432 = vst.msk [vmem:[#allocation2 + $0x60] sm:$0xff] %vm5419_vm4, %v5396_v20  ;;  %v8047_v44 = vpop.permute.xlu1 %8046 }
 0x9f9   :  { %8086 = vst.msk [vmem:[#allocation2 + $0x48] sm:$0xff] %vm8076_vm5, %v8047_v44 }
 0x9fb   :  { %v5400_v3 = vpop.permute.xlu0 %5399 }
 0x9fc   :  { %5434 = vst.msk [vmem:[#allocation2 + $0x70] sm:$0xff] %vm5419_vm4, %v5400_v3  ;;  %v8051_v35 = vpop.permute.xlu1 %8050 }
 0x9fd   :  { %8088 = vst.msk [vmem:[#allocation2 + $0x58] sm:$0xff] %vm8076_vm5, %v8051_v35 }
 0x9ff   :  { %v8053_v51 = vpop.permute.xlu0 %8052 }
 0xa00   :  { %8089 = vst.msk [vmem:[#allocation2 + $0x60] sm:$0xff] %vm8076_vm5, %v8053_v51  ;;  %v5398_v22 = vpop.permute.xlu1 %5397 }
 0xa01   :  { %5433 = vst.msk [vmem:[#allocation2 + $0x68] sm:$0xff] %vm5419_vm4, %v5398_v22 }
 0xa03   :  { %v8057_v24 = vpop.permute.xlu0 %8056 }
 0xa04   :  { %8091 = vst.msk [vmem:[#allocation2 + $0x70] sm:$0xff] %vm8076_vm5, %v8057_v24  ;;  %v5402_v17 = vpop.permute.xlu1 %5401 }
 0xa05   :  { %5435 = vst.msk [vmem:[#allocation2 + $0x78] sm:$0xff] %vm5419_vm4, %v5402_v17 }
 0xa08   :  { %v8055_v1 = vpop.permute.xlu1 %8054 }
 0xa09   :  { %8090 = vst.msk [vmem:[#allocation2 + $0x68] sm:$0xff] %vm8076_vm5, %v8055_v1 }
 0xa0c   :  { %v8059_v21 = vpop.permute.xlu1 %8058 }
 0xa0d   :  { %8092 = vst.msk [vmem:[#allocation2 + $0x78] sm:$0xff] %vm8076_vm5, %v8059_v21 }
 0xa46   :  { %v9555_v23 = vpop.f32.mrf.mxu1 }
 0xa47   :  { %10685 = vrot.lane.b32.xlu0 %v9555_v23, %s13676_s16 }
 0xa48   :  { %v13064_v28 = vpop.f32.mrf.mxu1 }
 0xa4a   :  { %v9703_v7 = vpop.f32.mrf.mxu1 }
 0xa4b   :  { %10689 = vrot.lane.b32.xlu0 %v9703_v7, %s13676_s16 }
 0xa4c   :  { %v13074_v38 = vpop.f32.mrf.mxu1 }
 0xa7c   :  { %v9629_v18 = vpop.f32.mrf.mxu0 }
 0xa7d   :  { %10687 = vrot.lane.b32.xlu1 %v9629_v18, %s13676_s16 }
 0xa7e   :  { %v13069_v56 = vpop.f32.mrf.mxu0 }
 0xa80   :  { %v9777_v59 = vpop.f32.mrf.mxu0 }
 0xa81   :  { %10691 = vrot.lane.b32.xlu1 %v9777_v59, %s13676_s16 }
 0xa82   :  { %v13079_v16 = vpop.f32.mrf.mxu0 }
 0xa84   :  { %v9851_v13 = vpop.f32.mrf.mxu1 }
 0xa85   :  { %v9925_v37 = vpop.f32.mrf.mxu0  ;;  %10693 = vrot.lane.b32.xlu0 %v9851_v13, %s13676_s16  ;;  %v16495_v13 = vld [vmem:[#allocation9_spill] sm:$0xff] }
 0xa86   :  { %10695 = vrot.lane.b32.xlu1 %v9925_v37, %s13676_s16  ;;  %v13084_v39 = vpop.f32.mrf.mxu1  ;;  %v10780_v37 = vsub.s32 1, %v16495_v13 }
 0xa87   :  { %v13089_v47 = vpop.f32.mrf.mxu0  ;;  %v15725_v39 = vld [vmem:[%s16459_s6] sm:$0xff] }
 0xa88   :  { %v9999_v29 = vpop.f32.mrf.mxu1  ;;  %v15728_v47 = vrot.slane %v15725_v39, %v10780_v37 }
 0xa89   :  { %v10073_v6 = vpop.f32.mrf.mxu0  ;;  %10697 = vrot.lane.b32.xlu0 %v9999_v29, %s13676_s16 }
 0xa8a   :  { %10699 = vrot.lane.b32.xlu1 %v10073_v6, %s13676_s16  ;;  %v13094_v8 = vpop.f32.mrf.mxu1 }
 0xa8b   :  { %v13099_v46 = vpop.f32.mrf.mxu0 }
 0xa8c   :  { %v10147_v9 = vpop.f32.mrf.mxu1 }
 0xa8d   :  { %v10221_v11 = vpop.f32.mrf.mxu0  ;;  %10701 = vrot.lane.b32.xlu0 %v10147_v9, %s13676_s16 }
 0xa8e   :  { %10703 = vrot.lane.b32.xlu1 %v10221_v11, %s13676_s16  ;;  %v13104_v45 = vpop.f32.mrf.mxu1  ;;  %v13606_v11 = vld [vmem:[#allocation3] sm:$0xff] }
 0xa8f   :  { %v13109_v12 = vpop.f32.mrf.mxu0 }
 0xa90   :  { %v10295_v4 = vpop.f32.mrf.mxu1 }
 0xa91   :  { %v10369_v34 = vpop.f32.mrf.mxu0  ;;  %10705 = vrot.lane.b32.xlu0 %v10295_v4, %s13676_s16  ;;  %v13607_v4 = vld [vmem:[#allocation3 + $0x10] sm:$0xff] }
 0xa92   :  { %10707 = vrot.lane.b32.xlu1 %v10369_v34, %s13676_s16  ;;  %v13114_v0 = vpop.f32.mrf.mxu1 }
 0xa93   :  { %v13119_v40 = vpop.f32.mrf.mxu0 }
 0xa94   :  { %v10443_v63 = vpop.f32.mrf.mxu1 }
 0xa95   :  { %v10517_v25 = vpop.f32.mrf.mxu0  ;;  %10709 = vrot.lane.b32.xlu0 %v10443_v63, %s13676_s16 }
 0xa96   :  { %10711 = vrot.lane.b32.xlu1 %v10517_v25, %s13676_s16  ;;  %v13124_v5 = vpop.f32.mrf.mxu1  ;;  %v13608_v25 = vld [vmem:[#allocation3 + $0x8] sm:$0xff] }
 0xa97   :  { %v13129_v54 = vpop.f32.mrf.mxu0 }
 0xa98   :  { %v10591_v19 = vpop.f32.mrf.mxu1 }
 0xa99   :  { %v10665_v49 = vpop.f32.mrf.mxu0  ;;  %10713 = vrot.lane.b32.xlu0 %v10591_v19, %s13676_s16  ;;  %v13609_v19 = vld [vmem:[#allocation3 + $0x18] sm:$0xff] }
 0xa9a   :  { %10715 = vrot.lane.b32.xlu1 %v10665_v49, %s13676_s16  ;;  %v13134_v36 = vpop.f32.mrf.mxu1 }
 0xa9b   :  { %v13139_v33 = vpop.f32.mrf.mxu0 }
 0xab9   :  { %v10686_v48 = vpop.permute.xlu0 %10685 }
 0xaba   :  { %10734 = vst.msk [vmem:[#allocation2] sm:$0xff] %vm10733_vm6, %v10686_v48 }
 0xabd   :  { %v10690_v60 = vpop.permute.xlu0 %10689 }
 0xabe   :  { %10736 = vst.msk [vmem:[#allocation2 + $0x10] sm:$0xff] %vm10733_vm6, %v10690_v60 }
 0xac1   :  { %v10750_v52 = vld [vmem:[#allocation2] sm:$0xff] }
 0xac5   :  { %v10752_v62 = vld [vmem:[#allocation2 + $0x10] sm:$0xff] }
 0xaef   :  { %v10688_v53 = vpop.permute.xlu1 %10687 }
 0xaf0   :  { %10735 = vst.msk [vmem:[#allocation2 + $0x8] sm:$0xff] %vm10733_vm6, %v10688_v53 }
 0xaf3   :  { %v10692_v50 = vpop.permute.xlu1 %10691 }
 0xaf4   :  { %10737 = vst.msk [vmem:[#allocation2 + $0x18] sm:$0xff] %vm10733_vm6, %v10692_v50 }
 0xaf7   :  { %v10694_v43 = vpop.permute.xlu0 %10693  ;;  %v10751_v41 = vld [vmem:[#allocation2 + $0x8] sm:$0xff] }
 0xaf8   :  { %10738 = vst.msk [vmem:[#allocation2 + $0x20] sm:$0xff] %vm10733_vm6, %v10694_v43  ;;  %v10696_v61 = vpop.permute.xlu1 %10695  ;;  %v10766_v2 = vpack.c.bf16 %v10751_v41, %v10750_v52  ;;  %v13610_v43 = vld [vmem:[#allocation3 + $0x20] sm:$0xff] }
 0xaf9   :  { %10739 = vst.msk [vmem:[#allocation2 + $0x28] sm:$0xff] %vm10733_vm6, %v10696_v61 }
 0xafa   :  { %13144 = vmatprep.mubr.msk.bf16.mxu1 %vm87_vm0, %v10766_v2 }
 0xafb   :  { %v10698_v26 = vpop.permute.xlu0 %10697  ;;  %v10753_v30 = vld [vmem:[#allocation2 + $0x18] sm:$0xff] }
 0xafc   :  { %10740 = vst.msk [vmem:[#allocation2 + $0x30] sm:$0xff] %vm10733_vm6, %v10698_v26  ;;  %v10700_v15 = vpop.permute.xlu1 %10699  ;;  %v10767_v14 = vpack.c.bf16 %v10753_v30, %v10752_v62  ;;  %v13611_v30 = vld [vmem:[#allocation3 + $0x28] sm:$0xff] }
 0xafd   :  { %10741 = vst.msk [vmem:[#allocation2 + $0x38] sm:$0xff] %vm10733_vm6, %v10700_v15 }
 0xafe   :  { %13145 = vmatmul.mubr.msk.bf16.vlgmr.msra.gmra.mxu1 %vm87_vm0, %v10767_v14  ;;  %v13612_v14 = vld [vmem:[#allocation3 + $0x30] sm:$0xff] }
 0xaff   :  { %v10702_v58 = vpop.permute.xlu0 %10701  ;;  %v10754_v57 = vld [vmem:[#allocation2 + $0x20] sm:$0xff] }
 0xb00   :  { %10742 = vst.msk [vmem:[#allocation2 + $0x40] sm:$0xff] %vm10733_vm6, %v10702_v58  ;;  %v10704_v42 = vpop.permute.xlu1 %10703  ;;  %v10755_v55 = vld [vmem:[#allocation2 + $0x28] sm:$0xff] }
 0xb01   :  { %10743 = vst.msk [vmem:[#allocation2 + $0x48] sm:$0xff] %vm10733_vm6, %v10704_v42  ;;  %v10768_v27 = vpack.c.bf16 %v10755_v55, %v10754_v57  ;;  %v13613_v55 = vld [vmem:[#allocation3 + $0x38] sm:$0xff] }
 0xb03   :  { %13148 = vmatprep.mubr.msk.bf16.mxu1 %vm87_vm0, %v10768_v27  ;;  %v10706_v31 = vpop.permute.xlu0 %10705  ;;  %v10756_v20 = vld [vmem:[#allocation2 + $0x30] sm:$0xff] }
 0xb04   :  { %10744 = vst.msk [vmem:[#allocation2 + $0x50] sm:$0xff] %vm10733_vm6, %v10706_v31  ;;  %v10708_v44 = vpop.permute.xlu1 %10707  ;;  %v10757_v3 = vld [vmem:[#allocation2 + $0x38] sm:$0xff] }
 0xb05   :  { %10745 = vst.msk [vmem:[#allocation2 + $0x58] sm:$0xff] %vm10733_vm6, %v10708_v44  ;;  %v10769_v35 = vpack.c.bf16 %v10757_v3, %v10756_v20 }
 0xb07   :  { %13149 = vmatmul.mubr.msk.bf16.gmra.mxu1 %vm87_vm0, %v10769_v35  ;;  %v10710_v51 = vpop.permute.xlu0 %10709  ;;  %v10758_v22 = vld [vmem:[#allocation2 + $0x40] sm:$0xff] }
 0xb08   :  { %10746 = vst.msk [vmem:[#allocation2 + $0x60] sm:$0xff] %vm10733_vm6, %v10710_v51  ;;  %v10712_v24 = vpop.permute.xlu1 %10711  ;;  %v10759_v17 = vld [vmem:[#allocation2 + $0x48] sm:$0xff]  ;;  %v13614_v35 = vld [vmem:[#allocation3 + $0x40] sm:$0xff] }
 0xb09   :  { %10747 = vst.msk [vmem:[#allocation2 + $0x68] sm:$0xff] %vm10733_vm6, %v10712_v24  ;;  %v10770_v1 = vpack.c.bf16 %v10759_v17, %v10758_v22 }
 0xb0b   :  { %13152 = vmatprep.mubr.msk.bf16.mxu1 %vm87_vm0, %v10770_v1  ;;  %v10714_v21 = vpop.permute.xlu0 %10713  ;;  %v10760_v23 = vld [vmem:[#allocation2 + $0x50] sm:$0xff] }
 0xb0c   :  { %10748 = vst.msk [vmem:[#allocation2 + $0x70] sm:$0xff] %vm10733_vm6, %v10714_v21  ;;  %v10716_v28 = vpop.permute.xlu1 %10715  ;;  %v10761_v7 = vld [vmem:[#allocation2 + $0x58] sm:$0xff] }
 0xb0d   :  { %10749 = vst.msk [vmem:[#allocation2 + $0x78] sm:$0xff] %vm10733_vm6, %v10716_v28  ;;  %v10771_v38 = vpack.c.bf16 %v10761_v7, %v10760_v23  ;;  %v13615_v28 = vld [vmem:[#allocation3 + $0x48] sm:$0xff] }
 0xb0f   :  { %13153 = vmatmul.mubr.msk.bf16.gmra.mxu1 %vm87_vm0, %v10771_v38  ;;  %v10762_v32 = vld [vmem:[#allocation2 + $0x60] sm:$0xff]  ;;  %v13616_v38 = vld [vmem:[#allocation3 + $0x50] sm:$0xff] }
 0xb10   :  { %v10763_v10 = vld [vmem:[#allocation2 + $0x68] sm:$0xff] }
 0xb11   :  { %v10772_v18 = vpack.c.bf16 %v10763_v10, %v10762_v32 }
 0xb13   :  { %13156 = vmatprep.mubr.msk.bf16.mxu1 %vm87_vm0, %v10772_v18  ;;  %v10764_v56 = vld [vmem:[#allocation2 + $0x70] sm:$0xff] }
 0xb14   :  { %v10765_v59 = vld [vmem:[#allocation2 + $0x78] sm:$0xff] }
 0xb15   :  { %v10773_v16 = vpack.c.bf16 %v10765_v59, %v10764_v56  ;;  %v13617_v56 = vld [vmem:[#allocation3 + $0x58] sm:$0xff] }
 0xb17   :  { %13157 = vmatmul.mubr.msk.bf16.gmra.mxu1 %vm87_vm0, %v10773_v16 }
 0xbbe   :  { %v13146_v29 = vpop.f32.mrf.mxu1 }
 0xbbf   :  { %v10861_v8 = vadd.f32 %v13146_v29, %v15728_v47 }
 0xbc0   :  { %v10852_v6 = vpop.f32.mrf.mxu1 }
 0xbc1   :  { %v10853_v46 = vadd.f32 %v10852_v6, %v15728_v47  ;;  %v15734_v34 = vadd.f32 %v13607_v4, %v10861_v8  ;;  %v13618_v8 = vld [vmem:[#allocation3 + $0x60] sm:$0xff] }
 0xbc2   :  { %v13147_v9 = vpop.f32.mrf.mxu1 }
 0xbc3   :  { %v15732_v45 = vadd.f32 %v13606_v11, %v10853_v46  ;;  %v10864_v0 = vadd.f32 %v13147_v9, %v15728_v47  ;;  %v10937_v33 = vsel %vm87_vm0, %v15734_v34, 0.0 }
 0xbc4   :  { %v10855_v12 = vpop.f32.mrf.mxu1 }
 0xbc5   :  { %v10856_v40 = vadd.f32 %v10855_v12, %v15728_v47  ;;  %v10931_v63 = vsel %vm87_vm0, %v15732_v45, 0.0  ;;  %v15742_v49 = vadd.f32 %v13609_v19, %v10864_v0 }
 0xbc6   :  { %10932 = vadd.xlane.f32.xlu0 %v10931_v63 }
 0xbc7   :  { %v15740_v5 = vadd.f32 %v13608_v25, %v10856_v40  ;;  %v13150_v54 = vpop.f32.mrf.mxu1  ;;  %v10940_v61 = vsel %vm87_vm0, %v15742_v49, 0.0  ;;  %v13619_v40 = vld [vmem:[#allocation3 + $0x68] sm:$0xff]  ;;  %v13620_v25 = vld [vmem:[#allocation3 + $0x70] sm:$0xff] }
 0xbc8   :  { %v10877_v50 = vadd.f32 %v13150_v54, %v15728_v47 }
 0xbc9   :  { %v10868_v36 = vpop.f32.mrf.mxu1  ;;  %v10934_v48 = vsel %vm87_vm0, %v15740_v5, 0.0 }
 0xbca   :  { %v10869_v60 = vadd.f32 %v10868_v36, %v15728_v47  ;;  %10938 = vadd.xlane.f32.xlu0 %v10937_v33  ;;  %10935 = vadd.xlane.f32.xlu1 %v10934_v48  ;;  %v15758_v58 = vadd.f32 %v13612_v14, %v10877_v50  ;;  %v13621_v36 = vld [vmem:[#allocation3 + $0x78] sm:$0xff] }
 0xbcb   :  { %v13151_v53 = vpop.f32.mrf.mxu1 }
 0xbcc   :  { %v15750_v52 = vadd.f32 %v13610_v43, %v10869_v60  ;;  %v10880_v2 = vadd.f32 %v13151_v53, %v15728_v47  ;;  %v10949_v24 = vsel %vm87_vm0, %v15758_v58, 0.0 }
 0xbcd   :  { %v10871_v41 = vpop.f32.mrf.mxu1 }
 0xbce   :  { %v10872_v26 = vadd.f32 %v10871_v41, %v15728_v47  ;;  %10941 = vadd.xlane.f32.xlu0 %v10940_v61  ;;  %v10943_v42 = vsel %vm87_vm0, %v15750_v52, 0.0  ;;  %v15762_v27 = vadd.f32 %v13613_v55, %v10880_v2 }
 0xbcf   :  { %v13154_v62 = vpop.f32.mrf.mxu1 }
 0xbd0   :  { %v15756_v15 = vadd.f32 %v13611_v30, %v10872_v26  ;;  %v10893_v3 = vadd.f32 %v13154_v62, %v15728_v47  ;;  %v10952_v21 = vsel %vm87_vm0, %v15762_v27, 0.0 }
 0xbd1   :  { %v10884_v57 = vpop.f32.mrf.mxu1 }
 0xbd2   :  { %v10885_v31 = vadd.f32 %v10884_v57, %v15728_v47  ;;  %10944 = vadd.xlane.f32.xlu0 %v10943_v42  ;;  %v10946_v20 = vsel %vm87_vm0, %v15756_v15, 0.0  ;;  %v15778_v32 = vadd.f32 %v13616_v38, %v10893_v3 }
 0xbd3   :  { %v13155_v44 = vpop.f32.mrf.mxu1  ;;  %10947 = vadd.xlane.f32.xlu1 %v10946_v20 }
 0xbd4   :  { %v15768_v51 = vadd.f32 %v13614_v35, %v10885_v31  ;;  %v10896_v17 = vadd.f32 %v13155_v44, %v15728_v47  ;;  %v10961_v11 = vsel %vm87_vm0, %v15778_v32, 0.0 }
 0xbd5   :  { %v10887_v22 = vpop.f32.mrf.mxu1 }
 0xbd6   :  { %v10888_v1 = vadd.f32 %v10887_v22, %v15728_v47  ;;  %10950 = vadd.xlane.f32.xlu0 %v10949_v24  ;;  %v10955_v18 = vsel %vm87_vm0, %v15768_v51, 0.0  ;;  %v15782_v59 = vadd.f32 %v13617_v56, %v10896_v17 }
 0xbd7   :  { %10953 = vadd.xlane.f32.xlu1 %v10952_v21  ;;  %v13158_v23 = vpop.f32.mrf.mxu1 }
 0xbd8   :  { %v15776_v7 = vadd.f32 %v13615_v28, %v10888_v1  ;;  %v10909_v6 = vadd.f32 %v13158_v23, %v15728_v47  ;;  %v10964_v0 = vsel %vm87_vm0, %v15782_v59, 0.0 }
 0xbd9   :  { %v10900_v10 = vpop.f32.mrf.mxu1 }
 0xbda   :  { %v10901_v16 = vadd.f32 %v10900_v10, %v15728_v47  ;;  %10956 = vadd.xlane.f32.xlu0 %v10955_v18  ;;  %v10958_v37 = vsel %vm87_vm0, %v15776_v7, 0.0  ;;  %v15798_v54 = vadd.f32 %v13620_v25, %v10909_v6 }
 0xbdb   :  { %10959 = vadd.xlane.f32.xlu1 %v10958_v37  ;;  %v13159_v29 = vpop.f32.mrf.mxu1 }
 0xbdc   :  { %v15788_v46 = vadd.f32 %v13618_v8, %v10901_v16  ;;  %v10912_v12 = vadd.f32 %v13159_v29, %v15728_v47  ;;  %v10973_v48 = vsel %vm87_vm0, %v15798_v54, 0.0 }
 0xbdd   :  { %v10903_v9 = vpop.f32.mrf.mxu1 }
 0xbde   :  { %v10904_v4 = vadd.f32 %v10903_v9, %v15728_v47  ;;  %10962 = vadd.xlane.f32.xlu0 %v10961_v11  ;;  %v10967_v19 = vsel %vm87_vm0, %v15788_v46, 0.0  ;;  %v15802_v33 = vadd.f32 %v13621_v36, %v10912_v12 }
 0xbdf   :  { %10965 = vadd.xlane.f32.xlu1 %v10964_v0 }
 0xbe0   :  { %v15796_v63 = vadd.f32 %v13619_v40, %v10904_v4  ;;  %v10976_v60 = vsel %vm87_vm0, %v15802_v33, 0.0 }
 0xbe2   :  { %v10970_v47 = vsel %vm87_vm0, %v15796_v63, 0.0  ;;  %10968 = vadd.xlane.f32.xlu0 %v10967_v19 }
 0xbe3   :  { %10971 = vadd.xlane.f32.xlu1 %v10970_v47 }
 0xbe6   :  { %10974 = vadd.xlane.f32.xlu0 %v10973_v48 }
 0xbe7   :  { %10977 = vadd.xlane.f32.xlu1 %v10976_v60 }
 0xc4f   :  { %v10933_v53 = vpop.xlane.xlu0 %10932 }
 0xc50   :  { %v10980_v50 = vmul.f32 0.03125, %v10933_v53 }
 0xc52   :  { %v15811_v43 = vsub.f32 %v15732_v45, %v10980_v50 }
 0xc53   :  { %v10939_v41 = vpop.xlane.xlu0 %10938  ;;  %v10936_v61 = vpop.xlane.xlu1 %10935 }
 0xc54   :  { %v10982_v2 = vmul.f32 0.03125, %v10939_v41  ;;  %v10981_v26 = vmul.f32 0.03125, %v10936_v61  ;;  %v11012_v62 = vmul.f32 %v15811_v43, %v15811_v43 }
 0xc56   :  { %v15816_v30 = vsub.f32 %v15734_v34, %v10982_v2  ;;  %v15819_v14 = vsub.f32 %v15740_v5, %v10981_v26  ;;  %v11028_v57 = vsel %vm87_vm0, %v11012_v62, 0.0 }
 0xc57   :  { %v10942_v42 = vpop.xlane.xlu0 %10941  ;;  %11029 = vadd.xlane.f32.xlu0 %v11028_v57 }
 0xc58   :  { %v10983_v55 = vmul.f32 0.03125, %v10942_v42  ;;  %v11014_v45 = vmul.f32 %v15816_v30, %v15816_v30  ;;  %v11013_v31 = vmul.f32 %v15819_v14, %v15819_v14 }
 0xc5a   :  { %v15827_v20 = vsub.f32 %v15742_v49, %v10983_v55  ;;  %v11034_v34 = vsel %vm87_vm0, %v11014_v45, 0.0  ;;  %v11031_v44 = vsel %vm87_vm0, %v11013_v31, 0.0 }
 0xc5b   :  { %v10945_v5 = vpop.xlane.xlu0 %10944  ;;  %11035 = vadd.xlane.f32.xlu0 %v11034_v34  ;;  %11032 = vadd.xlane.f32.xlu1 %v11031_v44 }
 0xc5c   :  { %v10984_v3 = vmul.f32 0.03125, %v10945_v5  ;;  %v10948_v35 = vpop.xlane.xlu1 %10947  ;;  %v11015_v22 = vmul.f32 %v15827_v20, %v15827_v20 }
 0xc5d   :  { %v10985_v24 = vmul.f32 0.03125, %v10948_v35 }
 0xc5e   :  { %v15834_v17 = vsub.f32 %v15750_v52, %v10984_v3  ;;  %v11037_v1 = vsel %vm87_vm0, %v11015_v22, 0.0 }
 0xc5f   :  { %v15838_v49 = vsub.f32 %v15756_v15, %v10985_v24  ;;  %v10951_v21 = vpop.xlane.xlu0 %10950  ;;  %11038 = vadd.xlane.f32.xlu1 %v11037_v1  ;;  %v13244_v1 = vld [vmem:[%s16456_s3] sm:$0xff]  }
 0xc60   :  { %v10986_v23 = vmul.f32 0.03125, %v10951_v21  ;;  %v10954_v28 = vpop.xlane.xlu1 %10953  ;;  %v11016_v38 = vmul.f32 %v15834_v17, %v15834_v17 }
 0xc61   :  { %v10987_v10 = vmul.f32 0.03125, %v10954_v28  ;;  %v11017_v18 = vmul.f32 %v15838_v49, %v15838_v49 }
 0xc62   :  { %v15845_v56 = vsub.f32 %v15758_v58, %v10986_v23  ;;  %v11040_v52 = vsel %vm87_vm0, %v11016_v38, 0.0 }
 0xc63   :  { %v15849_v16 = vsub.f32 %v15762_v27, %v10987_v10  ;;  %v10957_v15 = vpop.xlane.xlu0 %10956  ;;  %11041 = vadd.xlane.f32.xlu0 %v11040_v52  ;;  %v11043_v37 = vsel %vm87_vm0, %v11017_v18, 0.0 }
 0xc64   :  { %v10988_v29 = vmul.f32 0.03125, %v10957_v15  ;;  %11044 = vadd.xlane.f32.xlu1 %v11043_v37  ;;  %v10960_v6 = vpop.xlane.xlu1 %10959  ;;  %v11018_v8 = vmul.f32 %v15845_v56, %v15845_v56 }
 0xc65   :  { %v10989_v9 = vmul.f32 0.03125, %v10960_v6  ;;  %v11019_v58 = vmul.f32 %v15849_v16, %v15849_v16 }
 0xc66   :  { %v15857_v11 = vsub.f32 %v15768_v51, %v10988_v29  ;;  %v11046_v27 = vsel %vm87_vm0, %v11018_v8, 0.0 }
 0xc67   :  { %v15861_v12 = vsub.f32 %v15776_v7, %v10989_v9  ;;  %v10963_v4 = vpop.xlane.xlu0 %10962  ;;  %11047 = vadd.xlane.f32.xlu0 %v11046_v27  ;;  %v11049_v0 = vsel %vm87_vm0, %v11019_v58, 0.0 }
 0xc68   :  { %v10990_v40 = vmul.f32 0.03125, %v10963_v4  ;;  %11050 = vadd.xlane.f32.xlu1 %v11049_v0  ;;  %v10966_v25 = vpop.xlane.xlu1 %10965  ;;  %v11020_v19 = vmul.f32 %v15857_v11, %v15857_v11 }
 0xc69   :  { %v10991_v36 = vmul.f32 0.03125, %v10966_v25  ;;  %v11021_v51 = vmul.f32 %v15861_v12, %v15861_v12 }
 0xc6a   :  { %v15869_v47 = vsub.f32 %v15778_v32, %v10990_v40  ;;  %v11052_v7 = vsel %vm87_vm0, %v11020_v19, 0.0  ;;  %v11142_v40 = vsub.s32 2, %v16495_v13 }
 0xc6b   :  { %v15873_v48 = vsub.f32 %v15782_v59, %v10991_v36  ;;  %11053 = vadd.xlane.f32.xlu0 %v11052_v7  ;;  %v10969_v60 = vpop.xlane.xlu0 %10968  ;;  %v11055_v53 = vsel %vm87_vm0, %v11021_v51, 0.0 }
 0xc6c   :  { %v10992_v50 = vmul.f32 0.03125, %v10969_v60  ;;  %11056 = vadd.xlane.f32.xlu1 %v11055_v53  ;;  %v10972_v41 = vpop.xlane.xlu1 %10971  ;;  %v11022_v61 = vmul.f32 %v15869_v47, %v15869_v47 }
 0xc6d   :  { %v10993_v2 = vmul.f32 0.03125, %v10972_v41  ;;  %v11023_v32 = vmul.f32 %v15873_v48, %v15873_v48 }
 0xc6e   :  { %v15881_v26 = vsub.f32 %v15788_v46, %v10992_v50  ;;  %v11058_v59 = vsel %vm87_vm0, %v11022_v61, 0.0  ;;  %v15914_v50 = vrot.slane %v15725_v39, %v11142_v40 }
 0xc6f   :  { %v15885_v62 = vsub.f32 %v15796_v63, %v10993_v2  ;;  %11059 = vadd.xlane.f32.xlu0 %v11058_v59  ;;  %v10975_v57 = vpop.xlane.xlu0 %10974  ;;  %v11061_v42 = vsel %vm87_vm0, %v11023_v32, 0.0  ;;  %v11162_v32 = vsub.s32 3, %v16495_v13 }
 0xc70   :  { %v10994_v55 = vmul.f32 0.03125, %v10975_v57  ;;  %11062 = vadd.xlane.f32.xlu1 %v11061_v42  ;;  %v10978_v45 = vpop.xlane.xlu1 %10977  ;;  %v11024_v31 = vmul.f32 %v15881_v26, %v15881_v26 }
 0xc71   :  { %v10995_v34 = vmul.f32 0.03125, %v10978_v45  ;;  %v11025_v46 = vmul.f32 %v15885_v62, %v15885_v62 }
 0xc72   :  { %v15893_v44 = vsub.f32 %v15798_v54, %v10994_v55  ;;  %v11064_v63 = vsel %vm87_vm0, %v11024_v31, 0.0 }
 0xc73   :  { %v15897_v5 = vsub.f32 %v15802_v33, %v10995_v34  ;;  %11065 = vadd.xlane.f32.xlu0 %v11064_v63  ;;  %v11067_v3 = vsel %vm87_vm0, %v11025_v46, 0.0  ;;  %v13243_v33 = vld [vmem:[%s16456_s3 + $0x8] sm:$0xff]  }
 0xc74   :  { %11068 = vadd.xlane.f32.xlu1 %v11067_v3  ;;  %v11026_v35 = vmul.f32 %v15893_v44, %v15893_v44  ;;  %13160 = vmatprep.subr.bf16.mxu0 %v13243_v33 }
 0xc75   :  { %v11027_v22 = vmul.f32 %v15897_v5, %v15897_v5  ;;  %13161 = vmatpush3.bf16.msra.mxu0 %v13243_v33 }
 0xc76   :  { %v11070_v24 = vsel %vm87_vm0, %v11026_v35, 0.0  ;;  %13162 = vmatprep.subr.bf16.mxu0 %v13244_v1 }
 0xc77   :  { %11071 = vadd.xlane.f32.xlu0 %v11070_v24  ;;  %v11073_v54 = vsel %vm87_vm0, %v11027_v22, 0.0 }
 0xc78   :  { %11074 = vadd.xlane.f32.xlu1 %v11073_v54 }
 0xc79   :  { %13163 = vmatpush3.bf16.msra.mxu0 %v13244_v1 }
 0xce0   :  { %v11030_v21 = vpop.xlane.xlu0 %11029 }
 0xce1   :  { %v11076_v23 = vmul.f32 0.03125, %v11030_v21 }
 0xce3   :  { %v11092_v28 = vadd.f32 1e-05, %v11076_v23 }
 0xce4   :  { %v11036_v38 = vpop.xlane.xlu0 %11035  ;;  %v11033_v10 = vpop.xlane.xlu1 %11032 }
 0xce5   :  { %13509 = vrsqrt.f32 %v11092_v28  ;;  %v11078_v18 = vmul.f32 0.03125, %v11036_v38  ;;  %v11077_v52 = vmul.f32 0.03125, %v11033_v10 }
 0xce7   :  { %v11094_v15 = vadd.f32 1e-05, %v11078_v18  ;;  %v11093_v37 = vadd.f32 1e-05, %v11077_v52 }
 0xce8   :  { %v11039_v29 = vpop.xlane.xlu1 %11038 }
 0xce9   :  { %13511 = vrsqrt.f32 %v11094_v15  ;;  %v11079_v6 = vmul.f32 0.03125, %v11039_v29 }
 0xcea   :  { %13513 = vrsqrt.f32 %v11093_v37 }
 0xceb   :  { %v11095_v8 = vadd.f32 1e-05, %v11079_v6 }
 0xcec   :  { %v11042_v9 = vpop.xlane.xlu0 %11041 }
 0xced   :  { %13515 = vrsqrt.f32 %v11095_v8  ;;  %v11080_v58 = vmul.f32 0.03125, %v11042_v9  ;;  %v11045_v27 = vpop.xlane.xlu1 %11044 }
 0xcee   :  { %v11081_v4 = vmul.f32 0.03125, %v11045_v27 }
 0xcef   :  { %v11096_v0 = vadd.f32 1e-05, %v11080_v58 }
 0xcf0   :  { %v11097_v25 = vadd.f32 1e-05, %v11081_v4  ;;  %v11048_v19 = vpop.xlane.xlu0 %11047 }
 0xcf1   :  { %13517 = vrsqrt.f32 %v11096_v0  ;;  %v11082_v36 = vmul.f32 0.03125, %v11048_v19  ;;  %v11051_v51 = vpop.xlane.xlu1 %11050 }
 0xcf2   :  { %v13510_v7 = vpop.eup %13509  ;;  %13519 = vrsqrt.f32 %v11097_v25  ;;  %v11083_v60 = vmul.f32 0.03125, %v11051_v51 }
 0xcf3   :  { %v11098_v53 = vadd.f32 1e-05, %v11082_v36  ;;  %v11124_v2 = vmul.f32 %v13510_v7, %v15811_v43  ;;  %v15922_v43 = vrot.slane %v15725_v39, %v11162_v32 }
 0xcf4   :  { %v11099_v41 = vadd.f32 1e-05, %v11083_v60  ;;  %v11054_v61 = vpop.xlane.xlu0 %11053 }
 0xcf5   :  { %13521 = vrsqrt.f32 %v11098_v53  ;;  %v11084_v59 = vmul.f32 0.03125, %v11054_v61  ;;  %v11057_v57 = vpop.xlane.xlu1 %11056  ;;  %v11144_v35 = vmul.f32 %v15914_v50, %v11124_v2 }
 0xcf6   :  { %v13512_v42 = vpop.eup %13511  ;;  %13523 = vrsqrt.f32 %v11099_v41  ;;  %v11085_v55 = vmul.f32 0.03125, %v11057_v57 }
 0xcf7   :  { %v13514_v45 = vpop.eup %13513  ;;  %v11126_v31 = vmul.f32 %v13512_v42, %v15816_v30  ;;  %v11100_v34 = vadd.f32 1e-05, %v11084_v59  ;;  %v15928_v38 = vadd.f32 %v15922_v43, %v11144_v35 }
 0xcf8   :  { %v11101_v46 = vadd.f32 1e-05, %v11085_v55  ;;  %v11060_v63 = vpop.xlane.xlu0 %11059  ;;  %v11125_v3 = vmul.f32 %v13514_v45, %v15819_v14 }
 0xcf9   :  { %13525 = vrsqrt.f32 %v11100_v34  ;;  %v11086_v22 = vmul.f32 0.03125, %v11060_v63  ;;  %v11063_v24 = vpop.xlane.xlu1 %11062  ;;  %v11146_v30 = vmul.f32 %v15914_v50, %v11126_v31 }
 0xcfa   :  { %v13516_v54 = vpop.eup %13515  ;;  %13527 = vrsqrt.f32 %v11101_v46  ;;  %v11087_v33 = vmul.f32 0.03125, %v11063_v24  ;;  %v11145_v1 = vmul.f32 %v15914_v50, %v11125_v3 }
 0xcfb   :  { %v11127_v21 = vmul.f32 %v13516_v54, %v15827_v20  ;;  %v11102_v23 = vadd.f32 1e-05, %v11086_v22  ;;  %v15937_v8 = vadd.f32 %v15922_v43, %v11146_v30 }
 0xcfc   :  { %v11103_v28 = vadd.f32 1e-05, %v11087_v33  ;;  %v11066_v14 = vpop.xlane.xlu0 %11065  ;;  %v15931_v39 = vadd.f32 %v15922_v43, %v11145_v1 }
 0xcfd   :  { %v11147_v10 = vmul.f32 %v15914_v50, %v11127_v21  ;;  %13529 = vrsqrt.f32 %v11102_v23  ;;  %v11088_v18 = vmul.f32 0.03125, %v11066_v14  ;;  %v11069_v52 = vpop.xlane.xlu1 %11068 }
 0xcfe   :  { %v13518_v15 = vpop.eup %13517  ;;  %13531 = vrsqrt.f32 %v11103_v28  ;;  %v11089_v37 = vmul.f32 0.03125, %v11069_v52  ;;  %v11180_v20 = vpack.c.bf16 %v15931_v39, %v15928_v38 }
 0xcff   :  { %v13520_v29 = vpop.eup %13519  ;;  %v11104_v6 = vadd.f32 1e-05, %v11088_v18  ;;  %v15940_v9 = vadd.f32 %v15922_v43, %v11147_v10  ;;  %v11128_v58 = vmul.f32 %v13518_v15, %v15834_v17 }
 0xd00   :  { %v11105_v27 = vadd.f32 1e-05, %v11089_v37  ;;  %13164 = vmatprep.mubr.msk.bf16.mxu0 %vm87_vm0, %v11180_v20  ;;  %v11072_v4 = vpop.xlane.xlu0 %11071  ;;  %v11129_v0 = vmul.f32 %v13520_v29, %v15838_v49 }
 0xd01   :  { %13533 = vrsqrt.f32 %v11104_v6  ;;  %v11090_v40 = vmul.f32 0.03125, %v11072_v4  ;;  %v11075_v25 = vpop.xlane.xlu1 %11074  ;;  %v11181_v19 = vpack.c.bf16 %v15940_v9, %v15937_v8  ;;  %v11148_v36 = vmul.f32 %v15914_v50, %v11128_v58 }
 0xd02   :  { %v13522_v51 = vpop.eup %13521  ;;  %13535 = vrsqrt.f32 %v11105_v27  ;;  %v11091_v7 = vmul.f32 0.03125, %v11075_v25  ;;  %v11149_v60 = vmul.f32 %v15914_v50, %v11129_v0  ;;  %v13245_v0 = vld [vmem:[%s16458_s5 + $0x38] sm:$0xff]  }
 0xd03   :  { %v13524_v17 = vpop.eup %13523  ;;  %v11130_v53 = vmul.f32 %v13522_v51, %v15845_v56  ;;  %v11106_v41 = vadd.f32 1e-05, %v11090_v40  ;;  %13165 = vmatmul.mubr.msk.bf16.vlgmr.msra.gmra.mxu0 %vm87_vm0, %v11181_v19  ;;  %v15952_v49 = vadd.f32 %v15922_v43, %v11148_v36  ;;  %13180 = vmatprep.subr.bf16.mxu0 %v13245_v0  ;;  %v13248_v40 = vld [vmem:[%s16458_s5 + $0x20] sm:$0xff]   ;;  %v13249_v25 = vld [vmem:[%s16458_s5 + $0x18] sm:$0xff]   ;;  %v13250_v19 = vld [vmem:[%s16458_s5 + $0x10] sm:$0xff]  }
 0xd04   :  { %v11131_v61 = vmul.f32 %v13524_v17, %v15849_v16  ;;  %v11107_v2 = vadd.f32 1e-05, %v11091_v7  ;;  %v15956_v32 = vadd.f32 %v15922_v43, %v11149_v60  ;;  %13212 = vmatprep.subr.bf16.mxu1 %v13245_v0  ;;  %13181 = vmatpush3.bf16.msra.mxu0 %v13245_v0  ;;  %v13251_v36 = vld [vmem:[%s16458_s5 + $0x8] sm:$0xff]   ;;  %v13252_v51 = vld [vmem:[%s16458_s5] sm:$0xff]  }
 0xd05   :  { %13537 = vrsqrt.f32 %v11106_v41  ;;  %v11150_v59 = vmul.f32 %v15914_v50, %v11130_v53  ;;  %13220 = vmatpush3.bf16.msra.mxu1 %v13245_v0  ;;  %v16051_v7 = vld [vmem:[%s16457_s4] ss:$0 sm:$0xff] }
 0xd06   :  { %v13526_v57 = vpop.eup %13525  ;;  %13539 = vrsqrt.f32 %v11107_v2  ;;  %v11182_v56 = vpack.c.bf16 %v15956_v32, %v15952_v49  ;;  %v11151_v42 = vmul.f32 %v15914_v50, %v11131_v61 }
 0xd07   :  { %v13528_v55 = vpop.eup %13527  ;;  %v15963_v45 = vadd.f32 %v15922_v43, %v11150_v59  ;;  %v11132_v16 = vmul.f32 %v13526_v57, %v15857_v11 }
 0xd08   :  { %13168 = vmatprep.mubr.msk.bf16.mxu0 %vm87_vm0, %v11182_v56  ;;  %v15968_v31 = vadd.f32 %v15922_v43, %v11151_v42  ;;  %v11133_v34 = vmul.f32 %v13528_v55, %v15861_v12 }
 0xd09   :  { %v11152_v46 = vmul.f32 %v15914_v50, %v11132_v16 }
 0xd0a   :  { %v13530_v63 = vpop.eup %13529  ;;  %v11183_v3 = vpack.c.bf16 %v15968_v31, %v15963_v45  ;;  %v11153_v35 = vmul.f32 %v15914_v50, %v11133_v34 }
 0xd0b   :  { %v13532_v22 = vpop.eup %13531  ;;  %v11134_v24 = vmul.f32 %v13530_v63, %v15869_v47  ;;  %v15977_v11 = vadd.f32 %v15922_v43, %v11152_v46 }
 0xd0c   :  { %v11135_v54 = vmul.f32 %v13532_v22, %v15873_v48  ;;  %13169 = vmatmul.mubr.msk.bf16.gmra.mxu0 %vm87_vm0, %v11183_v3  ;;  %v15982_v12 = vadd.f32 %v15922_v43, %v11153_v35 }
 0xd0d   :  { %v11154_v33 = vmul.f32 %v15914_v50, %v11134_v24 }
 0xd0e   :  { %v13534_v1 = vpop.eup %13533  ;;  %v11184_v30 = vpack.c.bf16 %v15982_v12, %v15977_v11  ;;  %v11155_v21 = vmul.f32 %v15914_v50, %v11135_v54 }
 0xd0f   :  { %v13536_v23 = vpop.eup %13535  ;;  %v15989_v47 = vadd.f32 %v15922_v43, %v11154_v33  ;;  %v11136_v28 = vmul.f32 %v13534_v1, %v15881_v26 }
 0xd10   :  { %13172 = vmatprep.mubr.msk.bf16.mxu0 %vm87_vm0, %v11184_v30  ;;  %v15994_v48 = vadd.f32 %v15922_v43, %v11155_v21  ;;  %v11137_v14 = vmul.f32 %v13536_v23, %v15885_v62 }
 0xd11   :  { %v11156_v10 = vmul.f32 %v15914_v50, %v11136_v28 }
 0xd12   :  { %v13538_v18 = vpop.eup %13537  ;;  %v11185_v52 = vpack.c.bf16 %v15994_v48, %v15989_v47  ;;  %v11157_v15 = vmul.f32 %v15914_v50, %v11137_v14 }
 0xd13   :  { %v13540_v37 = vpop.eup %13539  ;;  %v11138_v20 = vmul.f32 %v13538_v18, %v15893_v44  ;;  %v16003_v26 = vadd.f32 %v15922_v43, %v11156_v10 }
 0xd14   :  { %v11139_v29 = vmul.f32 %v13540_v37, %v15897_v5  ;;  %13173 = vmatmul.mubr.msk.bf16.gmra.mxu0 %vm87_vm0, %v11185_v52  ;;  %v16008_v62 = vadd.f32 %v15922_v43, %v11157_v15 }
 0xd15   :  { %v11158_v6 = vmul.f32 %v15914_v50, %v11138_v20 }
 0xd16   :  { %v11186_v58 = vpack.c.bf16 %v16008_v62, %v16003_v26  ;;  %v11159_v27 = vmul.f32 %v15914_v50, %v11139_v29  ;;  %v13246_v50 = vld [vmem:[%s16458_s5 + $0x30] sm:$0xff]  }
 0xd17   :  { %v16015_v4 = vadd.f32 %v15922_v43, %v11158_v6  ;;  %13182 = vmatprep.subr.bf16.mxu0 %v13246_v50  ;;  %13213 = vmatprep.subr.bf16.mxu1 %v13246_v50 }
 0xd18   :  { %13176 = vmatprep.mubr.msk.bf16.mxu0 %vm87_vm0, %v11186_v58  ;;  %v16019_v44 = vadd.f32 %v15922_v43, %v11159_v27  ;;  %13183 = vmatpush3.bf16.msra.mxu0 %v13246_v50  ;;  %v13247_v43 = vld [vmem:[%s16458_s5 + $0x28] sm:$0xff]  }
 0xd19   :  { %13221 = vmatpush3.bf16.msra.mxu1 %v13246_v50  ;;  %13184 = vmatprep.subr.bf16.mxu0 %v13247_v43 }
 0xd1a   :  { %v11187_v5 = vpack.c.bf16 %v16019_v44, %v16015_v4  ;;  %13214 = vmatprep.subr.bf16.mxu1 %v13247_v43 }
 0xd1c   :  { %13177 = vmatmul.mubr.msk.bf16.gmra.mxu0 %vm87_vm0, %v11187_v5 }
 0xd1d   :  { %13185 = vmatpush3.bf16.msra.mxu0 %v13247_v43  ;;  %13222 = vmatpush3.bf16.msra.mxu1 %v13247_v43 }
 0xd1e   :  { %13186 = vmatprep.subr.bf16.mxu0 %v13248_v40  ;;  %13215 = vmatprep.subr.bf16.mxu1 %v13248_v40 }
 0xd21   :  { %13187 = vmatpush3.bf16.msra.mxu0 %v13248_v40  ;;  %13223 = vmatpush3.bf16.msra.mxu1 %v13248_v40 }
 0xd22   :  { %13188 = vmatprep.subr.bf16.mxu0 %v13249_v25  ;;  %13216 = vmatprep.subr.bf16.mxu1 %v13249_v25 }
 0xd25   :  { %13189 = vmatpush3.bf16.msra.mxu0 %v13249_v25  ;;  %13224 = vmatpush3.bf16.msra.mxu1 %v13249_v25 }
 0xd26   :  { %13190 = vmatprep.subr.bf16.mxu0 %v13250_v19  ;;  %13217 = vmatprep.subr.bf16.mxu1 %v13250_v19 }
 0xd29   :  { %13191 = vmatpush3.bf16.msra.mxu0 %v13250_v19  ;;  %13225 = vmatpush3.bf16.msra.mxu1 %v13250_v19 }
 0xd2a   :  { %13192 = vmatprep.subr.bf16.mxu0 %v13251_v36  ;;  %13218 = vmatprep.subr.bf16.mxu1 %v13251_v36 }
 0xd2d   :  { %13193 = vmatpush3.bf16.msra.mxu0 %v13251_v36  ;;  %13226 = vmatpush3.bf16.msra.mxu1 %v13251_v36 }
 0xd2e   :  { %13194 = vmatprep.subr.bf16.mxu0 %v13252_v51  ;;  %13219 = vmatprep.subr.bf16.mxu1 %v13252_v51 }
 0xd31   :  { %13195 = vmatpush3.bf16.msra.mxu0 %v13252_v51  ;;  %13227 = vmatpush3.bf16.msra.mxu1 %v13252_v51 }
 0xdc3   :  { %v13166_v60 = vpop.f32.mrf.mxu0 }
 0xdc4   :  { %v11278_v17 = vadd.f32 %v13166_v60, %v16051_v7 }
 0xdc5   :  { %v11269_v53 = vpop.f32.mrf.mxu0 }
 0xdc6   :  { %v11350_v41 = vmul.f32 0.044715, %v11278_v17  ;;  %v16055_v61 = vadd.f32 %v16051_v7, %v11269_v53 }
 0xdc7   :  { %v13167_v2 = vpop.f32.mrf.mxu0 }
 0xdc8   :  { %v11366_v59 = vmul.f32 %v11350_v41, %v11278_v17  ;;  %v11348_v57 = vmul.f32 0.044715, %v16055_v61  ;;  %v16059_v56 = vadd.f32 %v13167_v2, %v16051_v7 }
 0xdc9   :  { %v11272_v42 = vpop.f32.mrf.mxu0 }
 0xdca   :  { %v11382_v55 = vmul.f32 %v11366_v59, %v11278_v17  ;;  %v11364_v16 = vmul.f32 %v11348_v57, %v16055_v61  ;;  %v11351_v34 = vmul.f32 0.044715, %v16059_v56  ;;  %v16064_v46 = vadd.f32 %v16051_v7, %v11272_v42 }
 0xdcc   :  { %v11398_v63 = vadd.f32 %v11382_v55, %v11278_v17  ;;  %v11380_v3 = vmul.f32 %v11364_v16, %v16055_v61  ;;  %v11367_v35 = vmul.f32 %v11351_v34, %v16059_v56  ;;  %v13170_v22 = vpop.f32.mrf.mxu0  ;;  %v11349_v24 = vmul.f32 0.044715, %v16064_v46 }
 0xdcd   :  { %v16070_v54 = vadd.f32 %v13170_v22, %v16051_v7 }
 0xdce   :  { %v11414_v33 = vmul.f32 0.7978846, %v11398_v63  ;;  %v11383_v1 = vmul.f32 %v11367_v35, %v16059_v56  ;;  %v11285_v30 = vpop.f32.mrf.mxu0  ;;  %v11396_v21 = vadd.f32 %v11380_v3, %v16055_v61  ;;  %v11365_v23 = vmul.f32 %v11349_v24, %v16064_v46 }
 0xdcf   :  { %v11354_v28 = vmul.f32 0.044715, %v16070_v54  ;;  %v16077_v14 = vadd.f32 %v16051_v7, %v11285_v30  ;;  %v11334_v35 = vmul.f32 0.5, %v11278_v17 }
 0xdd0   :  { %13541 = vtanh.f32 %v11414_v33  ;;  %v11399_v10 = vadd.f32 %v11383_v1, %v16059_v56  ;;  %v13171_v18 = vpop.f32.mrf.mxu0  ;;  %v11412_v52 = vmul.f32 0.7978846, %v11396_v21  ;;  %v11381_v15 = vmul.f32 %v11365_v23, %v16064_v46 }
 0xdd1   :  { %v11370_v37 = vmul.f32 %v11354_v28, %v16070_v54  ;;  %v11352_v20 = vmul.f32 0.044715, %v16077_v14  ;;  %v16084_v29 = vadd.f32 %v13171_v18, %v16051_v7 }
 0xdd2   :  { %v11415_v6 = vmul.f32 0.7978846, %v11399_v10  ;;  %v11288_v58 = vpop.f32.mrf.mxu0  ;;  %13543 = vtanh.f32 %v11412_v52  ;;  %v11397_v40 = vadd.f32 %v11381_v15, %v16064_v46 }
 0xdd3   :  { %v11368_v27 = vmul.f32 %v11352_v20, %v16077_v14  ;;  %v11355_v5 = vmul.f32 0.044715, %v16084_v29  ;;  %v11386_v0 = vmul.f32 %v11370_v37, %v16070_v54  ;;  %v16090_v50 = vadd.f32 %v16051_v7, %v11288_v58 }
 0xdd4   :  { %13545 = vtanh.f32 %v11415_v6  ;;  %v13174_v43 = vpop.f32.mrf.mxu0  ;;  %v11413_v53 = vmul.f32 0.7978846, %v11397_v40  ;;  %v11335_v37 = vmul.f32 0.5, %v16059_v56  ;;  %v11332_v6 = vmul.f32 0.5, %v16055_v61 }
 0xdd5   :  { %v11384_v25 = vmul.f32 %v11368_v27, %v16077_v14  ;;  %v11371_v19 = vmul.f32 %v11355_v5, %v16084_v29  ;;  %v16096_v36 = vadd.f32 %v13174_v43, %v16051_v7  ;;  %v11353_v51 = vmul.f32 0.044715, %v16090_v50 }
 0xdd6   :  { %v11301_v60 = vpop.f32.mrf.mxu0  ;;  %v11402_v57 = vadd.f32 %v11386_v0, %v16070_v54  ;;  %13547 = vtanh.f32 %v11413_v53  ;;  %v11333_v58 = vmul.f32 0.5, %v16064_v46 }
 0xdd7   :  { %v11387_v41 = vmul.f32 %v11371_v19, %v16084_v29  ;;  %v11358_v2 = vmul.f32 0.044715, %v16096_v36  ;;  %v16102_v59 = vadd.f32 %v16051_v7, %v11301_v60  ;;  %v11369_v42 = vmul.f32 %v11353_v51, %v16090_v50 }
 0xdd8   :  { %v13175_v55 = vpop.f32.mrf.mxu0  ;;  %v11400_v16 = vadd.f32 %v11384_v25, %v16077_v14  ;;  %v11418_v28 = vmul.f32 0.7978846, %v11402_v57 }
 0xdd9   :  { %v11403_v34 = vadd.f32 %v11387_v41, %v16084_v29  ;;  %v11374_v63 = vmul.f32 %v11358_v2, %v16096_v36  ;;  %v11356_v3 = vmul.f32 0.044715, %v16102_v59  ;;  %v11385_v22 = vmul.f32 %v11369_v42, %v16090_v50 }
 0xdda   :  { %v16112_v24 = vadd.f32 %v13175_v55, %v16051_v7  ;;  %v11304_v33 = vpop.f32.mrf.mxu0  ;;  %v11416_v23 = vmul.f32 0.7978846, %v11400_v16 }
 0xddb   :  { %v11419_v1 = vmul.f32 0.7978846, %v11403_v34  ;;  %v11390_v30 = vmul.f32 %v11374_v63, %v16096_v36  ;;  %v16116_v21 = vadd.f32 %v16051_v7, %v11304_v33  ;;  %v11372_v10 = vmul.f32 %v11356_v3, %v16102_v59 }
 0xddc   :  { %v11359_v18 = vmul.f32 0.044715, %v16112_v24  ;;  %v13178_v52 = vpop.f32.mrf.mxu0  ;;  %v11401_v17 = vadd.f32 %v11385_v22, %v16090_v50 }
 0xddd   :  { %v13542_v15 = vpop.eup %13541  ;;  %v11357_v20 = vmul.f32 0.044715, %v16116_v21  ;;  %13549 = vtanh.f32 %v11419_v1  ;;  %v11406_v27 = vadd.f32 %v11390_v30, %v16096_v36  ;;  %v16128_v0 = vadd.f32 %v13178_v52, %v16051_v7 }
 0xdde   :  { %v11375_v5 = vmul.f32 %v11359_v18, %v16112_v24  ;;  %v11317_v43 = vpop.f32.mrf.mxu0  ;;  %v11417_v56 = vmul.f32 0.7978846, %v11401_v17  ;;  %13551 = vtanh.f32 %v11416_v23  ;;  %v11388_v61 = vmul.f32 %v11372_v10, %v16102_v59 }
 0xddf   :  { %v11373_v40 = vmul.f32 %v11357_v20, %v16116_v21  ;;  %v16132_v25 = vadd.f32 %v16051_v7, %v11317_v43  ;;  %v13544_v19 = vpop.eup %13543  ;;  %13553 = vtanh.f32 %v11418_v28  ;;  %v11362_v51 = vmul.f32 0.044715, %v16128_v0 }
 0xde0   :  { %v11391_v46 = vmul.f32 %v11375_v5, %v16112_v24  ;;  %v13179_v60 = vpop.f32.mrf.mxu0  ;;  %v11446_v41 = vadd.f32 1.0, %v13542_v15  ;;  %v11422_v16 = vmul.f32 0.7978846, %v11406_v27  ;;  %13555 = vtanh.f32 %v11417_v56 }
 0xde1   :  { %v13546_v53 = vpop.eup %13545  ;;  %v11389_v2 = vmul.f32 %v11373_v40, %v16116_v21  ;;  %v11360_v57 = vmul.f32 0.044715, %v16132_v25  ;;  %v16140_v42 = vadd.f32 %v13179_v60, %v16051_v7  ;;  %v11378_v63 = vmul.f32 %v11362_v51, %v16128_v0 }
 0xde2   :  { %v11447_v55 = vadd.f32 1.0, %v13546_v53  ;;  %v11407_v34 = vadd.f32 %v11391_v46, %v16112_v24  ;;  %v11320_v3 = vpop.f32.mrf.mxu0  ;;  %v11444_v28 = vadd.f32 1.0, %v13544_v19  ;;  %v11404_v10 = vadd.f32 %v11388_v61, %v16102_v59 }
 0xde3   :  { %v11376_v22 = vmul.f32 %v11360_v57, %v16132_v25  ;;  %v11363_v33 = vmul.f32 0.044715, %v16140_v42  ;;  %v16147_v1 = vadd.f32 %v16051_v7, %v11320_v3  ;;  %v11394_v23 = vmul.f32 %v11378_v63, %v16128_v0  ;;  %v13548_v18 = vpop.eup %13547 }
 0xde4   :  { %v11423_v30 = vmul.f32 0.7978846, %v11407_v34  ;;  %v11462_v52 = vmul.f32 %v11446_v41, %v11334_v35  ;;  %v11405_v20 = vadd.f32 %v11389_v2, %v16116_v21  ;;  %v11463_v27 = vmul.f32 %v11447_v55, %v11335_v37 }
 0xde5   :  { %v11379_v17 = vmul.f32 %v11363_v33, %v16140_v42  ;;  %v11361_v15 = vmul.f32 0.044715, %v16147_v1  ;;  %v11410_v7 = vadd.f32 %v11394_v23, %v16128_v0  ;;  %v11445_v5 = vadd.f32 1.0, %v13548_v18 }
 0xde6   :  { %13557 = vtanh.f32 %v11423_v30  ;;  %v11392_v43 = vmul.f32 %v11376_v22, %v16132_v25  ;;  %v11420_v19 = vmul.f32 0.7978846, %v11404_v10  ;;  %v11460_v35 = vmul.f32 %v11444_v28, %v11332_v6 }
 0xde7   :  { %v11395_v40 = vmul.f32 %v11379_v17, %v16140_v42  ;;  %v11377_v56 = vmul.f32 %v11361_v15, %v16147_v1  ;;  %13559 = vtanh.f32 %v11422_v16  ;;  %v11461_v61 = vmul.f32 %v11445_v5, %v11333_v58 }
 0xde8   :  { %v11421_v46 = vmul.f32 0.7978846, %v11405_v20  ;;  %v11426_v51 = vmul.f32 0.7978846, %v11410_v7  ;;  %13561 = vtanh.f32 %v11420_v19  ;;  %v11477_v2 = vpack.c.bf16 %v11463_v27, %v11462_v52 }
 0xde9   :  { %v11411_v60 = vadd.f32 %v11395_v40, %v16140_v42  ;;  %v11393_v37 = vmul.f32 %v11377_v56, %v16147_v1  ;;  %v11476_v53 = vpack.c.bf16 %v11461_v61, %v11460_v35  ;;  %v11408_v55 = vadd.f32 %v11392_v43, %v16132_v25 }
 0xdea   :  { %v13550_v41 = vpop.eup %13549  ;;  %13563 = vtanh.f32 %v11421_v46  ;;  %v11339_v23 = vmul.f32 0.5, %v16084_v29  ;;  %v11336_v28 = vmul.f32 0.5, %v16077_v14  ;;  %v11337_v10 = vmul.f32 0.5, %v16090_v50 }
 0xdeb   :  { %v11427_v57 = vmul.f32 0.7978846, %v11411_v60  ;;  %v13552_v34 = vpop.eup %13551  ;;  %13196 = vmatprep.mubr.bf16.mxu0 %v11476_v53  ;;  %v11409_v16 = vadd.f32 %v11393_v37, %v16147_v1  ;;  %13565 = vtanh.f32 %v11426_v51  ;;  %v11424_v58 = vmul.f32 0.7978846, %v11408_v55 }
 0xdec   :  { %v13554_v6 = vpop.eup %13553  ;;  %13197 = vmatmul.mubr.bf16.vlgmr.msra.gmra.mxu0 %v11477_v2  ;;  %v11451_v63 = vadd.f32 1.0, %v13550_v41  ;;  %v11448_v22 = vadd.f32 1.0, %v13552_v34  ;;  %v11338_v52 = vmul.f32 0.5, %v16070_v54  ;;  %v11343_v14 = vmul.f32 0.5, %v16112_v24 }
 0xded   :  { %13567 = vtanh.f32 %v11427_v57  ;;  %v11425_v3 = vmul.f32 0.7978846, %v11409_v16  ;;  %v13556_v33 = vpop.eup %13555  ;;  %v11450_v30 = vadd.f32 1.0, %v13554_v6  ;;  %v11340_v61 = vmul.f32 0.5, %v16102_v59 }
 0xdee   :  { %13569 = vtanh.f32 %v11424_v58  ;;  %v11449_v18 = vadd.f32 1.0, %v13556_v33  ;;  %v11467_v17 = vmul.f32 %v11451_v63, %v11339_v23  ;;  %v11464_v20 = vmul.f32 %v11448_v22, %v11336_v28 }
 0xdef   :  { %13571 = vtanh.f32 %v11425_v3  ;;  %v11466_v7 = vmul.f32 %v11450_v30, %v11338_v52  ;;  %v11341_v54 = vmul.f32 0.5, %v16116_v21  ;;  %v11342_v60 = vmul.f32 0.5, %v16096_v36 }
 0xdf0   :  { %v11465_v27 = vmul.f32 %v11449_v18, %v11337_v10  ;;  %v11344_v6 = vmul.f32 0.5, %v16132_v25  ;;  %v11345_v59 = vmul.f32 0.5, %v16147_v1  ;;  %v11347_v22 = vmul.f32 0.5, %v16140_v42  ;;  %v16178_v1 = vld [vmem:[%s16459_s6] sm:$0xff]  ;;  %s13677_s6 = smov [#allocation6]  }
 0xdf1   :  { %v11479_v56 = vpack.c.bf16 %v11467_v17, %v11466_v7  ;;  %v11346_v23 = vmul.f32 0.5, %v16128_v0  ;;  %v11502_v18 = vsub.s32 4, %v16495_v13  ;;  %s11934_s20 = sshll.u32 %s13677_s6, 4  ;;  %s11935_s20 = int_to_ptr.vmem [resolvable:$true] %s11934_s20 }
 0xdf2   :  { %v11478_v43 = vpack.c.bf16 %v11465_v27, %v11464_v20  ;;  %s13643_s2 = scalar_lea.vmem %s11935_s20, 2048  ;;  %p13648_p6 = scmp.lt.s32.totalorder %s11935_s20, %s11935_s20 }
 0xdf3   :  { %v13558_v15 = vpop.eup %13557  ;;  %v16181_v52 = vrot.slane %v16178_v1, %v11502_v18  ;;  %p13644_p5 = scmp.ne.s32.totalorder %s11935_s20, %s13643_s2  ;;  %p13649_p7 = scmp.lt.s32.totalorder %s13643_s2, %s13643_s2 }
 0xdf4   :  { %v13560_v5 = vpop.eup %13559  ;;  %v11455_v19 = vadd.f32 1.0, %v13558_v15  ;;  %13200 = vmatprep.mubr.bf16.mxu1 %v11478_v43 }
 0xdf5   :  { %v13562_v40 = vpop.eup %13561  ;;  %13201 = vmatmul.mubr.bf16.vlgmr.msra.gmra.mxu1 %v11479_v56  ;;  %v11454_v50 = vadd.f32 1.0, %v13560_v5  ;;  %p13650_p8 = por %p13649_p7, %p13648_p6 }
 0xdf6   :  { %v11452_v29 = vadd.f32 1.0, %v13562_v40  ;;  %v11471_v37 = vmul.f32 %v11455_v19, %v11343_v14 }
 0xdf7   :  { %v13564_v35 = vpop.eup %13563  ;;  %v11470_v55 = vmul.f32 %v11454_v50, %v11342_v60  ;;  %p13651_p9 = pnand %p13650_p8, %p13644_p5 }
 0xdf8   :  { %v11453_v46 = vadd.f32 1.0, %v13564_v35  ;;  %v13566_v51 = vpop.eup %13565  ;;  %v11468_v41 = vmul.f32 %v11452_v29, %v11340_v61 }
 0xdf9   :  { %v11481_v58 = vpack.c.bf16 %v11471_v37, %v11470_v55  ;;  %v11458_v33 = vadd.f32 1.0, %v13566_v51 }
 0xdfa   :  { %v13568_v53 = vpop.eup %13567  ;;  %v11469_v2 = vmul.f32 %v11453_v46, %v11341_v54 }
 0xdfb   :  { %v13570_v57 = vpop.eup %13569  ;;  %v11459_v21 = vadd.f32 1.0, %v13568_v53  ;;  %v11474_v10 = vmul.f32 %v11458_v33, %v11346_v23 }
 0xdfc   :  { %v13572_v34 = vpop.eup %13571  ;;  %v11480_v16 = vpack.c.bf16 %v11469_v2, %v11468_v41  ;;  %v11456_v24 = vadd.f32 1.0, %v13570_v57 }
 0xdfd   :  { %v11457_v63 = vadd.f32 1.0, %v13572_v34  ;;  %v11475_v28 = vmul.f32 %v11459_v21, %v11347_v22 }
 0xdfe   :  { %13204 = vmatprep.mubr.bf16.mxu1 %v11480_v16  ;;  %v11472_v3 = vmul.f32 %v11456_v24, %v11344_v6 }
 0xdff   :  { %13205 = vmatmul.mubr.bf16.gmra.mxu1 %v11481_v58  ;;  %v11473_v36 = vmul.f32 %v11457_v63, %v11345_v59  ;;  %v11483_v25 = vpack.c.bf16 %v11475_v28, %v11474_v10 }
 0xe01   :  { %v11482_v30 = vpack.c.bf16 %v11473_v36, %v11472_v3 }
 0xe03   :  { %13208 = vmatprep.mubr.bf16.mxu1 %v11482_v30 }
 0xe07   :  { %13209 = vmatmul.mubr.bf16.gmra.mxu1 %v11483_v25 }
 0xeac   :  { %v13198_v42 = vpop.f32.mrf.mxu0 }
 0xead   :  { %v11595_v17 = vadd.f32 %v13198_v42, %v16181_v52 }
 0xeae   :  { %v11586_v15 = vpop.f32.mrf.mxu0 }
 0xeaf   :  { %v16185_v0 = vadd.f32 %v11595_v17, %v15937_v8  ;;  %v11587_v20 = vadd.f32 %v11586_v15, %v16181_v52 }
 0xeb0   :  { %v13199_v27 = vpop.f32.mrf.mxu0 }
 0xeb1   :  { %v16189_v7 = vadd.f32 %v11587_v20, %v15928_v38  ;;  %v11598_v5 = vadd.f32 %v13199_v27, %v16181_v52  ;;  %v11671_v43 = vsel %vm87_vm0, %v16185_v0, 0.0 }
 0xeb2   :  { %11672 = vadd.xlane.f32.xlu0 %v11671_v43  ;;  %v11589_v40 = vpop.f32.mrf.mxu0 }
 0xeb3   :  { %v16195_v56 = vadd.f32 %v11598_v5, %v15940_v9  ;;  %v11590_v19 = vadd.f32 %v11589_v40, %v16181_v52  ;;  %v11665_v38 = vsel %vm87_vm0, %v16189_v7, 0.0 }
 0xeb5   :  { %v16199_v8 = vadd.f32 %v11590_v19, %v15931_v39  ;;  %v11674_v29 = vsel %vm87_vm0, %v16195_v56, 0.0  ;;  %v13202_v35 = vpop.f32.mrf.mxu1 }
 0xeb6   :  { %11675 = vadd.xlane.f32.xlu1 %v11674_v29  ;;  %11666 = vadd.xlane.f32.xlu0 %v11665_v38  ;;  %v11611_v14 = vadd.f32 %v13202_v35, %v16181_v52 }
 0xeb7   :  { %v11602_v50 = vpop.f32.mrf.mxu1  ;;  %v11668_v9 = vsel %vm87_vm0, %v16199_v8, 0.0 }
 0xeb8   :  { %v16209_v61 = vadd.f32 %v11611_v14, %v15963_v45  ;;  %v11603_v39 = vadd.f32 %v11602_v50, %v16181_v52 }
 0xeb9   :  { %v13203_v54 = vpop.f32.mrf.mxu1 }
 0xeba   :  { %11669 = vadd.xlane.f32.xlu1 %v11668_v9  ;;  %v16213_v46 = vadd.f32 %v11603_v39, %v15952_v49  ;;  %v11614_v51 = vadd.f32 %v13203_v54, %v16181_v52  ;;  %v11683_v60 = vsel %vm87_vm0, %v16209_v61, 0.0 }
 0xebb   :  { %v11605_v37 = vpop.f32.mrf.mxu1  ;;  %11684 = vadd.xlane.f32.xlu0 %v11683_v60 }
 0xebc   :  { %v16219_v53 = vadd.f32 %v11614_v51, %v15968_v31  ;;  %v11606_v45 = vadd.f32 %v11605_v37, %v16181_v52  ;;  %v11677_v55 = vsel %vm87_vm0, %v16213_v46, 0.0 }
 0xebe   :  { %v16223_v2 = vadd.f32 %v11606_v45, %v15956_v32  ;;  %v11686_v49 = vsel %vm87_vm0, %v16219_v53, 0.0 }
 0xebf   :  { %v13206_v41 = vpop.f32.mrf.mxu1  ;;  %11687 = vadd.xlane.f32.xlu1 %v11686_v49  ;;  %11678 = vadd.xlane.f32.xlu0 %v11677_v55 }
 0xec0   :  { %v11627_v57 = vadd.f32 %v13206_v41, %v16181_v52  ;;  %v11680_v58 = vsel %vm87_vm0, %v16223_v2, 0.0 }
 0xec1   :  { %v11618_v34 = vpop.f32.mrf.mxu1 }
 0xec2   :  { %v16231_v31 = vadd.f32 %v11627_v57, %v15989_v47  ;;  %v11619_v16 = vadd.f32 %v11618_v34, %v16181_v52 }
 0xec3   :  { %v13207_v6 = vpop.f32.mrf.mxu1  ;;  %11681 = vadd.xlane.f32.xlu1 %v11680_v58 }
 0xec4   :  { %v16235_v32 = vadd.f32 %v11619_v16, %v15977_v11  ;;  %v11630_v24 = vadd.f32 %v13207_v6, %v16181_v52  ;;  %v11695_v59 = vsel %vm87_vm0, %v16231_v31, 0.0 }
 0xec5   :  { %v11621_v63 = vpop.f32.mrf.mxu1  ;;  %11696 = vadd.xlane.f32.xlu0 %v11695_v59 }
 0xec6   :  { %v16243_v47 = vadd.f32 %v11630_v24, %v15994_v48  ;;  %v11622_v21 = vadd.f32 %v11621_v63, %v16181_v52  ;;  %v11689_v22 = vsel %vm87_vm0, %v16235_v32, 0.0 }
 0xec7   :  { %v13210_v3 = vpop.f32.mrf.mxu1 }
 0xec8   :  { %v16247_v11 = vadd.f32 %v11622_v21, %v15982_v12  ;;  %v11698_v36 = vsel %vm87_vm0, %v16243_v47, 0.0  ;;  %v11643_v30 = vadd.f32 %v13210_v3, %v16181_v52 }
 0xec9   :  { %v11634_v33 = vpop.f32.mrf.mxu1  ;;  %11699 = vadd.xlane.f32.xlu1 %v11698_v36  ;;  %11690 = vadd.xlane.f32.xlu0 %v11689_v22 }
 0xeca   :  { %v11635_v48 = vadd.f32 %v11634_v33, %v16181_v52  ;;  %v11692_v12 = vsel %vm87_vm0, %v16247_v11, 0.0  ;;  %v16261_v25 = vadd.f32 %v11643_v30, %v16015_v4 }
 0xecb   :  { %v13211_v23 = vpop.f32.mrf.mxu1 }
 0xecc   :  { %v16256_v28 = vadd.f32 %v11635_v48, %v16003_v26  ;;  %v11646_v18 = vadd.f32 %v13211_v23, %v16181_v52  ;;  %v11707_v4 = vsel %vm87_vm0, %v16261_v25, 0.0 }
 0xecd   :  { %v11637_v10 = vpop.f32.mrf.mxu1  ;;  %11693 = vadd.xlane.f32.xlu1 %v11692_v12 }
 0xece   :  { %v11638_v42 = vadd.f32 %v11637_v10, %v16181_v52  ;;  %v11701_v17 = vsel %vm87_vm0, %v16256_v28, 0.0  ;;  %v16271_v26 = vadd.f32 %v11646_v18, %v16019_v44 }
 0xecf   :  { %11702 = vadd.xlane.f32.xlu0 %v11701_v17 }
 0xed0   :  { %v16268_v15 = vadd.f32 %v11638_v42, %v16008_v62  ;;  %v11710_v52 = vsel %vm87_vm0, %v16271_v26, 0.0 }
 0xed2   :  { %v11704_v20 = vsel %vm87_vm0, %v16268_v15, 0.0 }
 0xed3   :  { %11705 = vadd.xlane.f32.xlu1 %v11704_v20  ;;  %11708 = vadd.xlane.f32.xlu0 %v11707_v4 }
 0xed7   :  { %11711 = vadd.xlane.f32.xlu1 %v11710_v52 }
 0xf3b   :  { %v11673_v27 = vpop.xlane.xlu0 %11672 }
 0xf3c   :  { %v11715_v5 = vmul.f32 0.03125, %v11673_v27 }
 0xf3e   :  { %v16280_v62 = vsub.f32 %v16185_v0, %v11715_v5 }
 0xf3f   :  { %v11676_v43 = vpop.xlane.xlu1 %11675  ;;  %v11667_v44 = vpop.xlane.xlu0 %11666 }
 0xf40   :  { %v11716_v40 = vmul.f32 0.03125, %v11676_v43  ;;  %v11713_v19 = vmul.f32 0.03125, %v11667_v44  ;;  %v11747_v29 = vmul.f32 %v16280_v62, %v16280_v62 }
 0xf42   :  { %v16285_v38 = vsub.f32 %v16195_v56, %v11716_v40  ;;  %v16288_v35 = vsub.f32 %v16189_v7, %v11713_v19  ;;  %v11767_v14 = vsel %vm87_vm0, %v11747_v29, 0.0 }
 0xf43   :  { %v11670_v50 = vpop.xlane.xlu1 %11669  ;;  %11768 = vadd.xlane.f32.xlu0 %v11767_v14 }
 0xf44   :  { %v11714_v9 = vmul.f32 0.03125, %v11670_v50  ;;  %v11748_v0 = vmul.f32 %v16285_v38, %v16285_v38  ;;  %v11745_v39 = vmul.f32 %v16288_v35, %v16288_v35  ;;  %v11685_v51 = vpop.xlane.xlu0 %11684 }
 0xf45   :  { %v11719_v60 = vmul.f32 0.03125, %v11685_v51 }
 0xf46   :  { %v16296_v54 = vsub.f32 %v16199_v8, %v11714_v9  ;;  %v11770_v56 = vsel %vm87_vm0, %v11748_v0, 0.0  ;;  %v11761_v7 = vsel %vm87_vm0, %v11745_v39, 0.0 }
 0xf47   :  { %11771 = vadd.xlane.f32.xlu1 %v11770_v56  ;;  %11762 = vadd.xlane.f32.xlu0 %v11761_v7  ;;  %v16303_v45 = vsub.f32 %v16209_v61, %v11719_v60 }
 0xf48   :  { %v11746_v37 = vmul.f32 %v16296_v54, %v16296_v54  ;;  %v11688_v41 = vpop.xlane.xlu1 %11687  ;;  %v11679_v57 = vpop.xlane.xlu0 %11678 }
 0xf49   :  { %v11720_v8 = vmul.f32 0.03125, %v11688_v41  ;;  %v11717_v55 = vmul.f32 0.03125, %v11679_v57  ;;  %v11751_v34 = vmul.f32 %v16303_v45, %v16303_v45 }
 0xf4a   :  { %v11764_v49 = vsel %vm87_vm0, %v11746_v37, 0.0 }
 0xf4b   :  { %11765 = vadd.xlane.f32.xlu1 %v11764_v49  ;;  %v16309_v16 = vsub.f32 %v16219_v53, %v11720_v8  ;;  %v16312_v6 = vsub.f32 %v16213_v46, %v11717_v55  ;;  %v11779_v24 = vsel %vm87_vm0, %v11751_v34, 0.0 }
 0xf4c   :  { %v11682_v61 = vpop.xlane.xlu1 %11681  ;;  %11780 = vadd.xlane.f32.xlu0 %v11779_v24 }
 0xf4d   :  { %v11718_v59 = vmul.f32 0.03125, %v11682_v61  ;;  %v11752_v21 = vmul.f32 %v16309_v16, %v16309_v16  ;;  %v11749_v3 = vmul.f32 %v16312_v6, %v16312_v6 }
 0xf4e   :  { %v11697_v58 = vpop.xlane.xlu0 %11696 }
 0xf4f   :  { %v11723_v63 = vmul.f32 0.03125, %v11697_v58  ;;  %v16320_v36 = vsub.f32 %v16223_v2, %v11718_v59  ;;  %v11782_v46 = vsel %vm87_vm0, %v11752_v21, 0.0  ;;  %v11773_v22 = vsel %vm87_vm0, %v11749_v3, 0.0 }
 0xf50   :  { %11783 = vadd.xlane.f32.xlu1 %v11782_v46  ;;  %11774 = vadd.xlane.f32.xlu0 %v11773_v22 }
 0xf51   :  { %v16323_v53 = vsub.f32 %v16231_v31, %v11723_v63  ;;  %v11750_v12 = vmul.f32 %v16320_v36, %v16320_v36 }
 0xf52   :  { %v11700_v33 = vpop.xlane.xlu1 %11699  ;;  %v11691_v30 = vpop.xlane.xlu0 %11690 }
 0xf53   :  { %v11724_v48 = vmul.f32 0.03125, %v11700_v33  ;;  %v11721_v23 = vmul.f32 0.03125, %v11691_v30  ;;  %v11755_v2 = vmul.f32 %v16323_v53, %v16323_v53  ;;  %v11776_v18 = vsel %vm87_vm0, %v11750_v12, 0.0 }
 0xf54   :  { %11777 = vadd.xlane.f32.xlu1 %v11776_v18  ;;  %v11875_v33 = vsub.s32 5, %v16495_v13 }
 0xf55   :  { %v16332_v10 = vsub.f32 %v16243_v47, %v11724_v48  ;;  %v16335_v31 = vsub.f32 %v16235_v32, %v11721_v23  ;;  %v11791_v42 = vsel %vm87_vm0, %v11755_v2, 0.0  ;;  %v11895_v48 = vsub.s32 6, %v16495_v13 }
 0xf56   :  { %v11694_v17 = vpop.xlane.xlu1 %11693  ;;  %11792 = vadd.xlane.f32.xlu0 %v11791_v42  ;;  %v16378_v42 = vrot.slane %v16178_v1, %v11875_v33 }
 0xf57   :  { %v11722_v20 = vmul.f32 0.03125, %v11694_v17  ;;  %v11756_v4 = vmul.f32 %v16332_v10, %v16332_v10  ;;  %v11753_v52 = vmul.f32 %v16335_v31, %v16335_v31 }
 0xf58   :  { %v11703_v27 = vpop.xlane.xlu0 %11702 }
 0xf59   :  { %v16344_v47 = vsub.f32 %v16247_v11, %v11722_v20  ;;  %v11725_v32 = vmul.f32 0.03125, %v11703_v27  ;;  %v11794_v5 = vsel %vm87_vm0, %v11756_v4, 0.0  ;;  %v11785_v43 = vsel %vm87_vm0, %v11753_v52, 0.0 }
 0xf5a   :  { %11795 = vadd.xlane.f32.xlu1 %v11794_v5  ;;  %11786 = vadd.xlane.f32.xlu0 %v11785_v43  ;;  %v16381_v52 = vrot.slane %v16178_v1, %v11895_v48 }
 0xf5b   :  { %v16349_v44 = vsub.f32 %v16256_v28, %v11725_v32  ;;  %v11754_v40 = vmul.f32 %v16344_v47, %v16344_v47 }
 0xf5c   :  { %v11706_v19 = vpop.xlane.xlu1 %11705  ;;  %v11709_v29 = vpop.xlane.xlu0 %11708 }
 0xf5d   :  { %v11726_v14 = vmul.f32 0.03125, %v11706_v19  ;;  %v11727_v50 = vmul.f32 0.03125, %v11709_v29  ;;  %v11788_v11 = vsel %vm87_vm0, %v11754_v40, 0.0  ;;  %v11757_v9 = vmul.f32 %v16349_v44, %v16349_v44 }
 0xf5e   :  { %11789 = vadd.xlane.f32.xlu1 %v11788_v11 }
 0xf5f   :  { %v16357_v0 = vsub.f32 %v16268_v15, %v11726_v14  ;;  %v16360_v39 = vsub.f32 %v16261_v25, %v11727_v50  ;;  %v11797_v28 = vsel %vm87_vm0, %v11757_v9, 0.0 }
 0xf60   :  { %v11712_v51 = vpop.xlane.xlu1 %11711  ;;  %11798 = vadd.xlane.f32.xlu0 %v11797_v28 }
 0xf61   :  { %v11728_v56 = vmul.f32 0.03125, %v11712_v51  ;;  %v11758_v7 = vmul.f32 %v16357_v0, %v16357_v0  ;;  %v11759_v60 = vmul.f32 %v16360_v39, %v16360_v39 }
 0xf63   :  { %v16368_v37 = vsub.f32 %v16271_v26, %v11728_v56  ;;  %v11800_v15 = vsel %vm87_vm0, %v11758_v7, 0.0  ;;  %v11803_v41 = vsel %vm87_vm0, %v11759_v60, 0.0 }
 0xf64   :  { %11801 = vadd.xlane.f32.xlu1 %v11800_v15  ;;  %11804 = vadd.xlane.f32.xlu0 %v11803_v41 }
 0xf65   :  { %v11760_v25 = vmul.f32 %v16368_v37, %v16368_v37 }
 0xf67   :  { %v11806_v57 = vsel %vm87_vm0, %v11760_v25, 0.0 }
 0xf68   :  { %11807 = vadd.xlane.f32.xlu1 %v11806_v57 }
 0xfcc   :  { %v11769_v49 = vpop.xlane.xlu0 %11768 }
 0xfcd   :  { %v11811_v8 = vmul.f32 0.03125, %v11769_v49 }
 0xfcf   :  { %v11827_v55 = vadd.f32 1e-05, %v11811_v8 }
 0xfd0   :  { %v11772_v34 = vpop.xlane.xlu1 %11771  ;;  %v11763_v24 = vpop.xlane.xlu0 %11762 }
 0xfd1   :  { %13573 = vrsqrt.f32 %v11827_v55  ;;  %v11812_v26 = vmul.f32 0.03125, %v11772_v34  ;;  %v11809_v61 = vmul.f32 0.03125, %v11763_v24 }
 0xfd3   :  { %v11828_v58 = vadd.f32 1e-05, %v11812_v26  ;;  %v11825_v59 = vadd.f32 1e-05, %v11809_v61 }
 0xfd4   :  { %v11766_v63 = vpop.xlane.xlu1 %11765 }
 0xfd5   :  { %13575 = vrsqrt.f32 %v11828_v58  ;;  %v11810_v21 = vmul.f32 0.03125, %v11766_v63  ;;  %v11781_v46 = vpop.xlane.xlu0 %11780 }
 0xfd6   :  { %13577 = vrsqrt.f32 %v11825_v59  ;;  %v11815_v22 = vmul.f32 0.03125, %v11781_v46 }
 0xfd7   :  { %v11826_v3 = vadd.f32 1e-05, %v11810_v21 }
 0xfd8   :  { %v11831_v30 = vadd.f32 1e-05, %v11815_v22 }
 0xfd9   :  { %13579 = vrsqrt.f32 %v11826_v3  ;;  %v11784_v23 = vpop.xlane.xlu1 %11783  ;;  %v11775_v12 = vpop.xlane.xlu0 %11774 }
 0xfda   :  { %13581 = vrsqrt.f32 %v11831_v30  ;;  %v11816_v2 = vmul.f32 0.03125, %v11784_v23  ;;  %v11813_v18 = vmul.f32 0.03125, %v11775_v12 }
 0xfdc   :  { %v11832_v20 = vadd.f32 1e-05, %v11816_v2  ;;  %v11829_v4 = vadd.f32 1e-05, %v11813_v18 }
 0xfdd   :  { %v11778_v32 = vpop.xlane.xlu1 %11777 }
 0xfde   :  { %v13574_v17 = vpop.eup %13573  ;;  %13583 = vrsqrt.f32 %v11832_v20  ;;  %v11814_v13 = vmul.f32 0.03125, %v11778_v32 }
 0xfdf   :  { %v11859_v27 = vmul.f32 %v13574_v17, %v16280_v62  ;;  %v11793_v5 = vpop.xlane.xlu0 %11792  ;;  %13585 = vrsqrt.f32 %v11829_v4 }
 0xfe0   :  { %v11819_v43 = vmul.f32 0.03125, %v11793_v5  ;;  %v11830_v29 = vadd.f32 1e-05, %v11814_v13 }
 0xfe1   :  { %v11879_v40 = vmul.f32 %v16378_v42, %v11859_v27 }
 0xfe2   :  { %v13576_v19 = vpop.eup %13575  ;;  %v11835_v14 = vadd.f32 1e-05, %v11819_v43  ;;  %13587 = vrsqrt.f32 %v11830_v29 }
 0xfe3   :  { %v13578_v50 = vpop.eup %13577  ;;  %v11899_v11 = vadd.f32 %v16381_v52, %v11879_v40  ;;  %v11860_v9 = vmul.f32 %v13576_v19, %v16285_v38  ;;  %v11796_v1 = vpop.xlane.xlu1 %11795 }
 0xfe4   :  { %v11787_v28 = vpop.xlane.xlu0 %11786  ;;  %v11857_v62 = vmul.f32 %v13578_v50, %v16288_v35  ;;  %v11820_v51 = vmul.f32 0.03125, %v11796_v1  ;;  %13589 = vrsqrt.f32 %v11835_v14 }
 0xfe5   :  { %v11817_v56 = vmul.f32 0.03125, %v11787_v28  ;;  %11915 = vst.msk [vmem:[#allocation6 + $0x10] sm:$0xff] %vm87_vm0, %v11899_v11  ;;  %v11880_v7 = vmul.f32 %v16378_v42, %v11860_v9 }
 0xfe6   :  { %v13580_v60 = vpop.eup %13579  ;;  %v11877_v15 = vmul.f32 %v16378_v42, %v11857_v62  ;;  %v11836_v41 = vadd.f32 1e-05, %v11820_v51 }
 0xfe7   :  { %v11833_v25 = vadd.f32 1e-05, %v11817_v56  ;;  %v11900_v57 = vadd.f32 %v16381_v52, %v11880_v7  ;;  %v11858_v38 = vmul.f32 %v13580_v60, %v16296_v54  ;;  %v11790_v49 = vpop.xlane.xlu1 %11789  ;;  %v13582_v55 = vpop.eup %13581 }
 0xfe8   :  { %v11897_v35 = vadd.f32 %v16381_v52, %v11877_v15  ;;  %13591 = vrsqrt.f32 %v11836_v41  ;;  %v11818_v8 = vmul.f32 0.03125, %v11790_v49  ;;  %v11863_v26 = vmul.f32 %v13582_v55, %v16303_v45 }
 0xfe9   :  { %11916 = vst.msk [vmem:[#allocation6 + $0x18] sm:$0xff] %vm87_vm0, %v11900_v57  ;;  %v11878_v34 = vmul.f32 %v16378_v42, %v11858_v38  ;;  %13593 = vrsqrt.f32 %v11833_v25  ;;  %v11799_v24 = vpop.xlane.xlu0 %11798 }
 0xfea   :  { %11913 = vst.msk [vmem:[#allocation6] sm:$0xff] %vm87_vm0, %v11897_v35  ;;  %v11834_v61 = vadd.f32 1e-05, %v11818_v8  ;;  %v11821_v58 = vmul.f32 0.03125, %v11799_v24  ;;  %v11883_v59 = vmul.f32 %v16378_v42, %v11863_v26 }
 0xfeb   :  { %v11898_v54 = vadd.f32 %v16381_v52, %v11878_v34  ;;  %v13584_v21 = vpop.eup %13583 }
 0xfec   :  { %13595 = vrsqrt.f32 %v11834_v61  ;;  %v11837_v63 = vadd.f32 1e-05, %v11821_v58  ;;  %v13586_v22 = vpop.eup %13585  ;;  %v11903_v33 = vadd.f32 %v16381_v52, %v11883_v59  ;;  %v11864_v30 = vmul.f32 %v13584_v21, %v16309_v16 }
 0xfed   :  { %11914 = vst.msk [vmem:[#allocation6 + $0x8] sm:$0xff] %vm87_vm0, %v11898_v54  ;;  %v11802_v3 = vpop.xlane.xlu1 %11801  ;;  %v11805_v46 = vpop.xlane.xlu0 %11804  ;;  %v11861_v48 = vmul.f32 %v13586_v22, %v16312_v6 }
 0xfee   :  { %13597 = vrsqrt.f32 %v11837_v63  ;;  %v11822_v45 = vmul.f32 0.03125, %v11802_v3  ;;  %v11823_v23 = vmul.f32 0.03125, %v11805_v46  ;;  %11919 = vst.msk [vmem:[#allocation6 + $0x30] sm:$0xff] %vm87_vm0, %v11903_v33  ;;  %v11884_v12 = vmul.f32 %v16378_v42, %v11864_v30 }
 0xfef   :  { %v13588_v18 = vpop.eup %13587  ;;  %v11881_v17 = vmul.f32 %v16378_v42, %v11861_v48 }
 0xff0   :  { %v11838_v2 = vadd.f32 1e-05, %v11822_v45  ;;  %v11839_v20 = vadd.f32 1e-05, %v11823_v23  ;;  %v11904_v32 = vadd.f32 %v16381_v52, %v11884_v12  ;;  %v11862_v16 = vmul.f32 %v13588_v18, %v16320_v36 }
 0xff1   :  { %v11808_v4 = vpop.xlane.xlu1 %11807  ;;  %v13590_v27 = vpop.eup %13589  ;;  %v11901_v6 = vadd.f32 %v16381_v52, %v11881_v17 }
 0xff2   :  { %13599 = vrsqrt.f32 %v11838_v2  ;;  %v11824_v5 = vmul.f32 0.03125, %v11808_v4  ;;  %v11867_v13 = vmul.f32 %v13590_v27, %v16323_v53  ;;  %11920 = vst.msk [vmem:[#allocation6 + $0x38] sm:$0xff] %vm87_vm0, %v11904_v32  ;;  %v11882_v43 = vmul.f32 %v16378_v42, %v11862_v16 }
 0xff3   :  { %13601 = vrsqrt.f32 %v11839_v20  ;;  %11917 = vst.msk [vmem:[#allocation6 + $0x20] sm:$0xff] %vm87_vm0, %v11901_v6 }
 0xff4   :  { %v11840_v40 = vadd.f32 1e-05, %v11824_v5  ;;  %v11887_v29 = vmul.f32 %v16378_v42, %v11867_v13  ;;  %v11902_v36 = vadd.f32 %v16381_v52, %v11882_v43 }
 0xff5   :  { %v13592_v19 = vpop.eup %13591 }
 0xff6   :  { %v13594_v14 = vpop.eup %13593  ;;  %v11868_v50 = vmul.f32 %v13592_v19, %v16332_v10  ;;  %13603 = vrsqrt.f32 %v11840_v40  ;;  %v11907_v11 = vadd.f32 %v16381_v52, %v11887_v29  ;;  %11918 = vst.msk [vmem:[#allocation6 + $0x28] sm:$0xff] %vm87_vm0, %v11902_v36 }
 0xff7   :  { %v11865_v53 = vmul.f32 %v13594_v14, %v16335_v31 }
 0xff8   :  { %v11888_v9 = vmul.f32 %v16378_v42, %v11868_v50  ;;  %11923 = vst.msk [vmem:[#allocation6 + $0x50] sm:$0xff] %vm87_vm0, %v11907_v11 }
 0xff9   :  { %v13596_v1 = vpop.eup %13595  ;;  %v11885_v28 = vmul.f32 %v16378_v42, %v11865_v53 }
 0xffa   :  { %v11908_v62 = vadd.f32 %v16381_v52, %v11888_v9  ;;  %v11866_v51 = vmul.f32 %v13596_v1, %v16344_v47 }
 0xffb   :  { %v13598_v56 = vpop.eup %13597  ;;  %v11905_v10 = vadd.f32 %v16381_v52, %v11885_v28 }
 0xffc   :  { %11924 = vst.msk [vmem:[#allocation6 + $0x58] sm:$0xff] %vm87_vm0, %v11908_v62  ;;  %v11886_v31 = vmul.f32 %v16378_v42, %v11866_v51  ;;  %v11869_v7 = vmul.f32 %v13598_v56, %v16349_v44 }
 0xffd   :  { %11921 = vst.msk [vmem:[#allocation6 + $0x40] sm:$0xff] %vm87_vm0, %v11905_v10 }
 0xffe   :  { %v11906_v60 = vadd.f32 %v16381_v52, %v11886_v31  ;;  %v11889_v15 = vmul.f32 %v16378_v42, %v11869_v7 }
 0xfff   :  { %v13600_v41 = vpop.eup %13599 }
0x1000   :  { %v13602_v25 = vpop.eup %13601  ;;  %11922 = vst.msk [vmem:[#allocation6 + $0x48] sm:$0xff] %vm87_vm0, %v11906_v60  ;;  %v11909_v47 = vadd.f32 %v16381_v52, %v11889_v15  ;;  %v11870_v57 = vmul.f32 %v13600_v41, %v16357_v0 }
0x1001   :  { %v11871_v38 = vmul.f32 %v13602_v25, %v16360_v39 }
0x1002   :  { %11925 = vst.msk [vmem:[#allocation6 + $0x60] sm:$0xff] %vm87_vm0, %v11909_v47  ;;  %v11890_v44 = vmul.f32 %v16378_v42, %v11870_v57 }
0x1003   :  { %v13604_v49 = vpop.eup %13603  ;;  %v11891_v35 = vmul.f32 %v16378_v42, %v11871_v38 }
0x1004   :  { %v11910_v8 = vadd.f32 %v16381_v52, %v11890_v44  ;;  %v11872_v55 = vmul.f32 %v13604_v49, %v16368_v37 }
0x1005   :  { %v11911_v34 = vadd.f32 %v16381_v52, %v11891_v35 }
0x1006   :  { %11926 = vst.msk [vmem:[#allocation6 + $0x68] sm:$0xff] %vm87_vm0, %v11910_v8  ;;  %v11892_v0 = vmul.f32 %v16378_v42, %v11872_v55 }
0x1007   :  { %11927 = vst.msk [vmem:[#allocation6 + $0x70] sm:$0xff] %vm87_vm0, %v11911_v34 }
0x1008   :  { %v11912_v39 = vadd.f32 %v16381_v52, %v11892_v0 }
0x100a   :  { %11928 = vst.msk [vmem:[#allocation6 + $0x78] sm:$0xff] %vm87_vm0, %v11912_v39 }
0x100b   :  { %13654 = shalt.err (!%p13651_p9)
}
0x100c   :  { %11940 = dma.vmem_to_hbm [thread:$0]  %s11935_s20, 2048, %s16460_s7, [#allocation5], %s13668_s27, %s13668_s27, %s13669_s28  }
0x100d   :  { %13665 = dma.done.wait [#allocation5], 2048  }
0x100e   :  { %13666 = vsyncadd [#allocation5], 4294965248 }
0x100f   :  { %11944 = vsyncpa [#allocation4], 1 }
0x1010   :  { %11945 = vsyncpa [#allocation5], 1 }

</bundles_post_ra>
